<compile_context>
chip_gen: v7x
topology: tpu7x:2x2x1
jax: 0.10.0
libtpu: 0.0.40
codegen_flags: <defaults>
</compile_context>

<pallas_src>
import functools

import jax
import jax.numpy as jnp
from jax import lax
from jax.experimental import pallas as pl
from jax.experimental.pallas import tpu as pltpu


def _basic_block_kernel(xt_ref, w1_ref, s1_ref, b1_ref, w2_ref, s2_ref, b2_ref,
                        out_ref, y_scr, *, H, W, TH):
    # xt_ref : (1, 1, TH+4, W+2, C) bf16  overlapping row tile of the padded input
    #          (H padded by 2, W padded by 1)
    # w1_ref : (3, 3, C, P) bf16 ; w2_ref : (3, 3, P, P) bf16   (HWIO)
    # s*/b*  : (1, P) f32 folded BN scale / bias
    # out_ref: (1, P, TH*W) f32   (NCHW with H*W flattened -> lane-dense store)
    # y_scr  : VMEM (TH+2, W+2, P) bf16 intermediate activation (1-row halo, W-pad)
    t = pl.program_id(1)
    C = xt_ref.shape[-1]
    P = out_ref.shape[1]
    R = TH + 2                      # intermediate rows computed (incl. 1-row halo)

    # ---- conv1: 9 shifted (R*W, C) x (C, P) bf16 matmuls, f32 accumulator ------
    acc1 = jnp.zeros((R * W, P), jnp.float32)
    for kh in range(3):
        for kw in range(3):
            patch = xt_ref[0, 0, kh:kh + R, kw:kw + W, :].reshape(R * W, C)
            acc1 = acc1 + jnp.dot(patch, w1_ref[kh, kw],
                                  preferred_element_type=jnp.float32)

    # ---- bn1 (folded) + relu; zero halo rows that fall outside the image -------
    y = jnp.maximum(acc1 * s1_ref[0] + b1_ref[0], 0.0).reshape(R, W, P)
    row = t * TH - 1 + lax.broadcasted_iota(jnp.int32, (R, 1, 1), 0)
    y = jnp.where((row >= 0) & (row < H), y, 0.0)

    # ---- stage into bf16 VMEM scratch; only the W-border columns need zeros ----
    y_scr[:, 1:W + 1, :] = y.astype(y_scr.dtype)
    zcol = jnp.zeros((R, 1, P), y_scr.dtype)
    y_scr[:, 0:1, :] = zcol
    y_scr[:, W + 1:W + 2, :] = zcol

    # ---- conv2: 9 shifted (TH*W, P) x (P, P) bf16 matmuls -----------------------
    acc2 = jnp.zeros((TH * W, P), jnp.float32)
    for kh in range(3):
        for kw in range(3):
            patch = y_scr[kh:kh + TH, kw:kw + W, :].reshape(TH * W, P)
            acc2 = acc2 + jnp.dot(patch, w2_ref[kh, kw],
                                  preferred_element_type=jnp.float32)

    # ---- bn2 (folded) + residual (from the same input tile) + relu -------------
    res = xt_ref[0, 0, 2:TH + 2, 1:W + 1, :].astype(jnp.float32).reshape(TH * W, C)
    out = jnp.maximum(acc2 * s2_ref[0] + b2_ref[0] + res, 0.0)

    # lane-dense, transposed store: (P, TH*W) == NCHW layout with H*W flattened
    out_ref[0] = out.T.astype(out_ref.dtype)


def _vmem_bytes_estimate(TH, W, C, P):
    """Rough per-grid-step VMEM budget (double-buffered blocks + scratch + temps)."""
    Wp = W + 2
    bf16, f32 = 2, 4
    x_blk = (TH + 4) * Wp * C * bf16
    out_blk = P * TH * W * f32
    w_blk = 9 * C * P * bf16 + 9 * P * P * bf16 + 4 * P * f32
    scratch = (TH + 2) * Wp * P * bf16
    temps = (TH + 2) * W * P * f32 + 2 * TH * W * P * f32
    return 2 * (x_blk + out_blk + w_blk) + scratch + temps


def _choose_row_tile(H, W, C, P, budget_bytes=8 * 2 ** 20):
    """Largest row tile that divides H, keeps the output lane-aligned and fits budget."""
    candidates = [th for th in range(1, H + 1)
                  if H % th == 0 and ((th * W) % 128 == 0 or th == H)]
    within = [th for th in candidates
              if _vmem_bytes_estimate(th, W, C, P) <= budget_bytes]
    return max(within) if within else min(candidates)


def basic_block_pallas(x_nchw, params, *, row_tile=None):
    """Fused BasicBlock forward. Input/output NCHW (PyTorch convention)."""
    w1, gamma1, beta1, mean1, var1, w2, gamma2, beta2, mean2, var2 = params
    eps = 1e-5

    # Fold BN (inference) into per-channel scale/bias (kept in f32).
    s1 = gamma1 / jnp.sqrt(var1 + eps)
    b1 = beta1 - mean1 * s1
    s2 = gamma2 / jnp.sqrt(var2 + eps)
    b2 = beta2 - mean2 * s2

    N, C, H, W = x_nchw.shape
    P = w1.shape[0]                        # planes (OIHW: out channels first)
    assert C == P, "BasicBlock with downsample=None requires inplanes == planes"

    if row_tile is None:
        row_tile = _choose_row_tile(H, W, C, P)
    TH = int(row_tile)
    assert H % TH == 0, "row_tile must divide H"
    n_tiles = H // TH
    assert (TH * W) % 128 == 0 or n_tiles == 1, "output row tile must be lane-aligned"

    Wp = W + 2

    # NCHW -> NHWC (channels on lanes), bf16, pad H by 2 and W by 1.
    x_nhwc = jnp.transpose(x_nchw, (0, 2, 3, 1)).astype(jnp.bfloat16)
    xpad2 = jnp.pad(x_nhwc, ((0, 0), (2, 2), (1, 1), (0, 0)))
    # Overlapping row tiles (4-row halo) so conv1+conv2 stay fused per tile.
    x_tiles = jnp.stack(
        [xpad2[:, t * TH: t * TH + TH + 4] for t in range(n_tiles)], axis=1)
    # x_tiles: (N, n_tiles, TH+4, W+2, C)

    # OIHW -> HWIO, bf16 for the MXU.
    w1_hwio = jnp.transpose(w1, (2, 3, 1, 0)).astype(jnp.bfloat16)
    w2_hwio = jnp.transpose(w2, (2, 3, 1, 0)).astype(jnp.bfloat16)

    s1_2d, b1_2d = s1.reshape(1, P), b1.reshape(1, P)
    s2_2d, b2_2d = s2.reshape(1, P), b2.reshape(1, P)

    est = _vmem_bytes_estimate(TH, W, C, P)
    vmem_limit = int(min(max(4 * est, 16 * 2 ** 20), 48 * 2 ** 20))

    kernel = functools.partial(_basic_block_kernel, H=H, W=W, TH=TH)

    out_flat = pl.pallas_call(
        kernel,
        out_shape=jax.ShapeDtypeStruct((N, P, H * W), x_nchw.dtype),
        grid_spec=pltpu.PrefetchScalarGridSpec(
            num_scalar_prefetch=0,
            grid=(N, n_tiles),
            in_specs=[
                pl.BlockSpec((1, 1, TH + 4, Wp, C), lambda n, t: (n, t, 0, 0, 0)),
                pl.BlockSpec((3, 3, C, P), lambda n, t: (0, 0, 0, 0)),   # w1
                pl.BlockSpec((1, P), lambda n, t: (0, 0)),               # s1
                pl.BlockSpec((1, P), lambda n, t: (0, 0)),               # b1
                pl.BlockSpec((3, 3, P, P), lambda n, t: (0, 0, 0, 0)),   # w2
                pl.BlockSpec((1, P), lambda n, t: (0, 0)),               # s2
                pl.BlockSpec((1, P), lambda n, t: (0, 0)),               # b2
            ],
            out_specs=pl.BlockSpec((1, P, TH * W), lambda n, t: (n, 0, t)),
            scratch_shapes=[pltpu.VMEM((TH + 2, Wp, P), jnp.bfloat16)],
        ),
        compiler_params=pltpu.CompilerParams(
            dimension_semantics=("parallel", "parallel"),
            vmem_limit_bytes=vmem_limit),
    )(x_tiles, w1_hwio, s1_2d, b1_2d, w2_hwio, s2_2d, b2_2d)

    # (N, P, H*W) -> (N, P, H, W): contiguous reshape, no transpose needed.
    return out_flat.reshape(N, P, H, W)


def basic_block_reference(x_nchw, params):
    """Pure-JAX reference (lax conv, f32), same math as the module."""
    w1, gamma1, beta1, mean1, var1, w2, gamma2, beta2, mean2, var2 = params
    eps = 1e-5

    def conv(x, w):  # NCHW, OIHW
        return lax.conv_general_dilated(
            x, w, window_strides=(1, 1), padding=((1, 1), (1, 1)),
            dimension_numbers=("NCHW", "OIHW", "NCHW"))

    def bn(x, g, b, m, v):
        return (x - m[None, :, None, None]) / jnp.sqrt(v + eps)[None, :, None, None] \
               * g[None, :, None, None] + b[None, :, None, None]

    out = jax.nn.relu(bn(conv(x_nchw, w1), gamma1, beta1, mean1, var1))
    out = bn(conv(out, w2), gamma2, beta2, mean2, var2)
    return jax.nn.relu(out + x_nchw)


def make_params(key, inplanes, planes):
    ks = jax.random.split(key, 6)
    w1 = jax.random.normal(ks[0], (planes, inplanes, 3, 3), jnp.float32) * 0.1
    w2 = jax.random.normal(ks[1], (planes, planes, 3, 3), jnp.float32) * 0.1
    gamma1 = 1.0 + 0.1 * jax.random.normal(ks[2], (planes,), jnp.float32)
    beta1 = 0.1 * jax.random.normal(ks[3], (planes,), jnp.float32)
    mean1 = 0.05 * jax.random.normal(ks[4], (planes,), jnp.float32)
    var1 = 1.0 + 0.1 * jnp.abs(jax.random.normal(ks[5], (planes,), jnp.float32))
    gamma2 = jnp.flip(gamma1)
    beta2 = -beta1
    mean2 = jnp.flip(mean1)
    var2 = jnp.flip(var1)
    return (w1, gamma1, beta1, mean1, var1, w2, gamma2, beta2, mean2, var2)


if __name__ == "__main__":
    N, C, H, W = 2, 4, 16, 16          # inplanes == planes == 4, stride=1
    key = jax.random.PRNGKey(0)
    kx, kp = jax.random.split(key)
    x = jax.random.normal(kx, (N, C, H, W), jnp.float32)
    params = make_params(kp, C, C)

    # row_tile=8 -> 2 row tiles per image, exercising the halo / masking path.
    out = basic_block_pallas(x, params, row_tile=8)
    out = jax.block_until_ready(out)

    ref = basic_block_reference(x, params)
    ref = jax.block_until_ready(ref)

    assert out.shape == (N, C, H, W)
    import numpy as np
    # bf16 matmul path -> looser tolerance than the pure-f32 version.
    np.testing.assert_allclose(np.asarray(out), np.asarray(ref),
                               rtol=5e-2, atol=5e-2)
    print("KERNEL_OK")
</pallas_src>

<mosaic_0001>
module attributes {stable_mosaic.version = 11 : i64} {
  func.func @_basic_block_kernel(%arg0: i32, %arg1: i32, %arg2: memref<1x1x12x18x4xbf16, #tpu.memory_space<vmem>>, %arg3: memref<3x3x4x4xbf16, #tpu.memory_space<vmem>>, %arg4: memref<1x4xf32, #tpu.memory_space<vmem>>, %arg5: memref<1x4xf32, #tpu.memory_space<vmem>>, %arg6: memref<3x3x4x4xbf16, #tpu.memory_space<vmem>>, %arg7: memref<1x4xf32, #tpu.memory_space<vmem>>, %arg8: memref<1x4xf32, #tpu.memory_space<vmem>>, %arg9: memref<1x4x128xf32, #tpu.memory_space<vmem>>, %arg10: memref<10x18x4xbf16, #tpu.memory_space<vmem>>) attributes {dimension_semantics = [#tpu.dimension_semantics<parallel>, #tpu.dimension_semantics<parallel>], iteration_bounds = array<i64: 2, 2>, scalar_prefetch = 0 : i64, scratch_operands = 1 : i64, tpu.core_type = #tpu.core_type<tc>, window_params = [{transform_indices = @transform_0, window_bounds = array<i64: 1, 1, 12, 18, 4>}, {pipeline_mode = #tpu.pipeline_mode<synchronous>, transform_indices = @transform_1, window_bounds = array<i64: 3, 3, 4, 4>}, {pipeline_mode = #tpu.pipeline_mode<synchronous>, transform_indices = @transform_2, window_bounds = array<i64: 1, 4>}, {pipeline_mode = #tpu.pipeline_mode<synchronous>, transform_indices = @transform_3, window_bounds = array<i64: 1, 4>}, {pipeline_mode = #tpu.pipeline_mode<synchronous>, transform_indices = @transform_4, window_bounds = array<i64: 3, 3, 4, 4>}, {pipeline_mode = #tpu.pipeline_mode<synchronous>, transform_indices = @transform_5, window_bounds = array<i64: 1, 4>}, {pipeline_mode = #tpu.pipeline_mode<synchronous>, transform_indices = @transform_6, window_bounds = array<i64: 1, 4>}, {transform_indices = @transform_7, window_bounds = array<i64: 1, 4, 128>}]} {
    %cst = arith.constant 0.000000e+00 : f32
    %0 = vector.broadcast %cst : f32 to vector<160x4xf32>
    %c0 = arith.constant 0 : index
    %c0_0 = arith.constant 0 : index
    %c0_1 = arith.constant 0 : index
    %c0_2 = arith.constant 0 : index
    %c0_3 = arith.constant 0 : index
    %1 = vector.load %arg2[%c0, %c0_0, %c0_1, %c0_2, %c0_3] : memref<1x1x12x18x4xbf16, #tpu.memory_space<vmem>>, vector<1x1x10x16x4xbf16>
    %2 = vector.shape_cast %1 : vector<1x1x10x16x4xbf16> to vector<10x16x4xbf16>
    %3 = vector.shape_cast %2 : vector<10x16x4xbf16> to vector<160x4xbf16>
    %c0_4 = arith.constant 0 : index
    %c0_5 = arith.constant 0 : index
    %c0_6 = arith.constant 0 : index
    %c0_7 = arith.constant 0 : index
    %4 = vector.load %arg3[%c0_4, %c0_5, %c0_6, %c0_7] : memref<3x3x4x4xbf16, #tpu.memory_space<vmem>>, vector<1x1x4x4xbf16>
    %5 = vector.shape_cast %4 : vector<1x1x4x4xbf16> to vector<4x4xbf16>
    %cst_8 = arith.constant dense<0.000000e+00> : vector<160x4xf32>
    %6 = tpu.matmul %3, %5, %cst_8 {dimension_numbers = #tpu.dot_dimension_numbers<[1], [0], [0], [1], [0, 0, 1, 1], [], []>} : vector<160x4xbf16>, vector<4x4xbf16>, vector<160x4xf32> -> vector<160x4xf32>
    %7 = arith.addf %0, %6 : vector<160x4xf32>
    %c0_9 = arith.constant 0 : index
    %c0_10 = arith.constant 0 : index
    %c0_11 = arith.constant 0 : index
    %c1 = arith.constant 1 : index
    %c0_12 = arith.constant 0 : index
    %8 = vector.load %arg2[%c0_9, %c0_10, %c0_11, %c1, %c0_12] : memref<1x1x12x18x4xbf16, #tpu.memory_space<vmem>>, vector<1x1x10x16x4xbf16>
    %9 = vector.shape_cast %8 : vector<1x1x10x16x4xbf16> to vector<10x16x4xbf16>
    %10 = vector.shape_cast %9 : vector<10x16x4xbf16> to vector<160x4xbf16>
    %c0_13 = arith.constant 0 : index
    %c1_14 = arith.constant 1 : index
    %c0_15 = arith.constant 0 : index
    %c0_16 = arith.constant 0 : index
    %11 = vector.load %arg3[%c0_13, %c1_14, %c0_15, %c0_16] : memref<3x3x4x4xbf16, #tpu.memory_space<vmem>>, vector<1x1x4x4xbf16>
    %12 = vector.shape_cast %11 : vector<1x1x4x4xbf16> to vector<4x4xbf16>
    %cst_17 = arith.constant dense<0.000000e+00> : vector<160x4xf32>
    %13 = tpu.matmul %10, %12, %cst_17 {dimension_numbers = #tpu.dot_dimension_numbers<[1], [0], [0], [1], [0, 0, 1, 1], [], []>} : vector<160x4xbf16>, vector<4x4xbf16>, vector<160x4xf32> -> vector<160x4xf32>
    %14 = arith.addf %7, %13 : vector<160x4xf32>
    %c0_18 = arith.constant 0 : index
    %c0_19 = arith.constant 0 : index
    %c0_20 = arith.constant 0 : index
    %c2 = arith.constant 2 : index
    %c0_21 = arith.constant 0 : index
    %15 = vector.load %arg2[%c0_18, %c0_19, %c0_20, %c2, %c0_21] : memref<1x1x12x18x4xbf16, #tpu.memory_space<vmem>>, vector<1x1x10x16x4xbf16>
    %16 = vector.shape_cast %15 : vector<1x1x10x16x4xbf16> to vector<10x16x4xbf16>
    %17 = vector.shape_cast %16 : vector<10x16x4xbf16> to vector<160x4xbf16>
    %c0_22 = arith.constant 0 : index
    %c2_23 = arith.constant 2 : index
    %c0_24 = arith.constant 0 : index
    %c0_25 = arith.constant 0 : index
    %18 = vector.load %arg3[%c0_22, %c2_23, %c0_24, %c0_25] : memref<3x3x4x4xbf16, #tpu.memory_space<vmem>>, vector<1x1x4x4xbf16>
    %19 = vector.shape_cast %18 : vector<1x1x4x4xbf16> to vector<4x4xbf16>
    %cst_26 = arith.constant dense<0.000000e+00> : vector<160x4xf32>
    %20 = tpu.matmul %17, %19, %cst_26 {dimension_numbers = #tpu.dot_dimension_numbers<[1], [0], [0], [1], [0, 0, 1, 1], [], []>} : vector<160x4xbf16>, vector<4x4xbf16>, vector<160x4xf32> -> vector<160x4xf32>
    %21 = arith.addf %14, %20 : vector<160x4xf32>
    %c0_27 = arith.constant 0 : index
    %c0_28 = arith.constant 0 : index
    %c1_29 = arith.constant 1 : index
    %c0_30 = arith.constant 0 : index
    %c0_31 = arith.constant 0 : index
    %22 = vector.load %arg2[%c0_27, %c0_28, %c1_29, %c0_30, %c0_31] : memref<1x1x12x18x4xbf16, #tpu.memory_space<vmem>>, vector<1x1x10x16x4xbf16>
    %23 = vector.shape_cast %22 : vector<1x1x10x16x4xbf16> to vector<10x16x4xbf16>
    %24 = vector.shape_cast %23 : vector<10x16x4xbf16> to vector<160x4xbf16>
    %c1_32 = arith.constant 1 : index
    %c0_33 = arith.constant 0 : index
    %c0_34 = arith.constant 0 : index
    %c0_35 = arith.constant 0 : index
    %25 = vector.load %arg3[%c1_32, %c0_33, %c0_34, %c0_35] : memref<3x3x4x4xbf16, #tpu.memory_space<vmem>>, vector<1x1x4x4xbf16>
    %26 = vector.shape_cast %25 : vector<1x1x4x4xbf16> to vector<4x4xbf16>
    %cst_36 = arith.constant dense<0.000000e+00> : vector<160x4xf32>
    %27 = tpu.matmul %24, %26, %cst_36 {dimension_numbers = #tpu.dot_dimension_numbers<[1], [0], [0], [1], [0, 0, 1, 1], [], []>} : vector<160x4xbf16>, vector<4x4xbf16>, vector<160x4xf32> -> vector<160x4xf32>
    %28 = arith.addf %21, %27 : vector<160x4xf32>
    %c0_37 = arith.constant 0 : index
    %c0_38 = arith.constant 0 : index
    %c1_39 = arith.constant 1 : index
    %c1_40 = arith.constant 1 : index
    %c0_41 = arith.constant 0 : index
    %29 = vector.load %arg2[%c0_37, %c0_38, %c1_39, %c1_40, %c0_41] : memref<1x1x12x18x4xbf16, #tpu.memory_space<vmem>>, vector<1x1x10x16x4xbf16>
    %30 = vector.shape_cast %29 : vector<1x1x10x16x4xbf16> to vector<10x16x4xbf16>
    %31 = vector.shape_cast %30 : vector<10x16x4xbf16> to vector<160x4xbf16>
    %c1_42 = arith.constant 1 : index
    %c1_43 = arith.constant 1 : index
    %c0_44 = arith.constant 0 : index
    %c0_45 = arith.constant 0 : index
    %32 = vector.load %arg3[%c1_42, %c1_43, %c0_44, %c0_45] : memref<3x3x4x4xbf16, #tpu.memory_space<vmem>>, vector<1x1x4x4xbf16>
    %33 = vector.shape_cast %32 : vector<1x1x4x4xbf16> to vector<4x4xbf16>
    %cst_46 = arith.constant dense<0.000000e+00> : vector<160x4xf32>
    %34 = tpu.matmul %31, %33, %cst_46 {dimension_numbers = #tpu.dot_dimension_numbers<[1], [0], [0], [1], [0, 0, 1, 1], [], []>} : vector<160x4xbf16>, vector<4x4xbf16>, vector<160x4xf32> -> vector<160x4xf32>
    %35 = arith.addf %28, %34 : vector<160x4xf32>
    %c0_47 = arith.constant 0 : index
    %c0_48 = arith.constant 0 : index
    %c1_49 = arith.constant 1 : index
    %c2_50 = arith.constant 2 : index
    %c0_51 = arith.constant 0 : index
    %36 = vector.load %arg2[%c0_47, %c0_48, %c1_49, %c2_50, %c0_51] : memref<1x1x12x18x4xbf16, #tpu.memory_space<vmem>>, vector<1x1x10x16x4xbf16>
    %37 = vector.shape_cast %36 : vector<1x1x10x16x4xbf16> to vector<10x16x4xbf16>
    %38 = vector.shape_cast %37 : vector<10x16x4xbf16> to vector<160x4xbf16>
    %c1_52 = arith.constant 1 : index
    %c2_53 = arith.constant 2 : index
    %c0_54 = arith.constant 0 : index
    %c0_55 = arith.constant 0 : index
    %39 = vector.load %arg3[%c1_52, %c2_53, %c0_54, %c0_55] : memref<3x3x4x4xbf16, #tpu.memory_space<vmem>>, vector<1x1x4x4xbf16>
    %40 = vector.shape_cast %39 : vector<1x1x4x4xbf16> to vector<4x4xbf16>
    %cst_56 = arith.constant dense<0.000000e+00> : vector<160x4xf32>
    %41 = tpu.matmul %38, %40, %cst_56 {dimension_numbers = #tpu.dot_dimension_numbers<[1], [0], [0], [1], [0, 0, 1, 1], [], []>} : vector<160x4xbf16>, vector<4x4xbf16>, vector<160x4xf32> -> vector<160x4xf32>
    %42 = arith.addf %35, %41 : vector<160x4xf32>
    %c0_57 = arith.constant 0 : index
    %c0_58 = arith.constant 0 : index
    %c2_59 = arith.constant 2 : index
    %c0_60 = arith.constant 0 : index
    %c0_61 = arith.constant 0 : index
    %43 = vector.load %arg2[%c0_57, %c0_58, %c2_59, %c0_60, %c0_61] : memref<1x1x12x18x4xbf16, #tpu.memory_space<vmem>>, vector<1x1x10x16x4xbf16>
    %44 = vector.shape_cast %43 : vector<1x1x10x16x4xbf16> to vector<10x16x4xbf16>
    %45 = vector.shape_cast %44 : vector<10x16x4xbf16> to vector<160x4xbf16>
    %c2_62 = arith.constant 2 : index
    %c0_63 = arith.constant 0 : index
    %c0_64 = arith.constant 0 : index
    %c0_65 = arith.constant 0 : index
    %46 = vector.load %arg3[%c2_62, %c0_63, %c0_64, %c0_65] : memref<3x3x4x4xbf16, #tpu.memory_space<vmem>>, vector<1x1x4x4xbf16>
    %47 = vector.shape_cast %46 : vector<1x1x4x4xbf16> to vector<4x4xbf16>
    %cst_66 = arith.constant dense<0.000000e+00> : vector<160x4xf32>
    %48 = tpu.matmul %45, %47, %cst_66 {dimension_numbers = #tpu.dot_dimension_numbers<[1], [0], [0], [1], [0, 0, 1, 1], [], []>} : vector<160x4xbf16>, vector<4x4xbf16>, vector<160x4xf32> -> vector<160x4xf32>
    %49 = arith.addf %42, %48 : vector<160x4xf32>
    %c0_67 = arith.constant 0 : index
    %c0_68 = arith.constant 0 : index
    %c2_69 = arith.constant 2 : index
    %c1_70 = arith.constant 1 : index
    %c0_71 = arith.constant 0 : index
    %50 = vector.load %arg2[%c0_67, %c0_68, %c2_69, %c1_70, %c0_71] : memref<1x1x12x18x4xbf16, #tpu.memory_space<vmem>>, vector<1x1x10x16x4xbf16>
    %51 = vector.shape_cast %50 : vector<1x1x10x16x4xbf16> to vector<10x16x4xbf16>
    %52 = vector.shape_cast %51 : vector<10x16x4xbf16> to vector<160x4xbf16>
    %c2_72 = arith.constant 2 : index
    %c1_73 = arith.constant 1 : index
    %c0_74 = arith.constant 0 : index
    %c0_75 = arith.constant 0 : index
    %53 = vector.load %arg3[%c2_72, %c1_73, %c0_74, %c0_75] : memref<3x3x4x4xbf16, #tpu.memory_space<vmem>>, vector<1x1x4x4xbf16>
    %54 = vector.shape_cast %53 : vector<1x1x4x4xbf16> to vector<4x4xbf16>
    %cst_76 = arith.constant dense<0.000000e+00> : vector<160x4xf32>
    %55 = tpu.matmul %52, %54, %cst_76 {dimension_numbers = #tpu.dot_dimension_numbers<[1], [0], [0], [1], [0, 0, 1, 1], [], []>} : vector<160x4xbf16>, vector<4x4xbf16>, vector<160x4xf32> -> vector<160x4xf32>
    %56 = arith.addf %49, %55 : vector<160x4xf32>
    %c0_77 = arith.constant 0 : index
    %c0_78 = arith.constant 0 : index
    %c2_79 = arith.constant 2 : index
    %c2_80 = arith.constant 2 : index
    %c0_81 = arith.constant 0 : index
    %57 = vector.load %arg2[%c0_77, %c0_78, %c2_79, %c2_80, %c0_81] : memref<1x1x12x18x4xbf16, #tpu.memory_space<vmem>>, vector<1x1x10x16x4xbf16>
    %58 = vector.shape_cast %57 : vector<1x1x10x16x4xbf16> to vector<10x16x4xbf16>
    %59 = vector.shape_cast %58 : vector<10x16x4xbf16> to vector<160x4xbf16>
    %c2_82 = arith.constant 2 : index
    %c2_83 = arith.constant 2 : index
    %c0_84 = arith.constant 0 : index
    %c0_85 = arith.constant 0 : index
    %60 = vector.load %arg3[%c2_82, %c2_83, %c0_84, %c0_85] : memref<3x3x4x4xbf16, #tpu.memory_space<vmem>>, vector<1x1x4x4xbf16>
    %61 = vector.shape_cast %60 : vector<1x1x4x4xbf16> to vector<4x4xbf16>
    %cst_86 = arith.constant dense<0.000000e+00> : vector<160x4xf32>
    %62 = tpu.matmul %59, %61, %cst_86 {dimension_numbers = #tpu.dot_dimension_numbers<[1], [0], [0], [1], [0, 0, 1, 1], [], []>} : vector<160x4xbf16>, vector<4x4xbf16>, vector<160x4xf32> -> vector<160x4xf32>
    %63 = arith.addf %56, %62 : vector<160x4xf32>
    %c0_87 = arith.constant 0 : index
    %c0_88 = arith.constant 0 : index
    %64 = vector.load %arg4[%c0_87, %c0_88] : memref<1x4xf32, #tpu.memory_space<vmem>>, vector<1x4xf32>
    %65 = vector.shape_cast %64 : vector<1x4xf32> to vector<4xf32>
    %66 = vector.shape_cast %65 : vector<4xf32> to vector<1x4xf32>
    %67 = vector.broadcast %66 : vector<1x4xf32> to vector<160x4xf32>
    %68 = arith.mulf %63, %67 : vector<160x4xf32>
    %c0_89 = arith.constant 0 : index
    %c0_90 = arith.constant 0 : index
    %69 = vector.load %arg5[%c0_89, %c0_90] : memref<1x4xf32, #tpu.memory_space<vmem>>, vector<1x4xf32>
    %70 = vector.shape_cast %69 : vector<1x4xf32> to vector<4xf32>
    %71 = vector.shape_cast %70 : vector<4xf32> to vector<1x4xf32>
    %72 = vector.broadcast %71 : vector<1x4xf32> to vector<160x4xf32>
    %73 = arith.addf %68, %72 : vector<160x4xf32>
    %cst_91 = arith.constant 0.000000e+00 : f32
    %74 = vector.broadcast %cst_91 : f32 to vector<160x4xf32>
    %75 = arith.maximumf %73, %74 : vector<160x4xf32>
    %76 = vector.shape_cast %75 : vector<160x4xf32> to vector<10x16x4xf32>
    %c8_i32 = arith.constant 8 : i32
    %77 = arith.muli %arg1, %c8_i32 : i32
    %c1_i32 = arith.constant 1 : i32
    %78 = arith.subi %77, %c1_i32 : i32
    %79 = tpu.iota {dimensions = array<i32: 0>} : vector<10x1x1xi32>
    %80 = vector.broadcast %78 : i32 to vector<10x1x1xi32>
    %81 = arith.addi %80, %79 : vector<10x1x1xi32>
    %c0_i32 = arith.constant 0 : i32
    %82 = vector.broadcast %c0_i32 : i32 to vector<10x1x1xi32>
    %83 = arith.cmpi sge, %81, %82 : vector<10x1x1xi32>
    %c16_i32 = arith.constant 16 : i32
    %84 = vector.broadcast %c16_i32 : i32 to vector<10x1x1xi32>
    %85 = arith.cmpi slt, %81, %84 : vector<10x1x1xi32>
    %86 = arith.andi %83, %85 : vector<10x1x1xi1>
    %cst_92 = arith.constant 0.000000e+00 : f32
    %87 = vector.shape_cast %86 : vector<10x1x1xi1> to vector<10x1x1xi1>
    %88 = vector.broadcast %87 : vector<10x1x1xi1> to vector<10x16x4xi1>
    %89 = vector.broadcast %cst_92 : f32 to vector<10x16x4xf32>
    %90 = arith.select %88, %76, %89 : vector<10x16x4xi1>, vector<10x16x4xf32>
    %91 = arith.truncf %90 : vector<10x16x4xf32> to vector<10x16x4xbf16>
    %c0_93 = arith.constant 0 : index
    %c1_94 = arith.constant 1 : index
    %c0_95 = arith.constant 0 : index
    %92 = vector.load %arg10[%c0_93, %c1_94, %c0_95] : memref<10x18x4xbf16, #tpu.memory_space<vmem>>, vector<10x16x4xbf16>
    tpu.vector_store %arg10[%c0_93, %c1_94, %c0_95], %91 {strides = array<i32>} : memref<10x18x4xbf16, #tpu.memory_space<vmem>>, vector<10x16x4xbf16>,
    %cst_96 = arith.constant 0.000000e+00 : bf16
    %93 = vector.broadcast %cst_96 : bf16 to vector<10x1x4xbf16>
    %c0_97 = arith.constant 0 : index
    %c0_98 = arith.constant 0 : index
    %c0_99 = arith.constant 0 : index
    %94 = vector.load %arg10[%c0_97, %c0_98, %c0_99] : memref<10x18x4xbf16, #tpu.memory_space<vmem>>, vector<10x1x4xbf16>
    tpu.vector_store %arg10[%c0_97, %c0_98, %c0_99], %93 {strides = array<i32>} : memref<10x18x4xbf16, #tpu.memory_space<vmem>>, vector<10x1x4xbf16>,
    %c0_100 = arith.constant 0 : index
    %c17 = arith.constant 17 : index
    %c0_101 = arith.constant 0 : index
    %95 = vector.load %arg10[%c0_100, %c17, %c0_101] : memref<10x18x4xbf16, #tpu.memory_space<vmem>>, vector<10x1x4xbf16>
    tpu.vector_store %arg10[%c0_100, %c17, %c0_101], %93 {strides = array<i32>} : memref<10x18x4xbf16, #tpu.memory_space<vmem>>, vector<10x1x4xbf16>,
    %cst_102 = arith.constant 0.000000e+00 : f32
    %96 = vector.broadcast %cst_102 : f32 to vector<128x4xf32>
    %c0_103 = arith.constant 0 : index
    %c0_104 = arith.constant 0 : index
    %c0_105 = arith.constant 0 : index
    %97 = vector.load %arg10[%c0_103, %c0_104, %c0_105] : memref<10x18x4xbf16, #tpu.memory_space<vmem>>, vector<8x16x4xbf16>
    %98 = vector.shape_cast %97 : vector<8x16x4xbf16> to vector<128x4xbf16>
    %c0_106 = arith.constant 0 : index
    %c0_107 = arith.constant 0 : index
    %c0_108 = arith.constant 0 : index
    %c0_109 = arith.constant 0 : index
    %99 = vector.load %arg6[%c0_106, %c0_107, %c0_108, %c0_109] : memref<3x3x4x4xbf16, #tpu.memory_space<vmem>>, vector<1x1x4x4xbf16>
    %100 = vector.shape_cast %99 : vector<1x1x4x4xbf16> to vector<4x4xbf16>
    %cst_110 = arith.constant dense<0.000000e+00> : vector<128x4xf32>
    %101 = tpu.matmul %98, %100, %cst_110 {dimension_numbers = #tpu.dot_dimension_numbers<[1], [0], [0], [1], [0, 0, 1, 1], [], []>} : vector<128x4xbf16>, vector<4x4xbf16>, vector<128x4xf32> -> vector<128x4xf32>
    %102 = arith.addf %96, %101 : vector<128x4xf32>
    %c0_111 = arith.constant 0 : index
    %c1_112 = arith.constant 1 : index
    %c0_113 = arith.constant 0 : index
    %103 = vector.load %arg10[%c0_111, %c1_112, %c0_113] : memref<10x18x4xbf16, #tpu.memory_space<vmem>>, vector<8x16x4xbf16>
    %104 = vector.shape_cast %103 : vector<8x16x4xbf16> to vector<128x4xbf16>
    %c0_114 = arith.constant 0 : index
    %c1_115 = arith.constant 1 : index
    %c0_116 = arith.constant 0 : index
    %c0_117 = arith.constant 0 : index
    %105 = vector.load %arg6[%c0_114, %c1_115, %c0_116, %c0_117] : memref<3x3x4x4xbf16, #tpu.memory_space<vmem>>, vector<1x1x4x4xbf16>
    %106 = vector.shape_cast %105 : vector<1x1x4x4xbf16> to vector<4x4xbf16>
    %cst_118 = arith.constant dense<0.000000e+00> : vector<128x4xf32>
    %107 = tpu.matmul %104, %106, %cst_118 {dimension_numbers = #tpu.dot_dimension_numbers<[1], [0], [0], [1], [0, 0, 1, 1], [], []>} : vector<128x4xbf16>, vector<4x4xbf16>, vector<128x4xf32> -> vector<128x4xf32>
    %108 = arith.addf %102, %107 : vector<128x4xf32>
    %c0_119 = arith.constant 0 : index
    %c2_120 = arith.constant 2 : index
    %c0_121 = arith.constant 0 : index
    %109 = vector.load %arg10[%c0_119, %c2_120, %c0_121] : memref<10x18x4xbf16, #tpu.memory_space<vmem>>, vector<8x16x4xbf16>
    %110 = vector.shape_cast %109 : vector<8x16x4xbf16> to vector<128x4xbf16>
    %c0_122 = arith.constant 0 : index
    %c2_123 = arith.constant 2 : index
    %c0_124 = arith.constant 0 : index
    %c0_125 = arith.constant 0 : index
    %111 = vector.load %arg6[%c0_122, %c2_123, %c0_124, %c0_125] : memref<3x3x4x4xbf16, #tpu.memory_space<vmem>>, vector<1x1x4x4xbf16>
    %112 = vector.shape_cast %111 : vector<1x1x4x4xbf16> to vector<4x4xbf16>
    %cst_126 = arith.constant dense<0.000000e+00> : vector<128x4xf32>
    %113 = tpu.matmul %110, %112, %cst_126 {dimension_numbers = #tpu.dot_dimension_numbers<[1], [0], [0], [1], [0, 0, 1, 1], [], []>} : vector<128x4xbf16>, vector<4x4xbf16>, vector<128x4xf32> -> vector<128x4xf32>
    %114 = arith.addf %108, %113 : vector<128x4xf32>
    %c1_127 = arith.constant 1 : index
    %c0_128 = arith.constant 0 : index
    %c0_129 = arith.constant 0 : index
    %115 = vector.load %arg10[%c1_127, %c0_128, %c0_129] : memref<10x18x4xbf16, #tpu.memory_space<vmem>>, vector<8x16x4xbf16>
    %116 = vector.shape_cast %115 : vector<8x16x4xbf16> to vector<128x4xbf16>
    %c1_130 = arith.constant 1 : index
    %c0_131 = arith.constant 0 : index
    %c0_132 = arith.constant 0 : index
    %c0_133 = arith.constant 0 : index
    %117 = vector.load %arg6[%c1_130, %c0_131, %c0_132, %c0_133] : memref<3x3x4x4xbf16, #tpu.memory_space<vmem>>, vector<1x1x4x4xbf16>
    %118 = vector.shape_cast %117 : vector<1x1x4x4xbf16> to vector<4x4xbf16>
    %cst_134 = arith.constant dense<0.000000e+00> : vector<128x4xf32>
    %119 = tpu.matmul %116, %118, %cst_134 {dimension_numbers = #tpu.dot_dimension_numbers<[1], [0], [0], [1], [0, 0, 1, 1], [], []>} : vector<128x4xbf16>, vector<4x4xbf16>, vector<128x4xf32> -> vector<128x4xf32>
    %120 = arith.addf %114, %119 : vector<128x4xf32>
    %c1_135 = arith.constant 1 : index
    %c1_136 = arith.constant 1 : index
    %c0_137 = arith.constant 0 : index
    %121 = vector.load %arg10[%c1_135, %c1_136, %c0_137] : memref<10x18x4xbf16, #tpu.memory_space<vmem>>, vector<8x16x4xbf16>
    %122 = vector.shape_cast %121 : vector<8x16x4xbf16> to vector<128x4xbf16>
    %c1_138 = arith.constant 1 : index
    %c1_139 = arith.constant 1 : index
    %c0_140 = arith.constant 0 : index
    %c0_141 = arith.constant 0 : index
    %123 = vector.load %arg6[%c1_138, %c1_139, %c0_140, %c0_141] : memref<3x3x4x4xbf16, #tpu.memory_space<vmem>>, vector<1x1x4x4xbf16>
    %124 = vector.shape_cast %123 : vector<1x1x4x4xbf16> to vector<4x4xbf16>
    %cst_142 = arith.constant dense<0.000000e+00> : vector<128x4xf32>
    %125 = tpu.matmul %122, %124, %cst_142 {dimension_numbers = #tpu.dot_dimension_numbers<[1], [0], [0], [1], [0, 0, 1, 1], [], []>} : vector<128x4xbf16>, vector<4x4xbf16>, vector<128x4xf32> -> vector<128x4xf32>
    %126 = arith.addf %120, %125 : vector<128x4xf32>
    %c1_143 = arith.constant 1 : index
    %c2_144 = arith.constant 2 : index
    %c0_145 = arith.constant 0 : index
    %127 = vector.load %arg10[%c1_143, %c2_144, %c0_145] : memref<10x18x4xbf16, #tpu.memory_space<vmem>>, vector<8x16x4xbf16>
    %128 = vector.shape_cast %127 : vector<8x16x4xbf16> to vector<128x4xbf16>
    %c1_146 = arith.constant 1 : index
    %c2_147 = arith.constant 2 : index
    %c0_148 = arith.constant 0 : index
    %c0_149 = arith.constant 0 : index
    %129 = vector.load %arg6[%c1_146, %c2_147, %c0_148, %c0_149] : memref<3x3x4x4xbf16, #tpu.memory_space<vmem>>, vector<1x1x4x4xbf16>
    %130 = vector.shape_cast %129 : vector<1x1x4x4xbf16> to vector<4x4xbf16>
    %cst_150 = arith.constant dense<0.000000e+00> : vector<128x4xf32>
    %131 = tpu.matmul %128, %130, %cst_150 {dimension_numbers = #tpu.dot_dimension_numbers<[1], [0], [0], [1], [0, 0, 1, 1], [], []>} : vector<128x4xbf16>, vector<4x4xbf16>, vector<128x4xf32> -> vector<128x4xf32>
    %132 = arith.addf %126, %131 : vector<128x4xf32>
    %c2_151 = arith.constant 2 : index
    %c0_152 = arith.constant 0 : index
    %c0_153 = arith.constant 0 : index
    %133 = vector.load %arg10[%c2_151, %c0_152, %c0_153] : memref<10x18x4xbf16, #tpu.memory_space<vmem>>, vector<8x16x4xbf16>
    %134 = vector.shape_cast %133 : vector<8x16x4xbf16> to vector<128x4xbf16>
    %c2_154 = arith.constant 2 : index
    %c0_155 = arith.constant 0 : index
    %c0_156 = arith.constant 0 : index
    %c0_157 = arith.constant 0 : index
    %135 = vector.load %arg6[%c2_154, %c0_155, %c0_156, %c0_157] : memref<3x3x4x4xbf16, #tpu.memory_space<vmem>>, vector<1x1x4x4xbf16>
    %136 = vector.shape_cast %135 : vector<1x1x4x4xbf16> to vector<4x4xbf16>
    %cst_158 = arith.constant dense<0.000000e+00> : vector<128x4xf32>
    %137 = tpu.matmul %134, %136, %cst_158 {dimension_numbers = #tpu.dot_dimension_numbers<[1], [0], [0], [1], [0, 0, 1, 1], [], []>} : vector<128x4xbf16>, vector<4x4xbf16>, vector<128x4xf32> -> vector<128x4xf32>
    %138 = arith.addf %132, %137 : vector<128x4xf32>
    %c2_159 = arith.constant 2 : index
    %c1_160 = arith.constant 1 : index
    %c0_161 = arith.constant 0 : index
    %139 = vector.load %arg10[%c2_159, %c1_160, %c0_161] : memref<10x18x4xbf16, #tpu.memory_space<vmem>>, vector<8x16x4xbf16>
    %140 = vector.shape_cast %139 : vector<8x16x4xbf16> to vector<128x4xbf16>
    %c2_162 = arith.constant 2 : index
    %c1_163 = arith.constant 1 : index
    %c0_164 = arith.constant 0 : index
    %c0_165 = arith.constant 0 : index
    %141 = vector.load %arg6[%c2_162, %c1_163, %c0_164, %c0_165] : memref<3x3x4x4xbf16, #tpu.memory_space<vmem>>, vector<1x1x4x4xbf16>
    %142 = vector.shape_cast %141 : vector<1x1x4x4xbf16> to vector<4x4xbf16>
    %cst_166 = arith.constant dense<0.000000e+00> : vector<128x4xf32>
    %143 = tpu.matmul %140, %142, %cst_166 {dimension_numbers = #tpu.dot_dimension_numbers<[1], [0], [0], [1], [0, 0, 1, 1], [], []>} : vector<128x4xbf16>, vector<4x4xbf16>, vector<128x4xf32> -> vector<128x4xf32>
    %144 = arith.addf %138, %143 : vector<128x4xf32>
    %c2_167 = arith.constant 2 : index
    %c2_168 = arith.constant 2 : index
    %c0_169 = arith.constant 0 : index
    %145 = vector.load %arg10[%c2_167, %c2_168, %c0_169] : memref<10x18x4xbf16, #tpu.memory_space<vmem>>, vector<8x16x4xbf16>
    %146 = vector.shape_cast %145 : vector<8x16x4xbf16> to vector<128x4xbf16>
    %c2_170 = arith.constant 2 : index
    %c2_171 = arith.constant 2 : index
    %c0_172 = arith.constant 0 : index
    %c0_173 = arith.constant 0 : index
    %147 = vector.load %arg6[%c2_170, %c2_171, %c0_172, %c0_173] : memref<3x3x4x4xbf16, #tpu.memory_space<vmem>>, vector<1x1x4x4xbf16>
    %148 = vector.shape_cast %147 : vector<1x1x4x4xbf16> to vector<4x4xbf16>
    %cst_174 = arith.constant dense<0.000000e+00> : vector<128x4xf32>
    %149 = tpu.matmul %146, %148, %cst_174 {dimension_numbers = #tpu.dot_dimension_numbers<[1], [0], [0], [1], [0, 0, 1, 1], [], []>} : vector<128x4xbf16>, vector<4x4xbf16>, vector<128x4xf32> -> vector<128x4xf32>
    %150 = arith.addf %144, %149 : vector<128x4xf32>
    %c0_175 = arith.constant 0 : index
    %c0_176 = arith.constant 0 : index
    %c2_177 = arith.constant 2 : index
    %c1_178 = arith.constant 1 : index
    %c0_179 = arith.constant 0 : index
    %151 = vector.load %arg2[%c0_175, %c0_176, %c2_177, %c1_178, %c0_179] : memref<1x1x12x18x4xbf16, #tpu.memory_space<vmem>>, vector<1x1x8x16x4xbf16>
    %152 = vector.shape_cast %151 : vector<1x1x8x16x4xbf16> to vector<8x16x4xbf16>
    %153 = arith.extf %152 : vector<8x16x4xbf16> to vector<8x16x4xf32>
    %154 = vector.shape_cast %153 : vector<8x16x4xf32> to vector<128x4xf32>
    %c0_180 = arith.constant 0 : index
    %c0_181 = arith.constant 0 : index
    %155 = vector.load %arg7[%c0_180, %c0_181] : memref<1x4xf32, #tpu.memory_space<vmem>>, vector<1x4xf32>
    %156 = vector.shape_cast %155 : vector<1x4xf32> to vector<4xf32>
    %157 = vector.shape_cast %156 : vector<4xf32> to vector<1x4xf32>
    %158 = vector.broadcast %157 : vector<1x4xf32> to vector<128x4xf32>
    %159 = arith.mulf %150, %158 : vector<128x4xf32>
    %c0_182 = arith.constant 0 : index
    %c0_183 = arith.constant 0 : index
    %160 = vector.load %arg8[%c0_182, %c0_183] : memref<1x4xf32, #tpu.memory_space<vmem>>, vector<1x4xf32>
    %161 = vector.shape_cast %160 : vector<1x4xf32> to vector<4xf32>
    %162 = vector.shape_cast %161 : vector<4xf32> to vector<1x4xf32>
    %163 = vector.broadcast %162 : vector<1x4xf32> to vector<128x4xf32>
    %164 = arith.addf %159, %163 : vector<128x4xf32>
    %165 = arith.addf %164, %154 : vector<128x4xf32>
    %cst_184 = arith.constant 0.000000e+00 : f32
    %166 = vector.broadcast %cst_184 : f32 to vector<128x4xf32>
    %167 = arith.maximumf %165, %166 : vector<128x4xf32>
    %168 = tpu.transpose %167, [1, 0] : vector<128x4xf32> -> vector<4x128xf32>
    %c0_185 = arith.constant 0 : index
    %c0_186 = arith.constant 0 : index
    %c0_187 = arith.constant 0 : index
    %169 = vector.load %arg9[%c0_185, %c0_186, %c0_187] : memref<1x4x128xf32, #tpu.memory_space<vmem>>, vector<1x4x128xf32>
    %170 = vector.shape_cast %169 : vector<1x4x128xf32> to vector<4x128xf32>
    %171 = vector.shape_cast %168 : vector<4x128xf32> to vector<1x4x128xf32>
    tpu.vector_store %arg9[%c0_185, %c0_186, %c0_187], %171 {strides = array<i32>} : memref<1x4x128xf32, #tpu.memory_space<vmem>>, vector<1x4x128xf32>,
    return
  }
  func.func @transform_0(%arg0: i32, %arg1: i32) -> (i32, i32, i32, i32, i32) {
    %c0_i32 = arith.constant 0 : i32
    %c0_i32_0 = arith.constant 0 : i32
    %c0_i32_1 = arith.constant 0 : i32
    %c0_i32_2 = arith.constant 0 : i32
    return %arg0, %arg1, %c0_i32, %c0_i32_0, %c0_i32_1 : i32, i32, i32, i32, i32
  }
  func.func @transform_1(%arg0: i32, %arg1: i32) -> (i32, i32, i32, i32) {
    %c0_i32 = arith.constant 0 : i32
    %c0_i32_0 = arith.constant 0 : i32
    %c0_i32_1 = arith.constant 0 : i32
    %c0_i32_2 = arith.constant 0 : i32
    %c0_i32_3 = arith.constant 0 : i32
    return %c0_i32, %c0_i32_0, %c0_i32_1, %c0_i32_2 : i32, i32, i32, i32
  }
  func.func @transform_2(%arg0: i32, %arg1: i32) -> (i32, i32) {
    %c0_i32 = arith.constant 0 : i32
    %c0_i32_0 = arith.constant 0 : i32
    %c0_i32_1 = arith.constant 0 : i32
    return %c0_i32, %c0_i32_0 : i32, i32
  }
  func.func @transform_3(%arg0: i32, %arg1: i32) -> (i32, i32) {
    %c0_i32 = arith.constant 0 : i32
    %c0_i32_0 = arith.constant 0 : i32
    %c0_i32_1 = arith.constant 0 : i32
    return %c0_i32, %c0_i32_0 : i32, i32
  }
  func.func @transform_4(%arg0: i32, %arg1: i32) -> (i32, i32, i32, i32) {
    %c0_i32 = arith.constant 0 : i32
    %c0_i32_0 = arith.constant 0 : i32
    %c0_i32_1 = arith.constant 0 : i32
    %c0_i32_2 = arith.constant 0 : i32
    %c0_i32_3 = arith.constant 0 : i32
    return %c0_i32, %c0_i32_0, %c0_i32_1, %c0_i32_2 : i32, i32, i32, i32
  }
  func.func @transform_5(%arg0: i32, %arg1: i32) -> (i32, i32) {
    %c0_i32 = arith.constant 0 : i32
    %c0_i32_0 = arith.constant 0 : i32
    %c0_i32_1 = arith.constant 0 : i32
    return %c0_i32, %c0_i32_0 : i32, i32
  }
  func.func @transform_6(%arg0: i32, %arg1: i32) -> (i32, i32) {
    %c0_i32 = arith.constant 0 : i32
    %c0_i32_0 = arith.constant 0 : i32
    %c0_i32_1 = arith.constant 0 : i32
    return %c0_i32, %c0_i32_0 : i32, i32
  }
  func.func @transform_7(%arg0: i32, %arg1: i32) -> (i32, i32, i32) {
    %c0_i32 = arith.constant 0 : i32
    %c0_i32_0 = arith.constant 0 : i32
    return %arg0, %c0_i32, %arg1 : i32, i32, i32
  }
}

</mosaic_0001>

<bundles_post_ra>
// kernel: tpu_custom_call.1
= control target key start
LH: loop header
LB: loop body
LE: loop exit
PB: predicated region body
PF: predicated region fallthrough
CT: control target
= control target key end

     0   :  { %s10643_s0 = inlined_call_operand.vmem [shape: bf16[2,2,12,18,4], index: 0, kind: input, shape index: {}]   ;;  %s10644_s1 = inlined_call_operand.vmem [shape: bf16[3,3,4,4], index: 1, kind: input, shape index: {}]   ;;  %s10645_s2 = inlined_call_operand.vmem [shape: f32[1,4], index: 2, kind: input, shape index: {}]   ;;  %s10646_s3 = inlined_call_operand.vmem [shape: f32[1,4], index: 3, kind: input, shape index: {}]   ;;  %s10647_s4 = inlined_call_operand.vmem [shape: bf16[3,3,4,4], index: 4, kind: input, shape index: {}]   ;;  %s10648_s5 = inlined_call_operand.vmem [shape: f32[1,4], index: 5, kind: input, shape index: {}]   ;;  %s10649_s6 = inlined_call_operand.vmem [shape: f32[1,4], index: 6, kind: input, shape index: {}]   ;;  %s10650_s7 = inlined_call_operand.hbm [shape: f32[2,4,256], index: 7, kind: output, shape index: {}]  }
   0x1   :  { %10670 = sst [smem:[#allocation31_spill]] %s10643_s0 }
   0x2   :  { %12 = vsyncpa [#allocation4], 0 }
   0x3   :  { %14 = vsyncpa [#allocation4 + $0x1], 0  ;;  %s8365_s24 = smov 0   ;;  %s8367_s25 = smov 0  }
   0x4   :  { %s8369_s26 = smov 0   ;;  %s8371_s27 = smov 0  }
   0x5   :  { %s8373_s28 = smov 0   ;;  %s8375_s29 = smov 0  }
   0x6   :  { %s8377_s30 = smov 0   ;;  %s8379_s8 = smov 0  }
   0x7 LB: > { %s6627_s9 = sadd.s32 4294967295, %s8322_s8   ;;  %s6628_s10 = sadd.s32 4294967294, %s8322_s8   ;;  %s8322_s8 = sphi %s8379_s8, %s20_s8   ;;  %s8318_s30 = sphi %s8377_s30, %s10851_s30   ;;  %s8314_s29 = sphi %s8375_s29, %s10850_s29   ;;  %s8310_s28 = sphi %s8373_s28, %s10849_s28   ;;  %s8306_s27 = sphi %s8371_s27, %s10848_s27   ;;  %s8302_s26 = sphi %s8369_s26, %s10847_s26   ;;  %s8298_s25 = sphi %s8367_s25, %s10846_s25   ;;  %s8294_s24 = sphi %s8365_s24, %s10845_s24  }
   0x8   : > { %s29_s11 = sadd.s32 1, %s8314_s29  ;;  %s32_s12 = sadd.s32 1, %s8318_s30 }
   0x9   : > { %p30_p0 = scmp.ge.s32.totalorder %s29_s11, 2  ;;  %p205_p1 = scmp.ne.s32.totalorder %s8302_s26, %s8298_s25 }
   0xa   : > { %p206_p2 = scmp.eq.s32.totalorder %s6627_s9, 3  ;;  %p211_p5 = scmp.ne.s32.totalorder %s8298_s25, %s8294_s24 }
   0xb   : > { %s10853_s11 = smov (%p30_p0, %s29_s11), 0  ;;  %s10855_s12 = smov (!%p30_p0, %s32_s12), %s8318_s30 }
   0xc   : > { %s191_s13 = ssub.s32 %s8314_s29, %s10853_s11  ;;  %p8416_p3 = por %p206_p2, %p205_p1 }
   0xd   : > { %p34_p4 = scmp.ge.s32.totalorder %s10855_s12, 2  ;;  %p212_p6 = scmp.eq.s32.totalorder %s6628_s10, 3 }
   0xe   : > { %p6631_p7 = scmp.ge.s32.totalorder %s8322_s8, 1  ;;  %p260_p9 = scmp.lt.s32.totalorder %s8322_s8, 5 }
   0xf   : > { %s10857_s12 = smov (%p34_p4, %s10855_s12), 0  ;;  %p8425_p8 = por %p212_p6, %p211_p5 }
  0x10   : > { %10672 = sst [smem:[#allocation6_spill]] %s10857_s12  ;;  %s190_s16 = ssub.s32 %s8318_s30, %s10857_s12 }
  0x11   : > { %s195_s17 = sadd.s32 1, %s8302_s26  ;;  %s192_s18 = sor.u32 %s191_s13, %s190_s16 }
  0x12   : > { %p261_p10 = pnand %p6631_p7, %p260_p9  ;;  %p193_p11 = scmp.eq.s32.totalorder %s192_s18, 0 }
  0x14   : > { %s8434_s19 = scalar_select %p193_p11, %s8302_s26, %s195_s17  }
  0x15   : > { %264 = sbr.rel (%p261_p10) target bundleno = 1246 (0x4de), region = 48 }
  0x1c   : > { %v326_v0 = vld [vmem:[%s10644_s1] sm:$0x3]  ;;  %vm10669_vm0 = vcmask 1041408   ;;  %p296_p12 = scmp.lt.s32.totalorder %s8310_s28, 1  ;;  %p298_p13 = scmp.lt.s32.totalorder %s8306_s27, 1  ;;  %vm10668_vm1 = vcmask 31744  }
  0x1d   : > { %8072 = vmatprep.subr.msk.bf16.mxu0 %vm10669_vm0, %v326_v0  ;;  %v841_v1 = vsel %vm10669_vm0, %v326_v0, 0  ;;  %v6685_v2 = vld [vmem:[%s10644_s1 + $0x4] sm:$0x3]  ;;  %s10674_s0 = sld [smem:[#allocation31_spill]]  ;;  %v8481_v12 = vld [vmem:[%s10644_s1 + $0x6] sm:$0x3] }
  0x1e   : > { %7446 = vmatpush3.bf16.msra.mxu0 %v841_v1  ;;  %s297_s9 = scalar_select %p296_p12, %s8310_s28, 1  ;;  %v1122_v10 = vsel %vm10669_vm0, %v6685_v2, 0  ;;  %vm986_vm2 = vcmask 1042432   ;;  %vm987_vm3 = vcmask 1046532   ;;  %vm337_vm5 = vsmask.f32 3328 }
  0x1f   : > { %s299_s10 = scalar_select %p298_p13, %s8306_s27, 1  ;;  %8073 = vmatprep.subr.msk.bf16.mxu0 %vm10669_vm0, %v6685_v2  ;;  %vm8547_vm4 = vmor %vm986_vm2, %vm987_vm3  ;;  %vm338_vm6 = vsmask.f32 7440  ;;  %vm3706_vm13 = vcmask 27648   ;;  %vm3503_vm15 = vsmask.f32 256 }
  0x20   : > { %s8090_s13 = smul.u32 72, %s297_s9  ;;  %vm8768_vm7 = vmor %vm337_vm5, %vm338_vm6  ;;  %s6974_s20 = sshll.u32 %s8306_s27, 3  ;;  %vm3707_vm2 = vsmask.f32 7938  ;;  %vm3714_vm3 = vcmask 24576  }
  0x21   : > { %s8089_s16 = smul.u32 36, %s299_s10  ;;  %s6975_s21 = sadd.s32 4294967295, %s6974_s20  ;;  %vm3504_vm6 = vsmask.f32 4368  ;;  %v10515_v37 = vld [vmem:[%s10649_s6] ss:$0 sm:$0xff] }
  0x22   : > { %s7199_s10 = sshll.u32 %s8310_s28, 1 }
  0x23   : > { %s302_s17 = sadd.s32 %s8090_s13, %s8089_s16  ;;  %s6542_s13 = sadd.s32 %s8306_s27, %s7199_s10 }
  0x24   : > { %s6633_s18 = sshll.u32 %s302_s17, 2  ;;  %s8324_s27 = smov [#allocation3]  }
  0x25   : > { %s8452_s12 = scalar_lea.vmem %s10674_s0, %s6633_s18  ;;  %s7200_s18 = sshll.u32 %s6542_s13, 6 }
  0x26   : > { %v8455_v3 = vld [vmem:[%s8452_s12] sm:$0xf]  ;;  %v8458_v4 = vld [vmem:[%s8452_s12 + $0x4] sm:$0xf]  ;;  %v8461_v5 = vld [vmem:[%s8452_s12 + $0xc] sm:$0xf]  ;;  %s10592_s22 = scalar_lea.hbm %s10650_s7, %s7200_s18 }
  0x27   : > { %v6655_v6 = vcombine.low %v8455_v3, %v8458_v4  ;;  %v8466_v7 = vld [vmem:[%s8452_s12 + $0x10] sm:$0xf]  ;;  %v8469_v8 = vld [vmem:[%s8452_s12 + $0x18] sm:$0xf]  ;;  %v8476_v11 = vld [vmem:[%s8452_s12 + $0x1c] sm:$0xf] }
  0x28   : > { %v6656_v9 = vcombine.low %v8461_v5, %v8466_v7  ;;  %10675 = vst [vmem:[#allocation7_spill] sm:$0xff] %v8476_v11  ;;  %v6657_v13 = vcombine.low %v8469_v8, %v8476_v11  ;;  %v8487_v14 = vld [vmem:[%s8452_s12 + $0x24] sm:$0xf]  ;;  %v8490_v15 = vld [vmem:[%s8452_s12 + $0x28] sm:$0xf]  ;;  %v991_v28 = vrot.slane %v8458_v4, 5 }
  0x29   : > { %7447 = vmatprep.mubr.msk.bf16.mxu0 %vm10668_vm1, %v6655_v6  ;;  %10676 = vst [vmem:[#allocation8_spill] sm:$0xff] %v8490_v15  ;;  %v8494_v16 = vld [vmem:[%s8452_s12 + $0x30] sm:$0xf]  ;;  %v8497_v17 = vld [vmem:[%s8452_s12 + $0x34] sm:$0xf]  ;;  %v6658_v18 = vcombine.low %v8487_v14, %v8490_v15  ;;  %v998_v34 = vrot.slane %v8466_v7, 5 }
  0x2a   : > { %7448 = vmatmul.mubr.msk.bf16.vlgmr.msra.gmra.mrb[0].mxu0 %vm10668_vm1, %v6656_v9  ;;  %10677 = vst [vmem:[#allocation9_spill] sm:$0xff] %v8497_v17  ;;  %v6659_v19 = vcombine.low %v8494_v16, %v8497_v17  ;;  %v8508_v20 = vld [vmem:[%s8452_s12 + $0x3c] sm:$0xf]  ;;  %v8511_v21 = vld [vmem:[%s8452_s12 + $0x40] sm:$0xf]  ;;  %v993_v36 = vrot.slane %v991_v28, 4 }
  0x2b   : > { %7468 = vmatpush3.bf16.msra.mxu0 %v1122_v10  ;;  %7451 = vmatprep.mubr.msk.bf16.mxu0 %vm10668_vm1, %v6657_v13  ;;  %10678 = vst [vmem:[#allocation10_spill] sm:$0xff] %v8511_v21  ;;  %v8514_v22 = vld [vmem:[%s8452_s12 + $0x48] sm:$0xf]  ;;  %v8517_v23 = vld [vmem:[%s8452_s12 + $0x4c] sm:$0xf]  ;;  %v6660_v24 = vcombine.low %v8508_v20, %v8511_v21  ;;  %v1005_v40 = vrot.slane %v8476_v11, 5 }
  0x2c   : > { %8074 = vmatprep.subr.msk.bf16.mxu0 %vm10669_vm0, %v8481_v12  ;;  %v6661_v25 = vcombine.low %v8514_v22, %v8517_v23  ;;  %v8526_v26 = vld [vmem:[%s8452_s12 + $0x54] sm:$0xf]  ;;  %v8529_v27 = vld [vmem:[%s8452_s12 + $0x58] sm:$0xf]  ;;  %v8533_v29 = vld [vmem:[%s8452_s12 + $0x60] sm:$0xf] }
  0x2d   : > { %v8536_v30 = vld [vmem:[%s8452_s12 + $0x64] sm:$0xf]  ;;  %v8539_v31 = vld [vmem:[%s8452_s12 + $0x8] sm:$0x1]  ;;  %v956_v32 = vld [vmem:[%s8452_s12] sm:$0xe]  ;;  %v6662_v33 = vcombine.low %v8526_v26, %v8529_v27 }
  0x2e   : > { %v6663_v35 = vcombine.low %v8533_v29, %v8536_v30  ;;  %v6675_v38 = vrot.slane %v956_v32, 9  ;;  %v994_v39 = vrot.slane %v8539_v31, 5  ;;  %v8554_v41 = vld [vmem:[%s8452_s12 + $0x6c] sm:$0xf]  ;;  %v8557_v42 = vld [vmem:[%s8452_s12 + $0x70] sm:$0xf] }
  0x2f   : > { %v8560_v43 = vld [vmem:[%s8452_s12 + $0x14] sm:$0x1]  ;;  %v957_v44 = vld [vmem:[%s8452_s12 + $0xc] sm:$0xe]  ;;  %v8566_v45 = vld [vmem:[%s8452_s12 + $0x20] sm:$0x1]  ;;  %v6664_v53 = vcombine.low %v8554_v41, %v8557_v42 }
  0x30   : > { %10681 = vst [vmem:[#allocation11_spill] sm:$0xff] %v8566_v45  ;;  %v958_v46 = vld [vmem:[%s8452_s12 + $0x18] sm:$0xe]  ;;  %v1000_v47 = vrot.slane %v998_v34, 4  ;;  %v992_v48 = vsel %vm8547_vm4, %v6675_v38, %v991_v28  ;;  %v995_v49 = vsel %vm8547_vm4, %v993_v36, %v994_v39  ;;  %v1007_v50 = vrot.slane %v1005_v40, 4  ;;  %s8232_s28 = sshll.u32 %s8324_s27, 4  ;;  %s8233_s28 = int_to_ptr.vmem [resolvable:$false] %s8232_s28 }
  0x31   : > { %v6676_v51 = vrot.slane %v957_v44, 9  ;;  %v1001_v52 = vrot.slane %v8560_v43, 5  ;;  %v6677_v54 = vrot.slane %v958_v46, 9  ;;  %v1008_v55 = vrot.slane %v8566_v45, 5  ;;  %v8589_v62 = vld [vmem:[%s8452_s12 + $0x2c] sm:$0x1] }
  0x32   : > { %7452 = vmatmul.mubr.msk.bf16.gmra.mrb[4].mxu0 %vm10668_vm1, %v6658_v18  ;;  %v6686_v56 = vcombine.low %v992_v48, %v995_v49  ;;  %v1012_v59 = vrot.slane %v8490_v15, 5  ;;  %10682 = vst [vmem:[#allocation12_spill] sm:$0xff] %v8589_v62  ;;  %v959_v63 = vld [vmem:[%s8452_s12 + $0x24] sm:$0xe]  ;;  %v1019_v0 = vrot.slane %v8497_v17, 5  ;;  %v1015_v18 = vrot.slane %v8589_v62, 5 }
  0x33   : > { %7455 = vmatprep.mubr.msk.bf16.mxu0 %vm10668_vm1, %v6659_v19  ;;  %v999_v57 = vsel %vm8547_vm4, %v6676_v51, %v998_v34  ;;  %v1002_v58 = vsel %vm8547_vm4, %v1000_v47, %v1001_v52  ;;  %v1006_v60 = vsel %vm8547_vm4, %v6677_v54, %v1005_v40  ;;  %v1009_v61 = vsel %vm8547_vm4, %v1007_v50, %v1008_v55  ;;  %v8594_v1 = vld [vmem:[%s8452_s12 + $0x38] sm:$0x1]  ;;  %v960_v2 = vld [vmem:[%s8452_s12 + $0x30] sm:$0xe]  ;;  %v8604_v32 = vld [vmem:[%s10644_s1 + $0x8] sm:$0x3] }
  0x34   : > { %10683 = vst [vmem:[#allocation13_spill] sm:$0xff] %v8594_v1  ;;  %v6687_v6 = vcombine.low %v999_v57, %v1002_v58  ;;  %v6688_v9 = vcombine.low %v1006_v60, %v1009_v61  ;;  %v6678_v10 = vrot.slane %v959_v63, 9  ;;  %v1014_v13 = vrot.slane %v1012_v59, 4  ;;  %v8618_v38 = vld [vmem:[%s8452_s12 + $0x44] sm:$0x1] }
  0x35   : > { %v1361_v19 = vsel %vm10669_vm0, %v8481_v12, 0  ;;  %v1022_v28 = vrot.slane %v8594_v1, 5  ;;  %v1026_v34 = vrot.slane %v8511_v21, 5  ;;  %10684 = vst [vmem:[#allocation14_spill] sm:$0xff] %v8618_v38  ;;  %v961_v39 = vld [vmem:[%s8452_s12 + $0x3c] sm:$0xe] }
  0x36   : > { %v1016_v12 = vsel %vm8547_vm4, %v1014_v13, %v1015_v18  ;;  %v1033_v40 = vrot.slane %v8517_v23, 5  ;;  %v333_v44 = vld [vmem:[%s8452_s12 + $0x50] sm:$0x1]  ;;  %v962_v46 = vld [vmem:[%s8452_s12 + $0x48] sm:$0xe]  ;;  %v6680_v49 = vrot.slane %v961_v39, 9 }
  0x37   : > { %v1028_v50 = vrot.slane %v1026_v34, 4  ;;  %v1029_v51 = vrot.slane %v8618_v38, 5  ;;  %v6681_v52 = vrot.slane %v962_v46, 9  ;;  %v1036_v54 = vrot.slane %v333_v44, 5  ;;  %v334_v60 = vld [vmem:[%s8452_s12 + $0x5c] sm:$0x1] }
  0x38   : > { %v1027_v55 = vsel %vm8547_vm4, %v6680_v49, %v1026_v34  ;;  %v1040_v57 = vrot.slane %v8529_v27, 5  ;;  %v963_v61 = vld [vmem:[%s8452_s12 + $0x54] sm:$0xe]  ;;  %v1047_v63 = vrot.slane %v8536_v30, 5  ;;  %v1043_v18 = vrot.slane %v334_v60, 5 }
  0x39   : > { %v1034_v58 = vsel %vm8547_vm4, %v6681_v52, %v1033_v40  ;;  %v965_v39 = vld [vmem:[%s8452_s12 + $0x6c] sm:$0xe]  ;;  %v8173_v52 = vld [vmem:[%s8452_s12 + $0x18] sm:$0xff]   ;;  %v8175_v60 = vld [vmem:[%s8452_s12 + $0x30] sm:$0xff]  }
  0x3a   : > { %7456 = vmatmul.mubr.msk.bf16.gmra.mrb[8].mxu0 %vm10668_vm1, %v6660_v24  ;;  %v6679_v24 = vrot.slane %v960_v2, 9  ;;  %v964_v2 = vld [vmem:[%s8452_s12 + $0x60] sm:$0xe]  ;;  %v1042_v13 = vrot.slane %v1040_v57, 4  ;;  %v6684_v46 = vrot.slane %v965_v39, 9 }
  0x3b   : > { %7459 = vmatprep.mubr.msk.bf16.mxu0 %vm10668_vm1, %v6661_v25  ;;  %v1021_v25 = vrot.slane %v1019_v0, 4  ;;  %v6750_v39 = vld [vmem:[%s8452_s12 + $0x18] sm:$0xf]  ;;  %v8895_v11 = vld [vmem:[%s8452_s12 + $0x74] sm:$0x1] }
  0x3c   : > { %v8791_v15 = vld [vmem:[%s8452_s12 + $0x38] sm:$0x1] }
  0x3d   : > { %v1023_v36 = vsel %vm8547_vm4, %v1021_v25, %v1022_v28 }
  0x42   : > { %7460 = vmatmul.mubr.msk.bf16.gmra.mrb[12].mxu0 %vm10668_vm1, %v6662_v33  ;;  %v1013_v33 = vsel %vm8547_vm4, %v6678_v10, %v1012_v59  ;;  %v6682_v10 = vrot.slane %v963_v61, 9  ;;  %v6747_v61 = vld [vmem:[%s8452_s12 + $0xc] sm:$0xf] }
  0x43   : > { %7463 = vmatprep.mubr.msk.bf16.mxu0 %vm10668_vm1, %v6663_v35  ;;  %v1020_v35 = vsel %vm8547_vm4, %v6679_v24, %v1019_v0  ;;  %v6689_v47 = vcombine.low %v1013_v33, %v1016_v12  ;;  %v335_v0 = vld [vmem:[%s8452_s12 + $0x68] sm:$0x1]  ;;  %v1049_v24 = vrot.slane %v1047_v63, 4  ;;  %v1044_v33 = vsel %vm8547_vm4, %v1042_v13, %v1043_v18 }
  0x44   : > { %v6690_v48 = vcombine.low %v1020_v35, %v1023_v36  ;;  %v1050_v25 = vrot.slane %v335_v0, 5  ;;  %v1041_v28 = vsel %vm8547_vm4, %v6682_v10, %v1040_v57  ;;  %v1054_v12 = vrot.slane %v8557_v42, 5  ;;  %v336_v36 = vld [vmem:[%s8452_s12 + $0x74] sm:$0x1] }
  0x45   : > { %v344_v57 = vshll.u32 %v8455_v3, 16 }
  0x46   : > { %v1051_v35 = vsel %vm8547_vm4, %v1049_v24, %v1050_v25  ;;  %v1055_v42 = vsel %vm8547_vm4, %v6684_v46, %v1054_v12  ;;  %v1530_v24 = vshll.u32 %v6747_v61, 16  ;;  %v440_v46 = vshll.u32 %v8494_v16, 16 }
  0x4a   : > { %7464 = vmatmul.mubr.msk.bf16.gmra.mrb[16].mxu0 %vm10668_vm1, %v6664_v53  ;;  %v1035_v53 = vrot.slane %v1033_v40, 4  ;;  %v6693_v40 = vcombine.low %v1041_v28, %v1044_v33  ;;  %v8762_v33 = vld [vmem:[%s8452_s12 + $0x34] sm:$0xf] }
  0x4b   : > { %7469 = vmatprep.mubr.msk.bf16.mxu0 %vm10668_vm1, %v6686_v56  ;;  %v1030_v56 = vsel %vm8547_vm4, %v1028_v50, %v1029_v51  ;;  %v8172_v51 = vld [vmem:[%s8452_s12 + $0xc] sm:$0xff]   ;;  %v1608_v17 = vshll.u32 %v8762_v33, 16 }
  0x4c   : > { %v1037_v59 = vsel %vm8547_vm4, %v1035_v53, %v1036_v54  ;;  %v8174_v53 = vld [vmem:[%s8452_s12 + $0x24] sm:$0xff]   ;;  %v1829_v54 = vsel %vm10669_vm0, %v8604_v32, 0 }
  0x52   : > { %7470 = vmatmul.mubr.msk.bf16.vlgmr.msra.gmra.mrb[0].mxu0 %vm10668_vm1, %v6687_v6  ;;  %v6691_v6 = vcombine.low %v1027_v55, %v1030_v56  ;;  %v6818_v55 = vld [vmem:[%s10644_s1 + $0xa] sm:$0x3]  ;;  %v341_v56 = vshrl.u32 %v8455_v3, 16 }
  0x53   : > { %7490 = vmatpush3.bf16.msra.mxu0 %v1361_v19  ;;  %7473 = vmatprep.mubr.msk.bf16.mxu0 %vm10668_vm1, %v6688_v9  ;;  %v6692_v9 = vcombine.low %v1034_v58, %v1037_v59  ;;  %v6683_v19 = vrot.slane %v964_v2, 9  ;;  %v365_v58 = vshrl.u32 %v8461_v5, 16  ;;  %v368_v59 = vshll.u32 %v8461_v5, 16 }
  0x54   : > { %8075 = vmatprep.subr.msk.bf16.mxu0 %vm10669_vm0, %v8604_v32  ;;  %v389_v32 = vshrl.u32 %v8469_v8, 16  ;;  %v8690_v3 = vsel %vm10669_vm0, %v6818_v55, 0  ;;  %v8692_v10 = vrot.slane %v341_v56, 4  ;;  %v8694_v5 = vrot.slane %v344_v57, 5  ;;  %v8178_v57 = vld [vmem:[%s8452_s12 + $0x54] sm:$0xff]  }
  0x55   : > { %v1048_v34 = vsel %vm8547_vm4, %v6683_v19, %v1047_v63  ;;  %v8683_v63 = vld [vmem:[%s8452_s12 + $0x10] sm:$0xf]  ;;  %v8696_v13 = vrot.slane %v365_v58, 4  ;;  %v8698_v18 = vrot.slane %v368_v59, 5  ;;  %v1527_v19 = vshrl.u32 %v6747_v61, 16 }
  0x56   : > { %v6694_v44 = vcombine.low %v1048_v34, %v1051_v35  ;;  %v1536_v25 = vshll.u32 %v8683_v63, 16  ;;  %v8702_v28 = vrot.slane %v389_v32, 4  ;;  %v416_v34 = vshll.u32 %v8487_v14, 16 }
  0x58   : > { %10685 = vst [vmem:[#allocation15_spill] sm:$0xff] %v8702_v28  ;;  %v8735_v61 = vrot.slane %v416_v34, 5 }
  0x5a   : > { %7474 = vmatmul.mubr.msk.bf16.gmra.mrb[4].mxu0 %vm10668_vm1, %v6689_v47  ;;  %v1056_v47 = vrot.slane %v1054_v12, 4  ;;  %v413_v12 = vshrl.u32 %v8487_v14, 16  ;;  %v6753_v14 = vld [vmem:[%s8452_s12 + $0x24] sm:$0xf]  ;;  %10688 = vst [vmem:[#allocation18_spill] sm:$0xff] %v8735_v61  ;;  %v8793_v61 = vrot.slane %v1608_v17, 5 }
  0x5b   : > { %7477 = vmatprep.mubr.msk.bf16.mxu0 %vm10668_vm1, %v6690_v48  ;;  %v1057_v48 = vrot.slane %v336_v36, 5  ;;  %v1578_v58 = vshll.u32 %v6753_v14, 16 }
  0x5d   : > { %v1058_v49 = vsel %vm8547_vm4, %v1056_v47, %v1057_v48  ;;  %v8720_v47 = vld [vmem:[%s8452_s12 + $0x28] sm:$0xf]  ;;  %v8723_v48 = vld [vmem:[%s8452_s12 + $0x14] sm:$0x1] }
  0x5e   : > { %v6695_v50 = vcombine.low %v1055_v42, %v1058_v49  ;;  %v1529_v42 = vrot.slane %v1527_v19, 4  ;;  %v1532_v49 = vrot.slane %v1530_v24, 5  ;;  %v1584_v59 = vshll.u32 %v8720_v47, 16 }
  0x5f   : > { %v1588_v32 = vshrl.u32 %v8720_v47, 16  ;;  %v8741_v24 = vrot.slane %v440_v46, 5 }
  0x61   : > { %10690 = vst [vmem:[#allocation20_spill] sm:$0xff] %v8741_v24  ;;  %v1612_v24 = vshrl.u32 %v8762_v33, 16 }
  0x62   : > { %7478 = vmatmul.mubr.msk.bf16.gmra.mrb[8].mxu0 %vm10668_vm1, %v6691_v6  ;;  %v392_v6 = vshll.u32 %v8469_v8, 16  ;;  %v1540_v8 = vshrl.u32 %v8683_v63, 16 }
  0x63   : > { %7481 = vmatprep.mubr.msk.bf16.mxu0 %vm10668_vm1, %v6692_v9  ;;  %v8176_v9 = vld [vmem:[%s8452_s12 + $0x3c] sm:$0xff]  }
  0x64   : > { %v8708_v35 = vrot.slane %v392_v6, 5 }
  0x66   : > { %10686 = vst [vmem:[#allocation16_spill] sm:$0xff] %v8708_v35 }
  0x6a   : > { %7482 = vmatmul.mubr.msk.bf16.gmra.mrb[12].mxu0 %vm10668_vm1, %v6693_v40  ;;  %v8714_v40 = vld [vmem:[%s8452_s12 + $0x1c] sm:$0xf] }
  0x6b   : > { %7485 = vmatprep.mubr.msk.bf16.mxu0 %vm10668_vm1, %v6694_v44  ;;  %v437_v44 = vshrl.u32 %v8494_v16, 16  ;;  %v1564_v56 = vshrl.u32 %v8714_v40, 16  ;;  %v1575_v16 = vshrl.u32 %v6753_v14, 16 }
  0x6d   : > { %v8739_v19 = vrot.slane %v437_v44, 4  ;;  %v1566_v6 = vrot.slane %v1564_v56, 4  ;;  %v8752_v44 = vld [vmem:[%s8452_s12 + $0x2c] sm:$0x1]  ;;  %v1577_v46 = vrot.slane %v1575_v16, 4 }
  0x6e   : > { %v6756_v56 = vld [vmem:[%s8452_s12 + $0x30] sm:$0xf]  ;;  %v6759_v16 = vld [vmem:[%s8452_s12 + $0x3c] sm:$0xf] }
  0x6f   : > { %10689 = vst [vmem:[#allocation19_spill] sm:$0xff] %v8739_v19  ;;  %v1599_v21 = vshrl.u32 %v6756_v56, 16  ;;  %v1602_v1 = vshll.u32 %v6756_v56, 16  ;;  %v1623_v19 = vshrl.u32 %v6759_v16, 16 }
  0x72   : > { %7486 = vmatmul.mubr.msk.bf16.gmra.mrb[16].mxu0 %vm10668_vm1, %v6695_v50  ;;  %v8725_v50 = vrot.slane %v1536_v25, 5  ;;  %v1533_v25 = vor.u32 %v1532_v49, %v1529_v42  ;;  %v1580_v42 = vrot.slane %v1578_v58, 5  ;;  %v8754_v49 = vrot.slane %v1584_v59, 5  ;;  %v8179_v58 = vld [vmem:[%s8452_s12 + $0x60] sm:$0xff]  }
  0x73   : > { %7491 = vmatprep.mubr.msk.bf16.mxu0 %vm10668_vm1, %v8172_v51  ;;  %v1542_v51 = vrot.slane %v1540_v8, 4 }
  0x74   : > { %v1534_v36 = vrot.slane %v1533_v25, 4  ;;  %v8180_v25 = vld [vmem:[%s8452_s12 + $0x6c] sm:$0xff]  }
  0x75   : > { %v1543_v8 = vor.u32 %v1542_v51, %v8725_v50  ;;  %v1590_v51 = vrot.slane %v1588_v32, 4 }
  0x77   : > { %v1544_v32 = vrot.slane %v1543_v8, 4  ;;  %v1591_v38 = vor.u32 %v1590_v51, %v8754_v49  ;;  %v1626_v8 = vshll.u32 %v6759_v16, 16 }
  0x7a   : > { %7492 = vmatmul.mubr.msk.bf16.vlgmr.msra.gmra.mrb[0].mxu0 %vm10668_vm1, %v8173_v52  ;;  %v8177_v52 = vld [vmem:[%s8452_s12 + $0x48] sm:$0xff]  }
  0x7b   : > { %7512 = vmatpush3.bf16.msra.mxu0 %v1829_v54  ;;  %7495 = vmatprep.mubr.msk.bf16.mxu0 %vm10668_vm1, %v8174_v53  ;;  %v1551_v53 = vshrl.u32 %v6750_v39, 16  ;;  %v1554_v54 = vshll.u32 %v6750_v39, 16  ;;  %v8746_v39 = vld [vmem:[%s8452_s12 + $0x20] sm:$0x1] }
  0x7c   : > { %8076 = vmatprep.subr.msk.bf16.mxu0 %vm10669_vm0, %v6818_v55  ;;  %v1560_v55 = vshll.u32 %v8714_v40, 16 }
  0x7d   : > { %v1556_v14 = vrot.slane %v1554_v54, 5  ;;  %v8775_v54 = vld [vmem:[%s8452_s12 + $0x40] sm:$0xf] }
  0x7e   : > { %v8748_v34 = vrot.slane %v1560_v55, 5  ;;  %10693 = vst [vmem:[#allocation21_spill] sm:$0xff] %v8775_v54 }
  0x80   : > { %v1567_v0 = vor.u32 %v1566_v6, %v8748_v34  ;;  %v1539_v6 = vsel %vm8768_vm7, %v1534_v36, %v8725_v50  ;;  %v1592_v36 = vrot.slane %v1591_v38, 4  ;;  %v1601_v50 = vrot.slane %v1599_v21, 4  ;;  %v8181_v21 = vld [vmem:[%s8452_s12 + $0x78] sm:$0xff]  }
  0x82   : > { %7496 = vmatmul.mubr.msk.bf16.gmra.mrb[4].mxu0 %vm10668_vm1, %v8175_v60  ;;  %v8733_v60 = vrot.slane %v413_v12, 4  ;;  %v1553_v12 = vrot.slane %v1551_v53, 4  ;;  %v1581_v53 = vor.u32 %v1580_v42, %v1577_v46  ;;  %v1636_v46 = vshrl.u32 %v8775_v54, 16 }
  0x83   : > { %7499 = vmatprep.mubr.msk.bf16.mxu0 %vm10668_vm1, %v8176_v9  ;;  %v1546_v9 = vshll.u32 %v8723_v48, 16  ;;  %v1568_v56 = vrot.slane %v1567_v0, 4 }
  0x84   : > { %10687 = vst [vmem:[#allocation17_spill] sm:$0xff] %v8733_v60  ;;  %v1557_v2 = vor.u32 %v1556_v14, %v1553_v12  ;;  %v1632_v14 = vshll.u32 %v8775_v54, 16  ;;  %v1582_v16 = vrot.slane %v1581_v53, 4  ;;  %v1625_v60 = vrot.slane %v1623_v19, 4  ;;  %v8810_v19 = vld [vmem:[%s8452_s12 + $0x4c] sm:$0xf] }
  0x85   : > { %v1548_v55 = vrot.slane %v1546_v9, 5  ;;  %v1594_v9 = vshll.u32 %v8752_v44, 16  ;;  %10696 = vst [vmem:[#allocation24_spill] sm:$0xff] %v8810_v19 }
  0x86   : > { %v1558_v51 = vrot.slane %v1557_v2, 4  ;;  %v8796_v2 = vld [vmem:[%s8452_s12 + $0x44] sm:$0x1]  ;;  %v8798_v0 = vrot.slane %v1632_v14, 5  ;;  %v8820_v14 = vld [vmem:[%s8452_s12 + $0x58] sm:$0xf] }
  0x87   : > { %v1549_v42 = vsel %vm8768_vm7, %v1544_v32, %v1548_v55  ;;  %v1596_v62 = vrot.slane %v1594_v9, 5  ;;  %v1628_v55 = vrot.slane %v1626_v8, 5  ;;  %10694 = vst [vmem:[#allocation22_spill] sm:$0xff] %v8796_v2  ;;  %v1638_v32 = vrot.slane %v1636_v46, 4  ;;  %v6762_v9 = vld [vmem:[%s8452_s12 + $0x48] sm:$0xf] }
  0x88   : > { %v6778_v38 = vcombine.low %v1539_v6, %v1549_v42  ;;  %v1563_v17 = vsel %vm8768_vm7, %v1558_v51, %v8748_v34  ;;  %v1618_v8 = vshll.u32 %v8791_v15, 16  ;;  %v6765_v6 = vld [vmem:[%s8452_s12 + $0x54] sm:$0xf]  ;;  %10697 = vst [vmem:[#allocation25_spill] sm:$0xff] %v8820_v14  ;;  %v1647_v42 = vshrl.u32 %v6762_v9, 16 }
  0x89   : > { %v1629_v46 = vor.u32 %v1628_v55, %v1625_v60  ;;  %v1639_v51 = vor.u32 %v1638_v32, %v8798_v0  ;;  %v1684_v32 = vshrl.u32 %v8820_v14, 16 }
  0x8a   : > { %7500 = vmatmul.mubr.msk.bf16.gmra.mrb[8].mxu0 %vm10668_vm1, %v8177_v52  ;;  %v461_v52 = vshrl.u32 %v8508_v20, 16  ;;  %v1620_v55 = vrot.slane %v1618_v8, 5 }
  0x8b   : > { %7503 = vmatprep.mubr.msk.bf16.mxu0 %vm10668_vm1, %v8178_v57  ;;  %v1570_v57 = vshll.u32 %v8746_v39, 16 }
  0x8c   : > { %v8801_v53 = vrot.slane %v461_v52, 4 }
  0x8d   : > { %v1572_v12 = vrot.slane %v1570_v57, 5  ;;  %v1604_v57 = vrot.slane %v1602_v1, 5 }
  0x8e   : > { %10695 = vst [vmem:[#allocation23_spill] sm:$0xff] %v8801_v53 }
  0x8f   : > { %v1573_v1 = vsel %vm8768_vm7, %v1568_v56, %v1572_v12  ;;  %v1605_v52 = vor.u32 %v1604_v57, %v1601_v50  ;;  %v1642_v12 = vshll.u32 %v8796_v2, 16  ;;  %v1650_v56 = vshll.u32 %v6762_v9, 16  ;;  %v6768_v9 = vld [vmem:[%s8452_s12 + $0x60] sm:$0xf] }
  0x90   : > { %v1674_v50 = vshll.u32 %v6765_v6, 16  ;;  %v1680_v57 = vshll.u32 %v8820_v14, 16  ;;  %v1649_v2 = vrot.slane %v1647_v42, 4  ;;  %v1695_v8 = vshrl.u32 %v6768_v9, 16 }
  0x91   : > { %v1644_v45 = vrot.slane %v1642_v12, 5  ;;  %v1698_v12 = vshll.u32 %v6768_v9, 16 }
  0x92   : > { %7504 = vmatmul.mubr.msk.bf16.gmra.mrb[12].mxu0 %vm10668_vm1, %v8179_v58  ;;  %v1614_v58 = vrot.slane %v1612_v24, 4  ;;  %v1587_v24 = vsel %vm8768_vm7, %v1582_v16, %v8754_v49  ;;  %v1656_v49 = vshll.u32 %v8810_v19, 16  ;;  %v6779_v16 = vcombine.low %v1563_v17, %v1573_v1 }
  0x93   : > { %7507 = vmatprep.mubr.msk.bf16.mxu0 %vm10668_vm1, %v8180_v25  ;;  %v1597_v25 = vsel %vm8768_vm7, %v1592_v36, %v1596_v62  ;;  %v1660_v62 = vshrl.u32 %v8810_v19, 16  ;;  %v1671_v36 = vshrl.u32 %v6765_v6, 16  ;;  %v1630_v19 = vrot.slane %v1629_v46, 4 }
  0x94   : > { %v1615_v34 = vor.u32 %v1614_v58, %v8793_v61  ;;  %v6780_v60 = vcombine.low %v1587_v24, %v1597_v25  ;;  %v1606_v58 = vrot.slane %v1605_v52, 4  ;;  %v1640_v17 = vrot.slane %v1639_v51, 4 }
  0x95   : > { %v1652_v1 = vrot.slane %v1650_v56, 5  ;;  %v8835_v6 = vrot.slane %v1656_v49, 5  ;;  %v1662_v54 = vrot.slane %v1660_v62, 4  ;;  %v1673_v24 = vrot.slane %v1671_v36, 4  ;;  %v8881_v62 = vld [vmem:[%s8452_s12 + $0x68] sm:$0x1] }
  0x96   : > { %v1616_v53 = vrot.slane %v1615_v34, 4  ;;  %v1676_v25 = vrot.slane %v1674_v50, 5  ;;  %v8840_v52 = vrot.slane %v1680_v57, 5  ;;  %v8843_v34 = vld [vmem:[%s8452_s12 + $0x5c] sm:$0x1]  ;;  %v1686_v46 = vrot.slane %v1684_v32, 4 }
  0x97   : > { %10700 = vst [vmem:[#allocation28_spill] sm:$0xff] %v8843_v34  ;;  %v10701_v56 = vshll.u32 %v8508_v20, 16  ;;  %v1611_v36 = vsel %vm8768_vm7, %v1606_v58, %v8793_v61  ;;  %v6771_v57 = vld [vmem:[%s8452_s12 + $0x6c] sm:$0xf]  ;;  %v1635_v32 = vsel %vm8768_vm7, %v1630_v19, %v8798_v0  ;;  %v1653_v9 = vor.u32 %v1652_v1, %v1649_v2 }
  0x98   : > { %v1621_v50 = vsel %vm8768_vm7, %v1616_v53, %v1620_v55  ;;  %v1663_v20 = vor.u32 %v1662_v54, %v8835_v6  ;;  %v8869_v61 = vld [vmem:[%s10644_s1 + $0xc] sm:$0x3]  ;;  %v1645_v53 = vsel %vm8768_vm7, %v1640_v17, %v1644_v45  ;;  %v1677_v58 = vor.u32 %v1676_v25, %v1673_v24 }
  0x99   : > { %v8849_v49 = vrot.slane %v10701_v56, 5  ;;  %v1690_v2 = vshll.u32 %v8843_v34, 16  ;;  %v1697_v0 = vrot.slane %v1695_v8, 4  ;;  %v1687_v54 = vor.u32 %v1686_v46, %v8840_v52 }
  0x9a   : > { %7508 = vmatmul.mubr.msk.bf16.gmra.mrb[16].mxu0 %vm10668_vm1, %v8181_v21  ;;  %v8833_v21 = vld [vmem:[%s8452_s12 + $0x64] sm:$0xf]  ;;  %v1700_v19 = vrot.slane %v1698_v12, 5  ;;  %v1654_v24 = vrot.slane %v1653_v9, 4  ;;  %v6782_v8 = vcombine.low %v1635_v32, %v1645_v53  ;;  %v1664_v46 = vrot.slane %v1663_v20, 4 }
  0x9b   : > { %7513 = vmatprep.mubr.msk.bf16.mxu0 %vm10668_vm1, %v6778_v38  ;;  %10698 = vst [vmem:[#allocation26_spill] sm:$0xff] %v8833_v21  ;;  %v8838_v38 = vld [vmem:[%s8452_s12 + $0x50] sm:$0x1]  ;;  %v1704_v42 = vshll.u32 %v8833_v21, 16  ;;  %v1708_v51 = vshrl.u32 %v8833_v21, 16  ;;  %10702 = vst [vmem:[#allocation29_spill] sm:$0xff] %v8849_v49 }
  0x9c   : > { %10699 = vst [vmem:[#allocation27_spill] sm:$0xff] %v8838_v38  ;;  %v1666_v56 = vshll.u32 %v8838_v38, 16  ;;  %v8864_v21 = vld [vmem:[%s8452_s12 + $0x70] sm:$0xf]  ;;  %v1722_v49 = vshll.u32 %v6771_v57, 16  ;;  %v1678_v12 = vrot.slane %v1677_v58, 4  ;;  %v1701_v34 = vor.u32 %v1700_v19, %v1697_v0 }
  0x9d   : > { %10703 = vst [vmem:[#allocation30_spill] sm:$0xff] %v8864_v21  ;;  %v8878_v55 = vrot.slane %v1704_v42, 5  ;;  %v1710_v1 = vrot.slane %v1708_v51, 4  ;;  %v1728_v45 = vshll.u32 %v8864_v21, 16  ;;  %v1732_v17 = vshrl.u32 %v8864_v21, 16 }
  0x9e   : > { %v1668_v25 = vrot.slane %v1666_v56, 5  ;;  %v1692_v42 = vrot.slane %v1690_v2, 5  ;;  %v6774_v51 = vld [vmem:[%s8452_s12 + $0x78] sm:$0xf]  ;;  %v1714_v21 = vshll.u32 %v8881_v62, 16  ;;  %v1724_v28 = vrot.slane %v1722_v49, 5 }
  0x9f   : > { %v1711_v14 = vor.u32 %v1710_v1, %v8878_v55  ;;  %v8892_v38 = vld [vmem:[%s8452_s12 + $0x7c] sm:$0xf]  ;;  %v498_v32 = vshrl.u32 %v8517_v23, 16  ;;  %v509_v9 = vshrl.u32 %v8526_v26, 16  ;;  %v1743_v20 = vshrl.u32 %v6774_v51, 16 }
  0xa0   : > { %v1746_v56 = vshll.u32 %v6774_v51, 16  ;;  %v1659_v53 = vsel %vm8768_vm7, %v1654_v24, %v8835_v6  ;;  %v1669_v58 = vsel %vm8768_vm7, %v1664_v46, %v1668_v25  ;;  %v1752_v49 = vshll.u32 %v8892_v38, 16  ;;  %v8919_v24 = vld [vmem:[%s8452_s12 + $0x80] sm:$0x1] }
  0xa1   : > { %v1756_v2 = vshrl.u32 %v8892_v38, 16  ;;  %v1683_v0 = vsel %vm8768_vm7, %v1678_v12, %v8840_v52  ;;  %v1716_v19 = vrot.slane %v1714_v21, 5  ;;  %v1738_v1 = vshll.u32 %v8895_v11, 16 }
  0xa2   : > { %7514 = vmatmul.mubr.msk.bf16.vlgmr.msra.gmra.mrb[0].mxu0 %vm10668_vm1, %v6779_v16  ;;  %v1719_v16 = vshrl.u32 %v6771_v57, 16  ;;  %v1688_v57 = vrot.slane %v1687_v54, 4  ;;  %v1702_v54 = vrot.slane %v1701_v34, 4  ;;  %v1745_v25 = vrot.slane %v1743_v20, 4 }
  0xa3   : > { %7534 = vmatpush3.bf16.msra.mxu0 %v8690_v3  ;;  %7517 = vmatprep.mubr.msk.bf16.mxu0 %vm10668_vm1, %v6780_v60  ;;  %v488_v3 = vshll.u32 %v8514_v22, 16  ;;  %v6781_v60 = vcombine.low %v1611_v36, %v1621_v50  ;;  %v8897_v36 = vrot.slane %v1728_v45, 5  ;;  %v1734_v50 = vrot.slane %v1732_v17, 4 }
  0xa4   : > { %8077 = vmatprep.subr.msk.bf16.mxu0 %vm10669_vm0, %v8869_v61  ;;  %v1721_v35 = vrot.slane %v1719_v16, 4  ;;  %v1693_v6 = vsel %vm8768_vm7, %v1688_v57, %v1692_v42  ;;  %v1712_v16 = vrot.slane %v1711_v14, 4  ;;  %v2006_v52 = vrot.slane %v8683_v63, 5 }
  0xa5   : > { %v1735_v17 = vor.u32 %v1734_v50, %v8897_v36  ;;  %v10704_v34 = vshrl.u32 %v8514_v22, 16  ;;  %v6783_v46 = vcombine.low %v1659_v53, %v1669_v58  ;;  %v8926_v12 = vrot.slane %v1752_v49, 5 }
  0xa6   : > { %v1725_v45 = vor.u32 %v1724_v28, %v1721_v35  ;;  %v1758_v14 = vrot.slane %v1756_v2, 4  ;;  %v6798_v28 = vld [vmem:[%s8452_s12 + $0xc] sm:$0xe]  ;;  %v8929_v35 = vrot.slane %v488_v3, 5  ;;  %v6784_v42 = vcombine.low %v1683_v0, %v1693_v6  ;;  %v6799_v3 = vld [vmem:[%s8452_s12 + $0x18] sm:$0xe] }
  0xa7   : > { %v8924_v21 = vrot.slane %v10704_v34, 4  ;;  %v1740_v51 = vrot.slane %v1738_v1, 5  ;;  %v1717_v63 = vsel %vm8768_vm7, %v1712_v16, %v1716_v19  ;;  %v1736_v57 = vrot.slane %v1735_v17, 4 }
  0xa8   : > { %v1726_v22 = vrot.slane %v1725_v45, 4  ;;  %v1762_v50 = vshll.u32 %v8919_v24, 16  ;;  %v2008_v53 = vrot.slane %v2006_v52, 4  ;;  %v2009_v58 = vrot.slane %v8723_v48, 5 }
  0xa9   : > { %v8939_v49 = vrot.slane %v509_v9, 4  ;;  %v522_v2 = vshrl.u32 %v8529_v27, 16  ;;  %v2013_v0 = vrot.slane %v8714_v40, 5  ;;  %v533_v19 = vshrl.u32 %v8533_v29, 16 }
  0xaa   : > { %7518 = vmatmul.mubr.msk.bf16.gmra.mrb[4].mxu0 %vm10668_vm1, %v6781_v60  ;;  %v512_v60 = vshll.u32 %v8526_v26, 16  ;;  %v1707_v26 = vsel %vm8768_vm7, %v1702_v54, %v8878_v55  ;;  %v1759_v55 = vor.u32 %v1758_v14, %v8926_v12  ;;  %v536_v1 = vshll.u32 %v8533_v29, 16 }
  0xab   : > { %7521 = vmatprep.mubr.msk.bf16.mxu0 %vm10668_vm1, %v6782_v8  ;;  %v1748_v8 = vrot.slane %v1746_v56, 5  ;;  %v6808_v56 = vrot.slane %v6798_v28, 9  ;;  %v546_v6 = vshrl.u32 %v8536_v30, 16  ;;  %v6785_v48 = vcombine.low %v1707_v26, %v1717_v63  ;;  %v6800_v26 = vld [vmem:[%s8452_s12 + $0x24] sm:$0xe] }
  0xac   : > { %v8945_v54 = vrot.slane %v512_v60, 5  ;;  %v1731_v9 = vsel %vm8768_vm7, %v1726_v22, %v8897_v36  ;;  %v1741_v16 = vsel %vm8768_vm7, %v1736_v57, %v1740_v51  ;;  %v6809_v40 = vrot.slane %v6799_v3, 9 }
  0xad   : > { %v1749_v20 = vor.u32 %v1748_v8, %v1745_v25  ;;  %v1764_v17 = vrot.slane %v1762_v50, 5  ;;  %v8958_v60 = vsel %vm8547_vm4, %v6808_v56, %v2006_v52  ;;  %v8962_v29 = vsel %vm8547_vm4, %v2008_v53, %v2009_v58 }
  0xae   : > { %v1760_v25 = vrot.slane %v1759_v55, 4  ;;  %v2015_v8 = vrot.slane %v2013_v0, 4  ;;  %v2016_v34 = vrot.slane %v8746_v39, 5  ;;  %v350_v36 = vshll.u32 %v8458_v4, 16 }
  0xaf   : > { %v1750_v45 = vrot.slane %v1749_v20, 4  ;;  %v8968_v14 = vrot.slane %v536_v1, 5  ;;  %v557_v28 = vshrl.u32 %v8554_v41, 16  ;;  %v560_v52 = vshll.u32 %v8554_v41, 16 }
  0xb0   : > { %v6819_v51 = vcombine.low %v8958_v60, %v8962_v29  ;;  %v8977_v63 = vsel %vm8547_vm4, %v6809_v40, %v2013_v0  ;;  %v347_v39 = vor.u32 %v8694_v5, %v8692_v10  ;;  %v352_v57 = vrot.slane %v350_v36, 5  ;;  %v6634_v5 = vld [vmem:[%s10644_s1 + $0x2] sm:$0x3] }
  0xb1   : > { %v1755_v22 = vsel %vm8768_vm7, %v1750_v45, %v8926_v12  ;;  %v10705_v50 = vshrl.u32 %v8458_v4, 16  ;;  %v360_v56 = vshll.u32 %v8539_v31, 16  ;;  %v1765_v53 = vsel %vm8768_vm7, %v1760_v25, %v1764_v17  ;;  %8071 = vmatprep.subr.msk.bf16.mxu1 %vm10669_vm0, %v6634_v5 }
  0xb2   : > { %7522 = vmatmul.mubr.msk.bf16.gmra.mrb[8].mxu0 %vm10668_vm1, %v6783_v46  ;;  %v8966_v46 = vrot.slane %v533_v19, 4  ;;  %v8992_v58 = vsel %vm8547_vm4, %v2015_v8, %v2016_v34  ;;  %v6810_v10 = vrot.slane %v6800_v26, 9  ;;  %v348_v12 = vrot.slane %v347_v39, 4  ;;  %v6801_v19 = vld [vmem:[%s8452_s12 + $0x30] sm:$0xe] }
  0xb3   : > { %7525 = vmatprep.mubr.msk.bf16.mxu0 %vm10668_vm1, %v6784_v42  ;;  %v6786_v42 = vcombine.low %v1731_v9, %v1741_v16  ;;  %v356_v20 = vrot.slane %v10705_v50, 4  ;;  %v645_v4 = vsel %vm10669_vm0, %v6634_v5, 0  ;;  %v362_v3 = vrot.slane %v360_v56, 5  ;;  %v10708_v50 = vld [vmem:[#allocation16_spill] sm:$0xff]  ;;  %v8216_v56 = vld [vmem:[%s8452_s12 + $0x1c] sm:$0xf] }
  0xb4   : > { %v371_v55 = vor.u32 %v8698_v18, %v8696_v13  ;;  %v2020_v0 = vrot.slane %v8720_v47, 5  ;;  %v2027_v1 = vrot.slane %v8762_v33, 5  ;;  %7424 = vmatpush3.bf16.msra.mxu1 %v645_v4  ;;  %v374_v9 = vshll.u32 %v8466_v7, 16  ;;  %v6802_v33 = vld [vmem:[%s8452_s12 + $0x3c] sm:$0xe]  ;;  %v10711_v4 = vld [vmem:[#allocation21_spill] sm:$0xff] }
  0xb5   : > { %v357_v31 = vor.u32 %v356_v20, %v352_v57  ;;  %v10706_v45 = vshrl.u32 %v8466_v7, 16  ;;  %v384_v60 = vshll.u32 %v8560_v43, 16  ;;  %v6787_v29 = vcombine.low %v1755_v22, %v1765_v53 }
  0xb6   : > { %v372_v40 = vrot.slane %v371_v55, 4  ;;  %v2376_v13 = vsel %vm10669_vm0, %v8869_v61, 0  ;;  %v2023_v18 = vrot.slane %v8752_v44, 5  ;;  %v376_v47 = vrot.slane %v374_v9, 5 }
  0xb7   : > { %v358_v16 = vrot.slane %v357_v31, 4  ;;  %v380_v17 = vrot.slane %v10706_v45, 4  ;;  %v6820_v25 = vcombine.low %v8977_v63, %v8992_v58  ;;  %v6811_v8 = vrot.slane %v6801_v19, 9  ;;  %v6803_v63 = vld [vmem:[%s8452_s12 + $0x48] sm:$0xe]  ;;  %v10709_v58 = vld [vmem:[#allocation7_spill] sm:$0xff] }
  0xb8   : > { %v2030_v34 = vrot.slane %v8791_v15, 5  ;;  %v2022_v43 = vrot.slane %v2020_v0, 4  ;;  %v386_v26 = vrot.slane %v384_v60, 5  ;;  %v2021_v44 = vsel %vm8547_vm4, %v6810_v10, %v2020_v0  ;;  %v10713_v0 = vld [vmem:[#allocation11_spill] sm:$0xff]  ;;  %v10714_v45 = vld [vmem:[#allocation24_spill] sm:$0xff]  ;;  %v10715_v60 = vld [vmem:[#allocation17_spill] sm:$0xff] }
  0xb9   : > { %v363_v7 = vsel %vm8768_vm7, %v358_v16, %v362_v3  ;;  %v2029_v61 = vrot.slane %v2027_v1, 4  ;;  %v6812_v39 = vrot.slane %v6802_v33, 9  ;;  %v377_v22 = vsel %vm8768_vm7, %v372_v40, %v376_v47  ;;  %v10712_v3 = vld [vmem:[#allocation22_spill] sm:$0xff] }
  0xba   : > { %7526 = vmatmul.mubr.msk.bf16.gmra.mrb[12].mxu0 %vm10668_vm1, %v6785_v48  ;;  %v353_v48 = vsel %vm8768_vm7, %v348_v12, %v352_v57  ;;  %v10707_v57 = vld [vmem:[#allocation15_spill] sm:$0xff]  ;;  %v398_v53 = vshll.u32 %v8216_v56, 16  ;;  %v10710_v5 = vshrl.u32 %v10709_v58, 16  ;;  %v9035_v10 = vsel %vm8547_vm4, %v6811_v8, %v2027_v1 }
  0xbb   : > { %7529 = vmatprep.mubr.msk.bf16.mxu0 %vm10668_vm1, %v6786_v42  ;;  %v6635_v36 = vcombine.low %v353_v48, %v363_v7  ;;  %v381_v42 = vor.u32 %v380_v17, %v376_v47  ;;  %v395_v20 = vor.u32 %v10708_v50, %v10707_v57  ;;  %v2034_v31 = vrot.slane %v10711_v4, 5  ;;  %v6804_v50 = vld [vmem:[%s8452_s12 + $0x54] sm:$0xe]  ;;  %v9071_v4 = vld [vmem:[%s10644_s1 + $0xe] sm:$0x3] }
  0xbc   : > { %v404_v12 = vrot.slane %v10710_v5, 4  ;;  %v2037_v55 = vrot.slane %v10712_v3, 5  ;;  %v408_v19 = vshll.u32 %v10713_v0, 16  ;;  %v2024_v48 = vsel %vm8547_vm4, %v2022_v43, %v2023_v18  ;;  %v8217_v18 = vld [vmem:[%s8452_s12 + $0x28] sm:$0xf]  ;;  %v10720_v5 = vld [vmem:[#allocation27_spill] sm:$0xff] }
  0xbd   : > { %7425 = vmatprep.mubr.msk.bf16.mxu1 %vm10668_vm1, %v6635_v36  ;;  %v382_v15 = vrot.slane %v381_v42, 4  ;;  %v396_v16 = vrot.slane %v395_v20, 4  ;;  %v6813_v40 = vrot.slane %v6803_v63, 9  ;;  %v2041_v17 = vrot.slane %v10714_v45, 5  ;;  %v6805_v0 = vld [vmem:[%s8452_s12 + $0x60] sm:$0xe] }
  0xbe   : > { %v9049_v47 = vsel %vm8547_vm4, %v2029_v61, %v2030_v34  ;;  %v410_v7 = vrot.slane %v408_v19, 5  ;;  %v422_v43 = vshll.u32 %v8217_v18, 16  ;;  %v6821_v36 = vcombine.low %v2021_v44, %v2024_v48  ;;  %v10722_v45 = vld [vmem:[#allocation19_spill] sm:$0xff]  ;;  %v10727_v18 = vld [vmem:[#allocation13_spill] sm:$0xff] }
  0xbf   : > { %v387_v9 = vsel %vm8768_vm7, %v382_v15, %v386_v26  ;;  %v2036_v42 = vrot.slane %v2034_v31, 4  ;;  %v10717_v26 = vld [vmem:[#allocation8_spill] sm:$0xff]  ;;  %v2035_v44 = vsel %vm8547_vm4, %v6812_v39, %v2034_v31  ;;  %v9065_v58 = vsel %vm8547_vm4, %v6813_v40, %v2041_v17 }
  0xc0   : > { %v6636_v1 = vcombine.low %v377_v22, %v387_v9  ;;  %v10718_v63 = vshrl.u32 %v10717_v26, 16  ;;  %v10719_v22 = vld [vmem:[#allocation12_spill] sm:$0xff]  ;;  %v424_v56 = vrot.slane %v422_v43, 5  ;;  %v2043_v3 = vrot.slane %v2041_v17, 4  ;;  %v10721_v9 = vld [vmem:[#allocation25_spill] sm:$0xff] }
  0xc1   : > { %v432_v57 = vshll.u32 %v10719_v22, 16  ;;  %v2038_v19 = vsel %vm8547_vm4, %v2036_v42, %v2037_v55  ;;  %v6814_v48 = vrot.slane %v6804_v50, 9  ;;  %v10723_v17 = vld [vmem:[#allocation20_spill] sm:$0xff]  ;;  %v456_v43 = vshll.u32 %v10727_v18, 16 }
  0xc2   : > { %7530 = vmatmul.mubr.msk.bf16.gmra.mrb[16].mxu0 %vm10668_vm1, %v6787_v29  ;;  %v10716_v29 = vld [vmem:[#allocation18_spill] sm:$0xff]  ;;  %7426 = vmatmul.mubr.msk.bf16.vlgmr.msra.gmra.mrb[0].mxu1 %vm10668_vm1, %v6636_v1  ;;  %v428_v15 = vrot.slane %v10718_v63, 4  ;;  %v8218_v1 = vld [vmem:[%s8452_s12 + $0x34] sm:$0xf]  ;;  %v10728_v63 = vld [vmem:[#allocation23_spill] sm:$0xff]  ;;  %v524_v23 = vrot.slane %v522_v2, 4 }
  0xc3   : > { %7535 = vmatprep.mubr.msk.bf16.mxu0 %vm10668_vm1, %v6819_v51  ;;  %v400_v51 = vrot.slane %v398_v53, 5  ;;  %v419_v33 = vor.u32 %v10716_v29, %v10715_v60  ;;  %v6822_v53 = vcombine.low %v9035_v10, %v9049_v47  ;;  %v434_v31 = vrot.slane %v432_v57, 5  ;;  %v10724_v29 = vld [vmem:[#allocation28_spill] sm:$0xff]  ;;  %v10725_v47 = vld [vmem:[#allocation9_spill] sm:$0xff] }
  0xc4   : > { %v429_v39 = vor.u32 %v428_v15, %v424_v56  ;;  %v446_v60 = vshll.u32 %v8218_v1, 16  ;;  %v2051_v55 = vrot.slane %v10724_v29, 5  ;;  %v10729_v15 = vld [vmem:[#allocation29_spill] sm:$0xff]  ;;  %v9100_v50 = vld [vmem:[%s8452_s12 + $0x6c] sm:$0xe]  ;;  %v2072_v41 = vrot.slane %v8919_v24, 5 }
  0xc5   : > { %v405_v8 = vor.u32 %v404_v12, %v400_v51  ;;  %v401_v20 = vsel %vm8768_vm7, %v396_v16, %v400_v51  ;;  %v420_v61 = vrot.slane %v419_v33, 4  ;;  %v2044_v12 = vrot.slane %v10720_v5, 5  ;;  %v8220_v18 = vld [vmem:[%s8452_s12 + $0x4c] sm:$0xf] }
  0xc6   : > { %v2048_v16 = vrot.slane %v10721_v9, 5  ;;  %v430_v40 = vrot.slane %v429_v39, 4  ;;  %v6815_v33 = vrot.slane %v6805_v0, 9  ;;  %v467_v22 = vor.u32 %v10729_v15, %v10728_v63  ;;  %v8219_v0 = vld [vmem:[%s8452_s12 + $0x40] sm:$0xf] }
  0xc7   : > { %v406_v34 = vrot.slane %v405_v8, 4  ;;  %v10726_v8 = vshrl.u32 %v10725_v47, 16  ;;  %v2045_v42 = vsel %vm8547_vm4, %v2043_v3, %v2044_v12  ;;  %v10733_v12 = vld [vmem:[#allocation14_spill] sm:$0xff]  ;;  %v2058_v9 = vrot.slane %v8881_v62, 5 }
  0xc8   : > { %v435_v26 = vsel %vm8768_vm7, %v430_v40, %v434_v31  ;;  %v2050_v57 = vrot.slane %v2048_v16, 4  ;;  %v480_v3 = vshll.u32 %v10733_v12, 16  ;;  %v6824_v31 = vcombine.low %v9065_v58, %v2045_v42  ;;  %v10734_v62 = vld [vmem:[#allocation30_spill] sm:$0xff] }
  0xc9   : > { %v411_v10 = vsel %vm8768_vm7, %v406_v34, %v410_v7  ;;  %v452_v7 = vrot.slane %v10726_v8, 4  ;;  %v458_v40 = vrot.slane %v456_v43, 5  ;;  %v2062_v1 = vrot.slane %v10734_v62, 5 }
  0xca   : > { %7536 = vmatmul.mubr.msk.bf16.vlgmr.msra.gmra.mrb[0].mxu0 %vm10668_vm1, %v6820_v25  ;;  %v6637_v51 = vcombine.low %v401_v20, %v411_v10  ;;  %v425_v25 = vsel %vm8768_vm7, %v420_v61, %v424_v56  ;;  %v448_v61 = vrot.slane %v446_v60, 5  ;;  %v10730_v56 = vld [vmem:[#allocation26_spill] sm:$0xff]  ;;  %v470_v10 = vshll.u32 %v8219_v0, 16 }
  0xcb   : > { %7556 = vmatpush3.bf16.msra.mxu0 %v2376_v13  ;;  %7539 = vmatprep.mubr.msk.bf16.mxu0 %vm10668_vm1, %v6821_v36  ;;  %v443_v13 = vor.u32 %v10723_v17, %v10722_v45  ;;  %v6823_v36 = vcombine.low %v2035_v44, %v2038_v19  ;;  %v6638_v20 = vcombine.low %v425_v25, %v435_v26  ;;  %v2055_v5 = vrot.slane %v10730_v56, 5  ;;  %v10731_v44 = vld [vmem:[#allocation10_spill] sm:$0xff] }
  0xcc   : > { %8078 = vmatprep.subr.msk.bf16.mxu0 %vm10669_vm0, %v9071_v4  ;;  %7429 = vmatprep.mubr.msk.bf16.mxu1 %vm10668_vm1, %v6637_v51  ;;  %v10732_v39 = vshrl.u32 %v10731_v44, 16  ;;  %v453_v51 = vor.u32 %v452_v7, %v448_v61  ;;  %v2049_v25 = vsel %vm8547_vm4, %v6814_v48, %v2048_v16  ;;  %v6816_v45 = vrot.slane %v9100_v50, 9 }
  0xcd   : > { %v444_v34 = vrot.slane %v443_v13, 4  ;;  %7430 = vmatmul.mubr.msk.bf16.gmra.mrb[4].mxu1 %vm10668_vm1, %v6638_v20  ;;  %v468_v17 = vrot.slane %v467_v22, 4  ;;  %v472_v13 = vrot.slane %v470_v10, 5  ;;  %v2052_v58 = vsel %vm8547_vm4, %v2050_v57, %v2051_v55  ;;  %v8222_v20 = vld [vmem:[%s8452_s12 + $0x58] sm:$0xf] }
  0xce   : > { %v476_v19 = vrot.slane %v10732_v39, 4  ;;  %v454_v29 = vrot.slane %v453_v51, 4  ;;  %v2057_v48 = vrot.slane %v2055_v5, 4  ;;  %v482_v47 = vrot.slane %v480_v3, 5  ;;  %v8223_v39 = vld [vmem:[%s8452_s12 + $0x5c] sm:$0x1] }
  0xcf   : > { %v449_v60 = vsel %vm8768_vm7, %v444_v34, %v448_v61  ;;  %v2065_v8 = vrot.slane %v8895_v11, 5  ;;  %v491_v55 = vor.u32 %v8929_v35, %v8924_v21  ;;  %v494_v43 = vshll.u32 %v8220_v18, 16  ;;  %v8221_v35 = vld [vmem:[%s8452_s12 + $0x50] sm:$0x1] }
  0xd0   : > { %v477_v16 = vor.u32 %v476_v19, %v472_v13  ;;  %v459_v7 = vsel %vm8768_vm7, %v454_v29, %v458_v40  ;;  %v2064_v63 = vrot.slane %v2062_v1, 4  ;;  %v500_v11 = vrot.slane %v498_v32, 4  ;;  %v6807_v32 = vld [vmem:[%s8452_s12 + $0x78] sm:$0xe] }
  0xd1   : > { %v6639_v42 = vcombine.low %v449_v60, %v459_v7  ;;  %v492_v15 = vrot.slane %v491_v55, 4  ;;  %v496_v22 = vrot.slane %v494_v43, 5  ;;  %v504_v57 = vshll.u32 %v8221_v35, 16  ;;  %v8225_v60 = vld [vmem:[%s8452_s12 + $0x70] sm:$0xf] }
  0xd2   : > { %7540 = vmatmul.mubr.msk.bf16.gmra.mrb[4].mxu0 %vm10668_vm1, %v6822_v53  ;;  %v9122_v53 = vsel %vm8547_vm4, %v6815_v33, %v2055_v5  ;;  %v473_v33 = vsel %vm8768_vm7, %v468_v17, %v472_v13  ;;  %v478_v26 = vrot.slane %v477_v16, 4  ;;  %v515_v50 = vor.u32 %v8945_v54, %v8939_v49 }
  0xd3   : > { %7543 = vmatprep.mubr.msk.bf16.mxu0 %vm10668_vm1, %v6823_v36  ;;  %v6825_v36 = vcombine.low %v2049_v25, %v2052_v58  ;;  %7433 = vmatprep.mubr.msk.bf16.mxu1 %vm10668_vm1, %v6639_v42  ;;  %v518_v34 = vshll.u32 %v8222_v20, 16  ;;  %v2059_v61 = vsel %vm8547_vm4, %v2057_v48, %v2058_v9  ;;  %v501_v5 = vor.u32 %v500_v11, %v496_v22  ;;  %v8182_v11 = vld [vmem:[%s8452_s12 + $0x18] sm:$0xff]  }
  0xd4   : > { %v483_v21 = vsel %vm8768_vm7, %v478_v26, %v482_v47  ;;  %v506_v0 = vrot.slane %v504_v57, 5  ;;  %v516_v10 = vrot.slane %v515_v50, 4  ;;  %v528_v19 = vshll.u32 %v8223_v39, 16  ;;  %v8186_v39 = vld [vmem:[%s8452_s12 + $0x48] sm:$0xff]  }
  0xd5   : > { %v6640_v56 = vcombine.low %v473_v33, %v483_v21  ;;  %v520_v44 = vrot.slane %v518_v34, 5  ;;  %v559_v49 = vrot.slane %v557_v28, 4  ;;  %v2069_v54 = vrot.slane %v8892_v38, 5  ;;  %v8227_v33 = vld [vmem:[%s8452_s12 + $0x74] sm:$0x1] }
  0xd6   : > { %v497_v27 = vsel %vm8768_vm7, %v492_v15, %v496_v22  ;;  %v502_v2 = vrot.slane %v501_v5, 4  ;;  %v2063_v12 = vsel %vm8547_vm4, %v6816_v45, %v2062_v1  ;;  %v2066_v3 = vsel %vm8547_vm4, %v2064_v63, %v2065_v8  ;;  %v8183_v5 = vld [vmem:[%s8452_s12 + $0x24] sm:$0xff]  }
  0xd7   : > { %7434 = vmatmul.mubr.msk.bf16.gmra.mrb[8].mxu1 %vm10668_vm1, %v6640_v56  ;;  %v530_v28 = vrot.slane %v528_v19, 5  ;;  %v562_v9 = vrot.slane %v560_v52, 5  ;;  %v6826_v38 = vcombine.low %v9122_v53, %v2059_v61  ;;  %v6817_v51 = vrot.slane %v6807_v32, 9  ;;  %v8224_v52 = vld [vmem:[%s8452_s12 + $0x64] sm:$0xf] }
  0xd8   : > { %v507_v40 = vsel %vm8768_vm7, %v502_v2, %v506_v0  ;;  %v521_v17 = vsel %vm8768_vm7, %v516_v10, %v520_v44  ;;  %v539_v13 = vor.u32 %v8968_v14, %v8966_v46  ;;  %v6827_v58 = vcombine.low %v2063_v12, %v2066_v3  ;;  %v8226_v14 = vld [vmem:[%s8452_s12 + $0x68] sm:$0x1]  ;;  %v9205_v0 = vld [vmem:[%s10644_s1 + $0x10] sm:$0x3]  ;;  %v8185_v10 = vld [vmem:[%s8452_s12 + $0x3c] sm:$0xff]  }
  0xd9   : > { %v6641_v25 = vcombine.low %v497_v27, %v507_v40  ;;  %v2071_v62 = vrot.slane %v2069_v54, 4  ;;  %v542_v1 = vshll.u32 %v8224_v52, 16  ;;  %v570_v29 = vshrl.u32 %v8225_v60, 16  ;;  %v6883_v19 = vld [vmem:[%s8452_s12 + $0x24] sm:$0xf] }
  0xda   : > { %7544 = vmatmul.mubr.msk.bf16.gmra.mrb[8].mxu0 %vm10668_vm1, %v6824_v31  ;;  %v525_v31 = vor.u32 %v524_v23, %v520_v44  ;;  %v548_v48 = vrot.slane %v546_v6, 4  ;;  %v540_v47 = vrot.slane %v539_v13, 4  ;;  %v552_v8 = vshll.u32 %v8226_v14, 16  ;;  %v8184_v23 = vld [vmem:[%s8452_s12 + $0x30] sm:$0xff]   ;;  %v6880_v44 = vld [vmem:[%s8452_s12 + $0x18] sm:$0xf] }
  0xdb   : > { %7547 = vmatprep.mubr.msk.bf16.mxu0 %vm10668_vm1, %v6825_v36  ;;  %7437 = vmatprep.mubr.msk.bf16.mxu1 %vm10668_vm1, %v6641_v25  ;;  %v544_v46 = vrot.slane %v542_v1, 5  ;;  %v2070_v24 = vsel %vm8547_vm4, %v6817_v51, %v2069_v54  ;;  %v2073_v7 = vsel %vm8547_vm4, %v2071_v62, %v2072_v41  ;;  %v563_v55 = vor.u32 %v562_v9, %v559_v49  ;;  %v9223_v12 = vld [vmem:[%s8452_s12 + $0x28] sm:$0xf]  ;;  %v6886_v51 = vld [vmem:[%s8452_s12 + $0x30] sm:$0xf] }
  0xdc   : > { %v526_v45 = vrot.slane %v525_v31, 4  ;;  %v554_v6 = vrot.slane %v552_v8, 5  ;;  %v566_v18 = vshll.u32 %v8225_v60, 16  ;;  %v572_v43 = vrot.slane %v570_v29, 4  ;;  %v9232_v13 = vld [vmem:[%s8452_s12 + $0x34] sm:$0xf] }
  0xdd   : > { %v549_v30 = vor.u32 %v548_v48, %v544_v46  ;;  %v545_v36 = vsel %vm8768_vm7, %v540_v47, %v544_v46  ;;  %v576_v26 = vshll.u32 %v8227_v33, 16  ;;  %v6828_v63 = vcombine.low %v2070_v24, %v2073_v7  ;;  %v9236_v62 = vld [vmem:[%s8452_s12 + $0x20] sm:$0x1]  ;;  %v9239_v1 = vld [vmem:[%s8452_s12 + $0x2c] sm:$0x1] }
  0xde   : > { %v531_v53 = vsel %vm8768_vm7, %v526_v45, %v530_v28  ;;  %v564_v15 = vrot.slane %v563_v55, 4  ;;  %v568_v22 = vrot.slane %v566_v18, 5  ;;  %v2844_v32 = vsel %vm10669_vm0, %v9071_v4, 0  ;;  %v9215_v4 = vld [vmem:[%s8452_s12 + $0x1c] sm:$0xf]  ;;  %v8187_v28 = vld [vmem:[%s8452_s12 + $0x54] sm:$0xff]  }
  0xdf   : > { %v6642_v16 = vcombine.low %v521_v17, %v531_v53  ;;  %v550_v42 = vrot.slane %v549_v30, 4  ;;  %v578_v50 = vrot.slane %v576_v26, 5  ;;  %v2542_v49 = vshrl.u32 %v6880_v44, 16  ;;  %v6889_v47 = vld [vmem:[%s8452_s12 + $0x3c] sm:$0xf] }
  0xe0   : > { %v573_v57 = vor.u32 %v572_v43, %v568_v22  ;;  %v569_v20 = vsel %vm8768_vm7, %v564_v15, %v568_v22  ;;  %v2545_v54 = vshll.u32 %v6880_v44, 16  ;;  %v2551_v27 = vshll.u32 %v9215_v4, 16  ;;  %v9245_v46 = vld [vmem:[%s8452_s12 + $0x40] sm:$0xf]  ;;  %v8189_v15 = vld [vmem:[%s8452_s12 + $0x6c] sm:$0xff]  }
  0xe1   : > { %7438 = vmatmul.mubr.msk.bf16.gmra.mrb[12].mxu1 %vm10668_vm1, %v6642_v16  ;;  %v555_v21 = vsel %vm8768_vm7, %v550_v42, %v554_v6  ;;  %v2555_v2 = vshrl.u32 %v9215_v4, 16  ;;  %v2566_v3 = vshrl.u32 %v6883_v19, 16  ;;  %v2569_v31 = vshll.u32 %v6883_v19, 16 }
  0xe2   : > { %7548 = vmatmul.mubr.msk.bf16.gmra.mrb[12].mxu0 %vm10668_vm1, %v6826_v38  ;;  %v6643_v35 = vcombine.low %v545_v36, %v555_v21  ;;  %v574_v34 = vrot.slane %v573_v57, 4  ;;  %v2544_v9 = vrot.slane %v2542_v49, 4  ;;  %v2547_v38 = vrot.slane %v2545_v54, 5  ;;  %v9261_v57 = vld [vmem:[%s8452_s12 + $0x38] sm:$0x1] }
  0xe3   : > { %7551 = vmatprep.mubr.msk.bf16.mxu0 %vm10668_vm1, %v6827_v58  ;;  %v9227_v40 = vrot.slane %v2551_v27, 5  ;;  %v2557_v25 = vrot.slane %v2555_v2, 4  ;;  %v2575_v17 = vshll.u32 %v9223_v12, 16  ;;  %v2579_v45 = vshrl.u32 %v9223_v12, 16  ;;  %v8188_v58 = vld [vmem:[%s8452_s12 + $0x60] sm:$0xff]  }
  0xe4   : > { %7441 = vmatprep.mubr.msk.bf16.mxu1 %vm10668_vm1, %v6643_v35  ;;  %v579_v61 = vsel %vm8768_vm7, %v574_v34, %v578_v50  ;;  %v2568_v41 = vrot.slane %v2566_v3, 4  ;;  %v2571_v52 = vrot.slane %v2569_v31, 5  ;;  %v2590_v60 = vshrl.u32 %v6886_v51, 16  ;;  %v8190_v50 = vld [vmem:[%s8452_s12 + $0x78] sm:$0xff]   ;;  %v6892_v34 = vld [vmem:[%s8452_s12 + $0x48] sm:$0xf] }
  0xe5   : > { %v6644_v56 = vcombine.low %v569_v20, %v579_v61  ;;  %v2593_v29 = vshll.u32 %v6886_v51, 16  ;;  %v2548_v53 = vor.u32 %v2547_v38, %v2544_v9  ;;  %v2599_v48 = vshll.u32 %v9232_v13, 16  ;;  %v9275_v49 = vld [vmem:[%s8452_s12 + $0x44] sm:$0x1]  ;;  %v6895_v38 = vld [vmem:[%s8452_s12 + $0x54] sm:$0xf] }
  0xe6   : > { %v2603_v16 = vshrl.u32 %v9232_v13, 16  ;;  %v2558_v14 = vor.u32 %v2557_v25, %v9227_v40  ;;  %v2561_v8 = vshll.u32 %v9236_v62, 16  ;;  %v9250_v24 = vrot.slane %v2575_v17, 5  ;;  %v8191_v17 = vld [vmem:[%s8452_s12 + $0x84] sm:$0xff]  }
  0xe7   : > { %v2581_v7 = vrot.slane %v2579_v45, 4  ;;  %v2572_v30 = vor.u32 %v2571_v52, %v2568_v41  ;;  %v2585_v6 = vshll.u32 %v9239_v1, 16  ;;  %v2614_v55 = vshrl.u32 %v6889_v47, 16 }
  0xe8   : > { %v2617_v18 = vshll.u32 %v6889_v47, 16  ;;  %v2623_v43 = vshll.u32 %v9245_v46, 16  ;;  %v2627_v36 = vshrl.u32 %v9245_v46, 16  ;;  %v2592_v42 = vrot.slane %v2590_v60, 4  ;;  %v9291_v60 = vld [vmem:[%s8452_s12 + $0x50] sm:$0x1] }
  0xe9   : > { %7442 = vmatmul.mubr.msk.bf16.gmra.mrb[16].mxu1 %vm10668_vm1, %v6644_v56  ;;  %v2595_v33 = vrot.slane %v2593_v29, 5  ;;  %v9256_v26 = vrot.slane %v2599_v48, 5  ;;  %v2549_v22 = vrot.slane %v2548_v53, 4  ;;  %v2563_v21 = vrot.slane %v2561_v8, 5 }
  0xea   : > { %7552 = vmatmul.mubr.msk.bf16.gmra.mrb[16].mxu0 %vm10668_vm1, %v6828_v63  ;;  %v2605_v63 = vrot.slane %v2603_v16, 4  ;;  %v2582_v35 = vor.u32 %v2581_v7, %v9250_v24  ;;  %v9264_v20 = vrot.slane %v2572_v30, 4  ;;  %v2616_v61 = vrot.slane %v2614_v55, 4  ;;  %v9300_v16 = vld [vmem:[%s8452_s12 + $0x58] sm:$0xf] }
  0xeb   : > { %7557 = vmatprep.mubr.msk.bf16.mxu0 %vm10668_vm1, %v8182_v11  ;;  %v2559_v11 = vrot.slane %v2558_v14, 4  ;;  %v2619_v56 = vrot.slane %v2617_v18, 5  ;;  %v2596_v44 = vor.u32 %v2595_v33, %v2592_v42  ;;  %v2609_v19 = vshll.u32 %v9261_v57, 16  ;;  %v6898_v14 = vld [vmem:[%s8452_s12 + $0x60] sm:$0xf] }
  0xec   : > { %v2554_v54 = vsel %vm8768_vm7, %v2549_v22, %v9227_v40  ;;  %v2583_v2 = vrot.slane %v2582_v35, 4  ;;  %v2638_v3 = vshrl.u32 %v6892_v34, 16  ;;  %v2641_v31 = vshll.u32 %v6892_v34, 16  ;;  %v9306_v55 = vld [vmem:[%s8452_s12 + $0x64] sm:$0xf] }
  0xed   : > { %v2564_v27 = vsel %vm8768_vm7, %v2559_v11, %v2563_v21  ;;  %v2620_v51 = vor.u32 %v2619_v56, %v2616_v61  ;;  %v2633_v40 = vshll.u32 %v9275_v49, 16  ;;  %v2611_v52 = vrot.slane %v2609_v19, 5 }
  0xee   : > { %v6911_v45 = vcombine.low %v2554_v54, %v2564_v27  ;;  %v2578_v29 = vsel %vm8768_vm7, %v9264_v20, %v9250_v24  ;;  %v2640_v48 = vrot.slane %v2638_v3, 4  ;;  %v2662_v47 = vshrl.u32 %v6895_v38, 16  ;;  %v9332_v3 = vld [vmem:[%s8452_s12 + $0x68] sm:$0x1] }
  0xef   : > { %v2643_v8 = vrot.slane %v2641_v31, 5  ;;  %v2621_v18 = vrot.slane %v2620_v51, 4  ;;  %v2657_v24 = vshll.u32 %v9291_v60, 16  ;;  %v2671_v42 = vshll.u32 %v9300_v16, 16 }
  0xf0   : > { %v2675_v33 = vshrl.u32 %v9300_v16, 16  ;;  %v2695_v21 = vshll.u32 %v9306_v55, 16  ;;  %v2699_v35 = vshrl.u32 %v9306_v55, 16  ;;  %v2664_v34 = vrot.slane %v2662_v47, 4 }
  0xf2   : > { %7558 = vmatmul.mubr.msk.bf16.vlgmr.msra.gmra.mrb[0].mxu0 %vm10668_vm1, %v8183_v5  ;;  %v9267_v5 = vrot.slane %v2623_v43, 5  ;;  %v9334_v31 = vrot.slane %v2695_v21, 5 }
  0xf3   : > { %7578 = vmatpush3.bf16.msra.mxu0 %v2844_v32  ;;  %7561 = vmatprep.mubr.msk.bf16.mxu0 %vm10668_vm1, %v8184_v23  ;;  %v2629_v23 = vrot.slane %v2627_v36, 4  ;;  %v9270_v32 = vld [vmem:[%s8452_s12 + $0x4c] sm:$0xf]  ;;  %v2635_v36 = vrot.slane %v2633_v40, 5  ;;  %v9339_v40 = vld [vmem:[%s8452_s12 + $0x70] sm:$0xf] }
  0xf4   : > { %8079 = vmatprep.subr.msk.bf16.mxu0 %vm10669_vm0, %v9205_v0  ;;  %v2651_v9 = vshrl.u32 %v9270_v32, 16 }
  0xf5   : > { %v2630_v25 = vor.u32 %v2629_v23, %v9267_v5  ;;  %v2659_v23 = vrot.slane %v2657_v24, 5 }
  0xf6   : > { %v2653_v30 = vrot.slane %v2651_v9, 4 }
  0xf7   : > { %v2631_v43 = vrot.slane %v2630_v25, 4 }
  0xf9   : > { %v2636_v56 = vsel %vm8768_vm7, %v2631_v43, %v2635_v36 }
  0xfa   : > { %7562 = vmatmul.mubr.msk.bf16.gmra.mrb[4].mxu0 %vm10668_vm1, %v8185_v10  ;;  %v2587_v10 = vrot.slane %v2585_v6, 5  ;;  %v2665_v6 = vshll.u32 %v6895_v38, 16 }
  0xfb   : > { %7565 = vmatprep.mubr.msk.bf16.mxu0 %vm10668_vm1, %v8186_v39  ;;  %v2606_v39 = vor.u32 %v2605_v63, %v9256_v26  ;;  %v2686_v63 = vshrl.u32 %v6898_v14, 16 }
  0xfc   : > { %v2588_v53 = vsel %vm8768_vm7, %v2583_v2, %v2587_v10  ;;  %v2667_v61 = vrot.slane %v2665_v6, 5  ;;  %v9327_v10 = vld [vmem:[%s8452_s12 + $0x5c] sm:$0x1] }
  0xfd   : > { %v2607_v41 = vrot.slane %v2606_v39, 4  ;;  %v2677_v39 = vrot.slane %v2675_v33, 4  ;;  %v2688_v19 = vrot.slane %v2686_v63, 4  ;;  %v6912_v27 = vcombine.low %v2578_v29, %v2588_v53  ;;  %v6904_v53 = vld [vmem:[%s8452_s12 + $0x78] sm:$0xf] }
  0xfe   : > { %v2668_v51 = vor.u32 %v2667_v61, %v2664_v34  ;;  %v2681_v25 = vshll.u32 %v9327_v10, 16  ;;  %v2734_v36 = vshrl.u32 %v6904_v53, 16  ;;  %v2737_v24 = vshll.u32 %v6904_v53, 16  ;;  %v6907_v61 = vld [vmem:[%s8452_s12 + $0x84] sm:$0xf] }
  0xff   : > { %v2612_v11 = vsel %vm8768_vm7, %v2607_v41, %v2611_v52  ;;  %v2705_v52 = vshll.u32 %v9332_v3, 16 }
 0x100   : > { %v2683_v43 = vrot.slane %v2681_v25, 5  ;;  %v2761_v25 = vshll.u32 %v6907_v61, 16 }
 0x102   : > { %7566 = vmatmul.mubr.msk.bf16.gmra.mrb[8].mxu0 %vm10668_vm1, %v8187_v28  ;;  %v2647_v28 = vshll.u32 %v9270_v32, 16 }
 0x103   : > { %7569 = vmatprep.mubr.msk.bf16.mxu0 %vm10668_vm1, %v8188_v58  ;;  %v2597_v58 = vrot.slane %v2596_v44, 4  ;;  %v9329_v44 = vrot.slane %v2671_v42, 5 }
 0x104   : > { %v9303_v7 = vrot.slane %v2647_v28, 5  ;;  %v6901_v28 = vld [vmem:[%s8452_s12 + $0x6c] sm:$0xf] }
 0x105   : > { %v2602_v22 = vsel %vm8768_vm7, %v2597_v58, %v9256_v26  ;;  %v2626_v26 = vsel %vm8768_vm7, %v2621_v18, %v9267_v5  ;;  %v2701_v5 = vrot.slane %v2699_v35, 4  ;;  %v2678_v58 = vor.u32 %v2677_v39, %v9329_v44 }
 0x106   : > { %v2654_v20 = vor.u32 %v2653_v30, %v9303_v7  ;;  %v6913_v2 = vcombine.low %v2602_v22, %v2612_v11  ;;  %v2710_v29 = vshrl.u32 %v6901_v28, 16  ;;  %v2723_v30 = vshrl.u32 %v9339_v40, 16 }
 0x107   : > { %v2702_v47 = vor.u32 %v2701_v5, %v9334_v31  ;;  %v2669_v18 = vrot.slane %v2668_v51, 4  ;;  %v2679_v63 = vrot.slane %v2678_v58, 4  ;;  %v2707_v22 = vrot.slane %v2705_v52, 5  ;;  %v9375_v5 = vld [vmem:[%s8452_s12 + $0x80] sm:$0x1] }
 0x108   : > { %v2655_v38 = vrot.slane %v2654_v20, 4  ;;  %v2712_v11 = vrot.slane %v2710_v29, 4  ;;  %v2725_v20 = vrot.slane %v2723_v30, 4  ;;  %v2753_v52 = vshll.u32 %v9375_v5, 16 }
 0x109   : > { %v2703_v21 = vrot.slane %v2702_v47, 4  ;;  %v2763_v30 = vrot.slane %v2761_v25, 5 }
 0x10a   : > { %7570 = vmatmul.mubr.msk.bf16.gmra.mrb[12].mxu0 %vm10668_vm1, %v8189_v15  ;;  %v2689_v15 = vshll.u32 %v6898_v14, 16  ;;  %v2713_v14 = vshll.u32 %v6901_v28, 16  ;;  %v2660_v6 = vsel %vm8768_vm7, %v2655_v38, %v2659_v23 }
 0x10b   : > { %7573 = vmatprep.mubr.msk.bf16.mxu0 %vm10668_vm1, %v8190_v50  ;;  %v2644_v50 = vor.u32 %v2643_v8, %v2640_v48  ;;  %v9347_v48 = vld [vmem:[%s8452_s12 + $0x7c] sm:$0xf]  ;;  %v2719_v8 = vshll.u32 %v9339_v40, 16 }
 0x10c   : > { %v2691_v54 = vrot.slane %v2689_v15, 5  ;;  %v2743_v42 = vshll.u32 %v9347_v48, 16  ;;  %v2747_v33 = vshrl.u32 %v9347_v48, 16  ;;  %v2715_v35 = vrot.slane %v2713_v14, 5 }
 0x10d   : > { %v2645_v9 = vrot.slane %v2644_v50, 4  ;;  %v2721_v50 = vrot.slane %v2719_v8, 5 }
 0x10e   : > { %v2692_v41 = vor.u32 %v2691_v54, %v2688_v19  ;;  %v2745_v23 = vrot.slane %v2743_v42, 5  ;;  %v2749_v39 = vrot.slane %v2747_v33, 4  ;;  %v9366_v19 = vld [vmem:[%s8452_s12 + $0x88] sm:$0xf]  ;;  %v2674_v54 = vsel %vm8768_vm7, %v2669_v18, %v9329_v44 }
 0x10f   : > { %v2716_v38 = vor.u32 %v2715_v35, %v2712_v11  ;;  %v2726_v51 = vor.u32 %v2725_v20, %v2721_v50  ;;  %v2758_v44 = vshrl.u32 %v6907_v61, 16  ;;  %v2771_v58 = vshrl.u32 %v9366_v19, 16  ;;  %v6931_v20 = vld [vmem:[%s8452_s12 + $0x18] sm:$0xe] }
 0x110   : > { %v2693_v15 = vrot.slane %v2692_v41, 4  ;;  %v3021_v35 = vrot.slane %v9215_v4, 5 }
 0x111   : > { %v2717_v53 = vrot.slane %v2716_v38, 4  ;;  %v2727_v47 = vrot.slane %v2726_v51, 4  ;;  %v2760_v8 = vrot.slane %v2758_v44, 4  ;;  %v6932_v38 = vld [vmem:[%s8452_s12 + $0x24] sm:$0xe] }
 0x112   : > { %7574 = vmatmul.mubr.msk.bf16.gmra.mrb[16].mxu0 %vm10668_vm1, %v8191_v17  ;;  %v3152_v17 = vsel %vm10669_vm0, %v9205_v0, 0  ;;  %v2650_v0 = vsel %vm8768_vm7, %v2645_v9, %v9303_v7  ;;  %v9362_v7 = vld [vmem:[%s8452_s12 + $0x74] sm:$0x1]  ;;  %v2698_v28 = vsel %vm8768_vm7, %v2693_v15, %v9334_v31  ;;  %v2708_v9 = vsel %vm8768_vm7, %v2703_v21, %v2707_v22  ;;  %v6933_v51 = vld [vmem:[%s8452_s12 + $0x30] sm:$0xe] }
 0x113   : > { %7579 = vmatprep.mubr.msk.bf16.mxu0 %vm10668_vm1, %v6911_v45  ;;  %v6914_v45 = vcombine.low %v2626_v26, %v2636_v56  ;;  %v6915_v34 = vcombine.low %v2650_v0, %v2660_v6  ;;  %v2736_v26 = vrot.slane %v2734_v36, 4  ;;  %v2739_v56 = vrot.slane %v2737_v24, 5  ;;  %v9388_v24 = vld [vmem:[%s8452_s12 + $0x8c] sm:$0x1] }
 0x114   : > { %v6917_v31 = vcombine.low %v2698_v28, %v2708_v9  ;;  %v2773_v6 = vrot.slane %v2771_v58, 4  ;;  %v2755_v36 = vrot.slane %v2753_v52, 5  ;;  %v2722_v42 = vsel %vm8768_vm7, %v2717_v53, %v2721_v50 }
 0x115   : > { %v2740_v41 = vor.u32 %v2739_v56, %v2736_v26  ;;  %v2777_v22 = vshll.u32 %v9388_v24, 16  ;;  %v3038_v52 = vrot.slane %v9261_v57, 5  ;;  %v3049_v57 = vrot.slane %v9270_v32, 5 }
 0x117   : > { %v2741_v18 = vrot.slane %v2740_v41, 4  ;;  %v2779_v56 = vrot.slane %v2777_v22, 5  ;;  %v3031_v41 = vrot.slane %v9239_v1, 5  ;;  %v6937_v22 = vld [vmem:[%s8452_s12 + $0x60] sm:$0xe] }
 0x119   : > { %v2746_v11 = vsel %vm8768_vm7, %v2741_v18, %v2745_v23  ;;  %v3045_v18 = vrot.slane %v9275_v49, 5 }
 0x11a   : > { %7580 = vmatmul.mubr.msk.bf16.vlgmr.msra.gmra.mrb[0].mxu0 %vm10668_vm1, %v6912_v27  ;;  %v2684_v27 = vsel %vm8768_vm7, %v2679_v63, %v2683_v43  ;;  %v2764_v63 = vor.u32 %v2763_v30, %v2760_v8 }
 0x11b   : > { %7600 = vmatpush3.bf16.msra.mxu0 %v3152_v17  ;;  %7583 = vmatprep.mubr.msk.bf16.mxu0 %vm10668_vm1, %v6913_v2  ;;  %v2729_v2 = vshll.u32 %v9362_v7, 16  ;;  %v2767_v17 = vshll.u32 %v9366_v19, 16  ;;  %v6916_v29 = vcombine.low %v2674_v54, %v2684_v27  ;;  %v3023_v54 = vrot.slane %v3021_v35, 4 }
 0x11c   : > { %v2765_v61 = vrot.slane %v2764_v63, 4  ;;  %v3024_v27 = vrot.slane %v9236_v62, 5  ;;  %v3035_v62 = vrot.slane %v9232_v13, 5 }
 0x11d   : > { %v2731_v14 = vrot.slane %v2729_v2, 5  ;;  %v2769_v0 = vrot.slane %v2767_v17, 5  ;;  %v3028_v2 = vrot.slane %v9223_v12, 5  ;;  %v6942_v17 = vrot.slane %v6932_v38, 9 }
 0x11e   : > { %v3025_v9 = vsel %vm8547_vm4, %v3023_v54, %v3024_v27  ;;  %v3037_v12 = vrot.slane %v3035_v62, 4  ;;  %v6938_v54 = vld [vmem:[%s8452_s12 + $0x6c] sm:$0xe]  ;;  %v6939_v27 = vld [vmem:[%s8452_s12 + $0x78] sm:$0xe] }
 0x11f   : > { %v2732_v33 = vsel %vm8768_vm7, %v2727_v47, %v2731_v14  ;;  %v2774_v15 = vor.u32 %v2773_v6, %v2769_v0  ;;  %v3030_v58 = vrot.slane %v3028_v2, 4  ;;  %v3029_v13 = vsel %vm8547_vm4, %v6942_v17, %v3028_v2  ;;  %v6934_v47 = vld [vmem:[%s8452_s12 + $0x3c] sm:$0xe]  ;;  %v6935_v14 = vld [vmem:[%s8452_s12 + $0x48] sm:$0xe] }
 0x120   : > { %v6918_v50 = vcombine.low %v2722_v42, %v2732_v33  ;;  %v3039_v1 = vsel %vm8547_vm4, %v3037_v12, %v3038_v52  ;;  %v3056_v33 = vrot.slane %v9300_v16, 5  ;;  %v6948_v2 = vrot.slane %v6938_v54, 9  ;;  %v6940_v17 = vld [vmem:[%s8452_s12 + $0x84] sm:$0xe] }
 0x121   : > { %v2775_v26 = vrot.slane %v2774_v15, 4  ;;  %v6936_v15 = vld [vmem:[%s8452_s12 + $0x54] sm:$0xe]  ;;  %v6949_v38 = vrot.slane %v6939_v27, 9  ;;  %v3087_v12 = vrot.slane %v9388_v24, 5 }
 0x122   : > { %7584 = vmatmul.mubr.msk.bf16.gmra.mrb[4].mxu0 %vm10668_vm1, %v6914_v45  ;;  %v2750_v45 = vor.u32 %v2749_v39, %v2745_v23  ;;  %v6941_v39 = vrot.slane %v6931_v20, 9  ;;  %v2770_v23 = vsel %vm8768_vm7, %v2765_v61, %v2769_v0  ;;  %v6944_v0 = vrot.slane %v6934_v47, 9 }
 0x123   : > { %7587 = vmatprep.mubr.msk.bf16.mxu0 %vm10668_vm1, %v6915_v34  ;;  %v2780_v4 = vsel %vm8768_vm7, %v2775_v26, %v2779_v56  ;;  %v3058_v20 = vrot.slane %v3056_v33, 4  ;;  %v3066_v61 = vrot.slane %v9332_v3, 5  ;;  %v3070_v56 = vrot.slane %v9339_v40, 5 }
 0x124   : > { %v2751_v43 = vrot.slane %v2750_v45, 4  ;;  %v3022_v28 = vsel %vm8547_vm4, %v6941_v39, %v3021_v35  ;;  %v6920_v44 = vcombine.low %v2770_v23, %v2780_v4  ;;  %v6943_v45 = vrot.slane %v6933_v51, 9 }
 0x125   : > { %v6952_v25 = vcombine.low %v3022_v28, %v3025_v9  ;;  %v6946_v35 = vrot.slane %v6936_v15, 9  ;;  %v3077_v3 = vrot.slane %v9347_v48, 5  ;;  %v3072_v28 = vrot.slane %v3070_v56, 4 }
 0x126   : > { %v2756_v21 = vsel %vm8768_vm7, %v2751_v43, %v2755_v36  ;;  %v3036_v53 = vsel %vm8547_vm4, %v6943_v45, %v3035_v62  ;;  %v6945_v43 = vrot.slane %v6935_v14, 9  ;;  %v3052_v36 = vrot.slane %v9291_v60, 5 }
 0x127   : > { %v6919_v34 = vcombine.low %v2746_v11, %v2756_v21  ;;  %v6954_v30 = vcombine.low %v3036_v53, %v3039_v1  ;;  %v3063_v60 = vrot.slane %v9306_v55, 5  ;;  %v3057_v55 = vsel %vm8547_vm4, %v6946_v35, %v3056_v33 }
 0x128   : > { %v3050_v63 = vsel %vm8547_vm4, %v6945_v43, %v3049_v57  ;;  %v3073_v9 = vrot.slane %v9362_v7, 5  ;;  %v3079_v62 = vrot.slane %v3077_v3, 4  ;;  %v3080_v40 = vrot.slane %v9375_v5, 5 }
 0x129   : > { %v3065_v16 = vrot.slane %v3063_v60, 4  ;;  %v3071_v51 = vsel %vm8547_vm4, %v6948_v2, %v3070_v56 }
 0x12a   : > { %7588 = vmatmul.mubr.msk.bf16.gmra.mrb[8].mxu0 %vm10668_vm1, %v6916_v29  ;;  %v3032_v29 = vsel %vm8547_vm4, %v3030_v58, %v3031_v41  ;;  %v3074_v48 = vsel %vm8547_vm4, %v3072_v28, %v3073_v9  ;;  %v3081_v7 = vsel %vm8547_vm4, %v3079_v62, %v3080_v40  ;;  %v6950_v41 = vrot.slane %v6940_v17, 9 }
 0x12b   : > { %7591 = vmatprep.mubr.msk.bf16.mxu0 %vm10668_vm1, %v6917_v31  ;;  %v3042_v31 = vrot.slane %v9245_v46, 5  ;;  %v6953_v8 = vcombine.low %v3029_v13, %v3032_v29  ;;  %v3051_v46 = vrot.slane %v3049_v57, 4  ;;  %v6959_v5 = vcombine.low %v3071_v51, %v3074_v48 }
 0x12d   : > { %v3044_v6 = vrot.slane %v3042_v31, 4  ;;  %v3043_v32 = vsel %vm8547_vm4, %v6944_v0, %v3042_v31  ;;  %v3053_v49 = vsel %vm8547_vm4, %v3051_v46, %v3052_v36  ;;  %v6996_v46 = vld [vmem:[%s10647_s4 + $0x2] sm:$0x3] }
 0x12e   : > { %v6956_v21 = vcombine.low %v3050_v63, %v3053_v49  ;;  %8080 = vmatprep.subr.msk.bf16.mxu1 %vm10669_vm0, %v6996_v46 }
 0x12f   : > { %v3046_v42 = vsel %vm8547_vm4, %v3044_v6, %v3045_v18 }
 0x130   : > { %v6955_v11 = vcombine.low %v3043_v32, %v3046_v42  ;;  %v4111_v42 = vsel %vm10669_vm0, %v6996_v46, 0 }
 0x131   : > { %7622 = vmatpush3.bf16.msra.mxu1 %v4111_v42 }
 0x132   : > { %7592 = vmatmul.mubr.msk.bf16.gmra.mrb[12].mxu0 %vm10668_vm1, %v6918_v50  ;;  %v3059_v50 = vrot.slane %v9327_v10, 5  ;;  %v3067_v10 = vsel %vm8547_vm4, %v3065_v16, %v3066_v61  ;;  %v9540_v16 = vld [vmem:[%s10646_s3] ss:$0 sm:$0xff] }
 0x133   : > { %7595 = vmatprep.mubr.msk.bf16.mxu0 %vm10668_vm1, %v6919_v34  ;;  %v6947_v34 = vrot.slane %v6937_v22, 9  ;;  %v3363_v22 = vstv %s6975_s21 }
 0x134   : > { %v3060_v26 = vsel %vm8547_vm4, %v3058_v20, %v3059_v50  ;;  %v9535_v20 = vld [vmem:[%s10645_s2] ss:$0 sm:$0xff]  ;;  %vm3373_vm10 = vcmp.ge.s32.totalorder %v3363_v22, 0  ;;  %vm3383_vm11 = vcmp.lt.s32.totalorder %v3363_v22, 16  ;;  %v9558_v9 = vadd.s32 5, %v3363_v22 }
 0x135   : > { %v3064_v39 = vsel %vm8547_vm4, %v6947_v34, %v3063_v60  ;;  %v6957_v23 = vcombine.low %v3057_v55, %v3060_v26  ;;  %v3859_v60 = vld [vmem:[%s10647_s4] sm:$0x3]  ;;  %v9571_v48 = vadd.s32 7, %v3363_v22 }
 0x136   : > { %v6958_v4 = vcombine.low %v3064_v39, %v3067_v10  ;;  %8081 = vmatprep.subr.msk.bf16.mxu1 %vm10669_vm0, %v3859_v60  ;;  %v9544_v10 = vadd.s32 2, %v3363_v22 }
 0x13a   : > { %7596 = vmatmul.mubr.msk.bf16.gmra.mrb[16].mxu0 %vm10668_vm1, %v6920_v44  ;;  %v3084_v44 = vrot.slane %v9366_v19, 5 }
 0x13b   : > { %7601 = vmatprep.mubr.msk.bf16.mxu0 %vm10668_vm1, %v6952_v25  ;;  %v3078_v25 = vsel %vm8547_vm4, %v6949_v38, %v3077_v3  ;;  %v9560_v38 = vadd.s32 4, %v3363_v22 }
 0x13c   : > { %v6960_v58 = vcombine.low %v3078_v25, %v3081_v7  ;;  %v3086_v45 = vrot.slane %v3084_v44, 4  ;;  %v3085_v19 = vsel %vm8547_vm4, %v6950_v41, %v3084_v44  ;;  %v9573_v44 = vadd.s32 6, %v3363_v22 }
 0x13e   : > { %v3088_v52 = vsel %vm8547_vm4, %v3086_v45, %v3087_v12 }
 0x13f   : > { %v6961_v13 = vcombine.low %v3085_v19, %v3088_v52  ;;  %v9584_v52 = vsel %vm10669_vm0, %v3859_v60, 0  ;;  %vm3387_vm0 = vcmp.lt.s32.totalorder %v9560_v38, 16 }
 0x142   : > { %7602 = vmatmul.mubr.msk.bf16.vlgmr.msra.gmra.mrb[0].mxu0 %vm10668_vm1, %v6953_v8 }
 0x143   : > { %7605 = vmatprep.mubr.msk.bf16.mxu0 %vm10668_vm1, %v6954_v30 }
 0x14a   : > { %7606 = vmatmul.mubr.msk.bf16.gmra.mrb[4].mxu0 %vm10668_vm1, %v6955_v11  ;;  %v3364_v11 = vadd.s32 1, %v3363_v22 }
 0x14b   : > { %7609 = vmatprep.mubr.msk.bf16.mxu0 %vm10668_vm1, %v6956_v21  ;;  %v9530_v21 = vadd.s32 3, %v3363_v22 }
 0x14c   : > { %vm3374_vm8 = vcmp.ge.s32.totalorder %v3364_v11, 0  ;;  %vm3384_vm9 = vcmp.lt.s32.totalorder %v3364_v11, 16 }
 0x14d   : > { %vm3376_vm12 = vcmp.ge.s32.totalorder %v9530_v21, 0  ;;  %vm3386_vm14 = vcmp.lt.s32.totalorder %v9530_v21, 16  ;;  %vm9552_vm5 = vmand %vm3374_vm8, %vm3384_vm9  ;;  %vm3375_vm8 = vcmp.ge.s32.totalorder %v9544_v10, 0  ;;  %vm3385_vm9 = vcmp.lt.s32.totalorder %v9544_v10, 16 }
 0x152   : > { %7610 = vmatmul.mubr.msk.bf16.gmra.mrb[8].mxu0 %vm10668_vm1, %v6957_v23 }
 0x153   : > { %7613 = vmatprep.mubr.msk.bf16.mxu0 %vm10668_vm1, %v6958_v4 }
 0x15a   : > { %7614 = vmatmul.mubr.msk.bf16.gmra.mrb[12].mxu0 %vm10668_vm1, %v6959_v5  ;;  %v9576_v5 = vadd.s32 9, %v3363_v22 }
 0x15b   : > { %7617 = vmatprep.mubr.msk.bf16.mxu0 %vm10668_vm1, %v6960_v58  ;;  %v9578_v58 = vadd.s32 8, %v3363_v22 }
 0x162   : > { %7618 = vmatmul.mubr.msk.bf16.gmra.mrb[16].mxu0 %vm10668_vm1, %v6961_v13  ;;  %vm9564_vm1 = vmand %vm3373_vm10, %vm3383_vm11 }
 0x163   : > { %vm9602_vm10 = vmand %vm3376_vm12, %vm3386_vm14  ;;  %vm3378_vm14 = vcmp.ge.s32.totalorder %v9558_v9, 0 }
 0x164   : > { %vm9615_vm11 = vmand %vm3714_vm3, %vm3503_vm15 }
 0x165   : > { %vm9622_vm12 = vmor %vm3503_vm15, %vm3504_vm6  ;;  %vm3377_vm6 = vcmp.ge.s32.totalorder %v9560_v38, 0 }
 0x166   : > { %vm9636_vm15 = vmand %vm3375_vm8, %vm3385_vm9  ;;  %vm3390_vm9 = vcmp.lt.s32.totalorder %v9571_v48, 16 }
 0x167   : > { %vm9673_vm8 = vmand %vm3714_vm3, %vm3707_vm2 }
 0x168   : > { %vm9716_vm3 = vmand %vm3377_vm6, %vm3387_vm0  ;;  %vm3380_vm0 = vcmp.ge.s32.totalorder %v9571_v48, 0 }
 0x169   : > { %vm9787_vm6 = vmand %vm3380_vm0, %vm3390_vm9  ;;  %vm3391_vm0 = vcmp.lt.s32.totalorder %v9578_v58, 16 }
 0x195   : > { %v7427_v29 = vpop.f32.mrb[0].mxu1 }
 0x196   : > { %v681_v31 = vpop.f32.mrb[1].mxu1 }
 0x197   : > { %v7428_v53 = vpop.f32.mrb[2].mxu1 }
 0x198   : > { %v684_v1 = vpop.f32.mrb[3].mxu1 }
 0x1a0   : > { %v9488_v47 = vpop.f32.mrb[4].mxu1 }
 0x1a1   : > { %v9490_v24 = vpop.f32.mrb[5].mxu1 }
 0x1a2   : > { %v9492_v57 = vpop.f32.mrb[6].mxu1 }
 0x1a3   : > { %v9494_v14 = vpop.f32.mrb[7].mxu1 }
 0x1aa   : > { %v9496_v8 = vpop.f32.mrb[8].mxu1 }
 0x1ab   : > { %v9498_v30 = vpop.f32.mrb[9].mxu1 }
 0x1ac   : > { %v9500_v0 = vpop.f32.mrb[10].mxu1 }
 0x1ad   : > { %v9502_v6 = vpop.f32.mrb[11].mxu1 }
 0x1b4   : > { %v9504_v18 = vpop.f32.mrb[12].mxu1 }
 0x1b5   : > { %v9506_v43 = vpop.f32.mrb[13].mxu1 }
 0x1b6   : > { %v9511_v36 = vpop.f32.mrb[14].mxu1 }
 0x1b7   : > { %v9514_v32 = vpop.f32.mrb[15].mxu1 }
 0x1bc   : > { %v9517_v33 = vpop.f32.mrb[16].mxu1 }
 0x1bd   : > { %v9519_v63 = vpop.f32.mrb[17].mxu1 }
 0x1be   : > { %v9521_v49 = vpop.f32.mrb[18].mxu1 }
 0x1bf   : > { %v9523_v15 = vpop.f32.mrb[19].mxu1 }
 0x215   : > { %v7603_v35 = vpop.f32.mrb[0].mxu0 }
 0x216   : > { %v7783_v50 = vadd.f32 %v7603_v35, %v7427_v29  ;;  %v3188_v34 = vpop.f32.mrb[1].mxu0 }
 0x217   : > { %v7784_v61 = vadd.f32 %v3188_v34, %v681_v31  ;;  %v7604_v55 = vpop.f32.mrb[2].mxu0 }
 0x218   : > { %v3296_v26 = vmul.f32 %v7783_v50, %v9535_v20  ;;  %v7785_v56 = vadd.f32 %v7604_v55, %v7428_v53  ;;  %v3191_v39 = vpop.f32.mrb[3].mxu0 }
 0x219   : > { %v3294_v54 = vmul.f32 %v7784_v61, %v9535_v20  ;;  %v7786_v3 = vadd.f32 %v3191_v39, %v684_v1 }
 0x21a   : > { %v3323_v27 = vadd.f32 %v9540_v16, %v3296_v26  ;;  %v3297_v23 = vmul.f32 %v7785_v56, %v9535_v20 }
 0x21b   : > { %v3321_v2 = vadd.f32 %v9540_v16, %v3294_v54  ;;  %v3295_v28 = vmul.f32 %v7786_v3, %v9535_v20 }
 0x21c   : > { %v3343_v62 = vmax.f32 %v3323_v27, 0.0  ;;  %v3324_v51 = vadd.f32 %v9540_v16, %v3297_v23  ;;  %v3719_v23 = vld [vmem:[#allocation2 + $0xc] sm:$0xf] }
 0x21d   : > { %v3341_v25 = vmax.f32 %v3321_v2, 0.0  ;;  %v3322_v7 = vadd.f32 %v9540_v16, %v3295_v28  ;;  %v7607_v17 = vpop.f32.mrb[4].mxu0 }
 0x21e   : > { %v3425_v41 = vsel %vm9552_vm5, %v3343_v62, 0.0  ;;  %v3344_v45 = vmax.f32 %v3324_v51, 0.0  ;;  %v7787_v12 = vadd.f32 %v7607_v17, %v9488_v47  ;;  %v3204_v19 = vpop.f32.mrb[5].mxu0 }
 0x21f   : > { %v7205_v13 = vpack.c.bf16 %v3425_v41, %v3425_v41  ;;  %v3423_v29 = vsel %vm9564_vm1, %v3341_v25, 0.0  ;;  %v3342_v31 = vmax.f32 %v3322_v7, 0.0  ;;  %v7788_v53 = vadd.f32 %v3204_v19, %v9490_v24  ;;  %v7608_v1 = vpop.f32.mrb[6].mxu0  ;;  %v3709_v25 = vld [vmem:[#allocation2] sm:$0xf] }
 0x220   : > { %v7203_v46 = vpack.c.bf16 %v3423_v29, %v3423_v29  ;;  %v3426_v42 = vsel %vm9552_vm5, %v3344_v45, 0.0  ;;  %v3300_v22 = vmul.f32 %v7787_v12, %v9535_v20  ;;  %v7789_v47 = vadd.f32 %v7608_v1, %v9492_v57  ;;  %v9593_v11 = vpop.f32.mrb[7].mxu0 }
 0x221   : > { %v3524_v60 = vshrl.u32 %v7205_v13, 16  ;;  %v3527_v35 = vshll.u32 %v7205_v13, 16  ;;  %v7206_v50 = vpack.c.bf16 %v3426_v42, %v3426_v42  ;;  %v3424_v34 = vsel %vm9564_vm1, %v3342_v31, 0.0  ;;  %vm9609_vm1 = vmand %vm3706_vm13, %vm3707_vm2  ;;  %v3723_v13 = vld [vmem:[#allocation2 + $0x14] sm:$0x1] }
 0x222   : > { %v3507_v61 = vshrl.u32 %v7203_v46, 16  ;;  %v3510_v55 = vshll.u32 %v7203_v46, 16  ;;  %v7204_v24 = vpack.c.bf16 %v3424_v34, %v3424_v34  ;;  %v3327_v26 = vadd.f32 %v9540_v16, %v3300_v22  ;;  %v3716_v22 = vld [vmem:[#allocation2 + $0x8] sm:$0x1] }
 0x223   : > { %v3526_v56 = vrot.slane %v3524_v60, 7  ;;  %v3532_v39 = vshrl.u32 %v7206_v50, 16  ;;  %v3535_v54 = vshll.u32 %v7206_v50, 16  ;;  %v3298_v3 = vmul.f32 %v7788_v53, %v9535_v20 }
 0x224   : > { %v3509_v4 = vrot.slane %v3507_v61, 7  ;;  %v3515_v2 = vshrl.u32 %v7204_v24, 16  ;;  %v3518_v28 = vshll.u32 %v7204_v24, 16  ;;  %v3347_v62 = vmax.f32 %v3327_v26, 0.0 }
 0x225   : > { %v3529_v40 = vor.u32 %v3527_v35, %v3526_v56  ;;  %v3530_v51 = vrot.slane %v3526_v56, 4  ;;  %v3534_v7 = vrot.slane %v3532_v39, 7  ;;  %v3325_v17 = vadd.f32 %v9540_v16, %v3298_v3  ;;  %v7611_v41 = vpop.f32.mrb[8].mxu0 }
 0x226   : > { %v3512_v45 = vor.u32 %v3510_v55, %v3509_v4  ;;  %v3513_v12 = vrot.slane %v3509_v4, 4  ;;  %v3517_v29 = vrot.slane %v3515_v2, 7  ;;  %v3429_v31 = vsel %vm9602_vm10, %v3347_v62, 0.0  ;;  %v3220_v53 = vpop.f32.mrb[9].mxu0 }
 0x227   : > { %vm3388_vm5 = vcmp.lt.s32.totalorder %v9558_v9, 16  ;;  %v3720_v1 = vsel %vm9609_vm1, %v3529_v40, %v3719_v23  ;;  %v3537_v46 = vor.u32 %v3535_v54, %v3534_v7  ;;  %v3539_v42 = vrot.slane %v3534_v7, 4  ;;  %v7612_v50 = vpop.f32.mrb[10].mxu0 }
 0x228   : > { %v7209_v60 = vpack.c.bf16 %v3429_v31, %v3429_v31  ;;  %3721 = vst [vmem:[#allocation2 + $0xc] sm:$0xf] %v3720_v1  ;;  %v3710_v34 = vsel %vm9609_vm1, %v3512_v45, %v3709_v25  ;;  %v3520_v61 = vor.u32 %v3518_v28, %v3517_v29  ;;  %v3522_v55 = vrot.slane %v3517_v29, 4  ;;  %v3223_v26 = vpop.f32.mrb[11].mxu0  ;;  %v3733_v25 = vld [vmem:[#allocation2 + $0x24] sm:$0xf]  ;;  %vm9701_vm2 = vmand %vm3378_vm14, %vm3388_vm5 }
 0x229   : > { %v3345_v24 = vmax.f32 %v3325_v17, 0.0  ;;  %3711 = vst [vmem:[#allocation2] sm:$0xf] %v3710_v34  ;;  %v3538_v10 = vsel %vm9622_vm12, %v3530_v51, %v3537_v46  ;;  %v3724_v56 = vsel %vm9615_vm11, %v3539_v42, %v3723_v13  ;;  %v3301_v2 = vmul.f32 %v7789_v47, %v9535_v20  ;;  %v3726_v42 = vld [vmem:[#allocation2 + $0x18] sm:$0xf] }
 0x22a   : > { %v3558_v39 = vshrl.u32 %v7209_v60, 16  ;;  %v3561_v54 = vshll.u32 %v7209_v60, 16  ;;  %3722 = vst.msk [vmem:[#allocation2 + $0x10] sm:$0xf] %vm3706_vm13, %v3538_v10  ;;  %3725 = vst [vmem:[#allocation2 + $0x14] sm:$0x1] %v3724_v56  ;;  %v3521_v3 = vsel %vm9622_vm12, %v3513_v12, %v3520_v61  ;;  %v3717_v23 = vsel %vm9615_vm11, %v3522_v55, %v3716_v22 }
 0x22b   : > { %v3427_v4 = vsel %vm9636_vm15, %v3345_v24, 0.0  ;;  %3713 = vst.msk [vmem:[#allocation2 + $0x4] sm:$0xf] %vm3706_vm13, %v3521_v3  ;;  %3718 = vst [vmem:[#allocation2 + $0x8] sm:$0x1] %v3717_v23  ;;  %v7790_v40 = vadd.f32 %v9593_v11, %v9494_v14  ;;  %v7791_v51 = vadd.f32 %v7611_v41, %v9496_v8  ;;  %v3328_v7 = vadd.f32 %v9540_v16, %v3301_v2 }
 0x22c   : > { %v9657_v28 = vrot.slane %v3558_v39, 7  ;;  %v7207_v62 = vpack.c.bf16 %v3427_v4, %v3427_v4  ;;  %v7792_v17 = vadd.f32 %v3220_v53, %v9498_v30  ;;  %v7793_v45 = vadd.f32 %v7612_v50, %v9500_v0 }
 0x22d   : > { %v7794_v47 = vadd.f32 %v3223_v26, %v9502_v6  ;;  %v7615_v1 = vpop.f32.mrb[12].mxu0  ;;  %v3348_v46 = vmax.f32 %v3328_v7, 0.0  ;;  %v3299_v14 = vmul.f32 %v7790_v40, %v9535_v20  ;;  %v3304_v8 = vmul.f32 %v7791_v51, %v9535_v20 }
 0x22e   : > { %v3563_v12 = vor.u32 %v3561_v54, %v9657_v28  ;;  %v3564_v13 = vrot.slane %v9657_v28, 4  ;;  %v3541_v29 = vshrl.u32 %v7207_v62, 16  ;;  %v3544_v31 = vshll.u32 %v7207_v62, 16  ;;  %v3236_v41 = vpop.f32.mrb[13].mxu0 }
 0x22f   : > { %v3302_v11 = vmul.f32 %v7792_v17, %v9535_v20  ;;  %v3785_v30 = vld [vmem:[#allocation2 + $0xc] sm:$0x1]  ;;  %v3305_v22 = vmul.f32 %v7793_v45, %v9535_v20  ;;  %v3303_v60 = vmul.f32 %v7794_v47, %v9535_v20  ;;  %v9683_v50 = vpop.f32.mrb[14].mxu0  ;;  %v3430_v55 = vsel %vm9602_vm10, %v3348_v46, 0.0 }
 0x230   : > { %v3734_v6 = vsel %vm9609_vm1, %v3563_v12, %v3733_v25  ;;  %v9679_v53 = vrot.slane %v3541_v29, 7  ;;  %v3786_v34 = vsel %vm9615_vm11, 0, %v3785_v30  ;;  %v3782_v61 = vld [vmem:[#allocation2] sm:$0x1]  ;;  %v3326_v24 = vadd.f32 %v9540_v16, %v3299_v14  ;;  %v9691_v10 = vpop.f32.mrb[15].mxu0 }
 0x231   : > { %3735 = vst [vmem:[#allocation2 + $0x24] sm:$0xf] %v3734_v6  ;;  %v3331_v26 = vadd.f32 %v9540_v16, %v3304_v8  ;;  %3787 = vst [vmem:[#allocation2 + $0xc] sm:$0x1] %v3786_v34  ;;  %v3783_v56 = vsel %vm9615_vm11, 0, %v3782_v61  ;;  %v7210_v23 = vpack.c.bf16 %v3430_v55, %v3430_v55  ;;  %v3329_v51 = vadd.f32 %v9540_v16, %v3302_v11 }
 0x232   : > { %v3816_v39 = vld [vmem:[#allocation2 + $0x14] sm:$0x1]  ;;  %v3546_v54 = vor.u32 %v3544_v31, %v9679_v53  ;;  %v3547_v3 = vrot.slane %v9679_v53, 4  ;;  %3784 = vst [vmem:[#allocation2] sm:$0x1] %v3783_v56  ;;  %v3346_v62 = vmax.f32 %v3326_v24, 0.0  ;;  %v3332_v31 = vadd.f32 %v9540_v16, %v3305_v22 }
 0x233   : > { %v3817_v4 = vsel %vm9673_vm8, 0, %v3816_v39  ;;  %v3813_v2 = vld [vmem:[#allocation2 + $0x8] sm:$0x1]  ;;  %v3351_v40 = vmax.f32 %v3331_v26, 0.0  ;;  %v3566_v7 = vshrl.u32 %v7210_v23, 16  ;;  %v3569_v17 = vshll.u32 %v7210_v23, 16 }
 0x234   : > { %3818 = vst [vmem:[#allocation2 + $0x14] sm:$0x1] %v3817_v4  ;;  %v3814_v25 = vsel %vm9673_vm8, 0, %v3813_v2  ;;  %v3727_v9 = vsel %vm9609_vm1, %v3546_v54, %v3726_v42  ;;  %v3428_v47 = vsel %vm9636_vm15, %v3346_v62, 0.0  ;;  %v3349_v29 = vmax.f32 %v3329_v51, 0.0 }
 0x235   : > { %3815 = vst [vmem:[#allocation2 + $0x8] sm:$0x1] %v3814_v25  ;;  %3728 = vst [vmem:[#allocation2 + $0x18] sm:$0xf] %v3727_v9  ;;  %v3433_v12 = vsel %vm9701_vm2, %v3351_v40, 0.0  ;;  %v3568_v46 = vrot.slane %v3566_v7, 7  ;;  %v7208_v14 = vpack.c.bf16 %v3428_v47, %v3428_v47  ;;  %v3330_v38 = vadd.f32 %v9540_v16, %v3303_v60 }
 0x236   : > { %v7213_v8 = vpack.c.bf16 %v3433_v12, %v3433_v12  ;;  %v9726_v11 = vpop.f32.mrb[16].mxu0  ;;  %v3737_v30 = vld [vmem:[#allocation2 + $0x2c] sm:$0x1]  ;;  %v3431_v6 = vsel %vm9716_vm3, %v3349_v29, 0.0  ;;  %v3352_v42 = vmax.f32 %v3332_v31, 0.0  ;;  %v7795_v35 = vadd.f32 %v7615_v1, %v9504_v18 }
 0x237   : > { %v7796_v22 = vadd.f32 %v3236_v41, %v9506_v43  ;;  %v9734_v34 = vpop.f32.mrb[17].mxu0  ;;  %v3571_v55 = vor.u32 %v3569_v17, %v3568_v46  ;;  %v3573_v60 = vrot.slane %v3568_v46, 4  ;;  %v3549_v24 = vshrl.u32 %v7208_v14, 16  ;;  %v3730_v62 = vld [vmem:[#allocation2 + $0x20] sm:$0x1] }
 0x238   : > { %v3791_v61 = vld [vmem:[#allocation2 + $0x24] sm:$0x1]  ;;  %v3552_v26 = vshll.u32 %v7208_v14, 16  ;;  %v9736_v56 = vpop.f32.mrb[18].mxu0  ;;  %v3592_v54 = vshrl.u32 %v7213_v8, 16  ;;  %v3595_v18 = vshll.u32 %v7213_v8, 16  ;;  %v7211_v1 = vpack.c.bf16 %v3431_v6, %v3431_v6 }
 0x239   : > { %v3792_v39 = vsel %vm9615_vm11, 0, %v3791_v61  ;;  %vm3379_vm10 = vcmp.ge.s32.totalorder %v9573_v44, 0  ;;  %vm3389_vm14 = vcmp.lt.s32.totalorder %v9573_v44, 16  ;;  %v9742_v43 = vpop.f32.mrb[19].mxu0  ;;  %v3572_v41 = vsel %vm9622_vm12, %v3564_v13, %v3571_v55  ;;  %v3747_v47 = vld [vmem:[#allocation2 + $0x3c] sm:$0xf] }
 0x23a   : > { %3793 = vst [vmem:[#allocation2 + $0x24] sm:$0x1] %v3792_v39  ;;  %v3738_v23 = vsel %vm9615_vm11, %v3573_v60, %v3737_v30  ;;  %v3551_v4 = vrot.slane %v3549_v24, 7  ;;  %v3434_v2 = vsel %vm9701_vm2, %v3352_v42, 0.0  ;;  %3736 = vst.msk [vmem:[#allocation2 + $0x28] sm:$0xf] %vm3706_vm13, %v3572_v41  ;;  %v3308_v12 = vmul.f32 %v7795_v35, %v9535_v20 }
 0x23b   : > { %3739 = vst [vmem:[#allocation2 + $0x2c] sm:$0x1] %v3738_v23  ;;  %v3594_v40 = vrot.slane %v3592_v54, 7  ;;  %v3575_v51 = vshrl.u32 %v7211_v1, 16  ;;  %v3578_v25 = vshll.u32 %v7211_v1, 16  ;;  %v7214_v9 = vpack.c.bf16 %v3434_v2, %v3434_v2  ;;  %vm9803_vm2 = vmand %vm3379_vm10, %vm3389_vm14 }
 0x23c   : > { %v3788_v7 = vld [vmem:[#allocation2 + $0x18] sm:$0x1]  ;;  %v3554_v28 = vor.u32 %v3552_v26, %v3551_v4  ;;  %v3556_v17 = vrot.slane %v3551_v4, 4  ;;  %v3350_v13 = vmax.f32 %v3330_v38, 0.0  ;;  %v3740_v30 = vld [vmem:[#allocation2 + $0x30] sm:$0xf]  ;;  %v3335_v60 = vadd.f32 %v9540_v16, %v3308_v12 }
 0x23d   : > { %v3789_v29 = vsel %vm9615_vm11, 0, %v3788_v7  ;;  %v3597_v57 = vor.u32 %v3595_v18, %v3594_v40  ;;  %v3598_v31 = vrot.slane %v3594_v40, 4  ;;  %v9756_v46 = vrot.slane %v3575_v51, 7  ;;  %v3751_v39 = vld [vmem:[#allocation2 + $0x44] sm:$0x1] }
 0x23e   : > { %3790 = vst [vmem:[#allocation2 + $0x18] sm:$0x1] %v3789_v29  ;;  %v3555_v14 = vsel %vm9622_vm12, %v3547_v3, %v3554_v28  ;;  %v3731_v8 = vsel %vm9615_vm11, %v3556_v17, %v3730_v62  ;;  %v3600_v38 = vshrl.u32 %v7214_v9, 16  ;;  %v3603_v6 = vshll.u32 %v7214_v9, 16  ;;  %v3744_v51 = vld [vmem:[#allocation2 + $0x38] sm:$0x1] }
 0x23f   : > { %3729 = vst.msk [vmem:[#allocation2 + $0x1c] sm:$0xf] %vm3706_vm13, %v3555_v14  ;;  %3732 = vst [vmem:[#allocation2 + $0x20] sm:$0x1] %v3731_v8  ;;  %v3748_v42 = vsel %vm9609_vm1, %v3597_v57, %v3747_v47  ;;  %v3580_v35 = vor.u32 %v3578_v25, %v9756_v46  ;;  %v3581_v61 = vrot.slane %v9756_v46, 4  ;;  %v3432_v53 = vsel %vm9716_vm3, %v3350_v13, 0.0 }
 0x240   : > { %vm3382_vm5 = vcmp.ge.s32.totalorder %v9576_v5, 0  ;;  %vm3392_vm15 = vcmp.lt.s32.totalorder %v9576_v5, 16  ;;  %3749 = vst [vmem:[#allocation2 + $0x3c] sm:$0xf] %v3748_v42  ;;  %v3602_v3 = vrot.slane %v3600_v38, 7  ;;  %v7212_v55 = vpack.c.bf16 %v3432_v53, %v3432_v53 }
 0x241   : > { %v3306_v24 = vmul.f32 %v7796_v22, %v9535_v20  ;;  %v3741_v26 = vsel %vm9609_vm1, %v3580_v35, %v3740_v30  ;;  %v7797_v54 = vadd.f32 %v9683_v50, %v9511_v36  ;;  %v7798_v45 = vadd.f32 %v9691_v10, %v9514_v32  ;;  %vm9836_vm9 = vmand %vm3382_vm5, %vm3392_vm15  ;;  %v9954_v19 = vld [vmem:[#allocation2 + $0x24] sm:$0xf] }
 0x242   : > { %v7799_v18 = vadd.f32 %v9726_v11, %v9517_v33  ;;  %v3822_v1 = vld [vmem:[#allocation2 + $0x2c] sm:$0x1]  ;;  %3742 = vst [vmem:[#allocation2 + $0x30] sm:$0xf] %v3741_v26  ;;  %v3605_v41 = vor.u32 %v3603_v6, %v3602_v3  ;;  %v3607_v23 = vrot.slane %v3602_v3, 4  ;;  %v3583_v4 = vshrl.u32 %v7212_v55, 16 }
 0x243   : > { %v3586_v2 = vshll.u32 %v7212_v55, 16  ;;  %v3823_v36 = vsel %vm9673_vm8, 0, %v3822_v1  ;;  %v3355_v32 = vmax.f32 %v3335_v60, 0.0  ;;  %v3333_v33 = vadd.f32 %v9540_v16, %v3306_v24 }
 0x244   : > { %v3309_v50 = vmul.f32 %v7797_v54, %v9535_v20  ;;  %3824 = vst [vmem:[#allocation2 + $0x2c] sm:$0x1] %v3823_v36  ;;  %v3606_v10 = vsel %vm9622_vm12, %v3598_v31, %v3605_v41  ;;  %v3752_v11 = vsel %vm9615_vm11, %v3607_v23, %v3751_v39  ;;  %v3585_v48 = vrot.slane %v3583_v4, 7  ;;  %v3761_v54 = vld [vmem:[#allocation2 + $0x54] sm:$0xf] }
 0x245   : > { %v3307_v40 = vmul.f32 %v7798_v45, %v9535_v20  ;;  %3750 = vst.msk [vmem:[#allocation2 + $0x40] sm:$0xf] %vm3706_vm13, %v3606_v10  ;;  %3753 = vst [vmem:[#allocation2 + $0x44] sm:$0x1] %v3752_v11  ;;  %v3437_v25 = vsel %vm9787_vm6, %v3355_v32, 0.0  ;;  %v3353_v9 = vmax.f32 %v3333_v33, 0.0  ;;  %v3312_v28 = vmul.f32 %v7799_v18, %v9535_v20 }
 0x246   : > { %v3336_v7 = vadd.f32 %v9540_v16, %v3309_v50  ;;  %v3819_v17 = vld [vmem:[#allocation2 + $0x20] sm:$0x1]  ;;  %v3588_v44 = vor.u32 %v3586_v2, %v3585_v48  ;;  %v3590_v47 = vrot.slane %v3585_v48, 4  ;;  %v7217_v13 = vpack.c.bf16 %v3437_v25, %v3437_v25  ;;  %v3754_v33 = vld [vmem:[#allocation2 + $0x48] sm:$0xf] }
 0x247   : > { %v3334_v12 = vadd.f32 %v9540_v16, %v3307_v40  ;;  %v3820_v29 = vsel %vm9673_vm8, 0, %v3819_v17  ;;  %v3797_v57 = vld [vmem:[#allocation2 + $0x3c] sm:$0x1]  ;;  %v3435_v31 = vsel %vm9803_vm2, %v3353_v9, 0.0  ;;  %v3339_v14 = vadd.f32 %v9540_v16, %v3312_v28  ;;  %v9913_v39 = vld [vmem:[#allocation2 + $0xc] sm:$0xf] }
 0x248   : > { %v3356_v46 = vmax.f32 %v3336_v7, 0.0  ;;  %vm3381_vm3 = vcmp.ge.s32.totalorder %v9578_v58, 0  ;;  %3821 = vst [vmem:[#allocation2 + $0x20] sm:$0x1] %v3820_v29  ;;  %v3798_v8 = vsel %vm9615_vm11, 0, %v3797_v57  ;;  %v3589_v30 = vsel %vm9622_vm12, %v3581_v61, %v3588_v44 }
 0x249   : > { %v3745_v38 = vsel %vm9615_vm11, %v3590_v47, %v3744_v51  ;;  %v3626_v6 = vshrl.u32 %v7217_v13, 16  ;;  %3799 = vst [vmem:[#allocation2 + $0x3c] sm:$0x1] %v3798_v8  ;;  %v3794_v42 = vld [vmem:[#allocation2 + $0x30] sm:$0x1]  ;;  %v3629_v35 = vshll.u32 %v7217_v13, 16  ;;  %v7215_v53 = vpack.c.bf16 %v3435_v31, %v3435_v31  ;;  %vm9868_vm10 = vmand %vm3381_vm3, %vm3391_vm0 }
 0x24a   : > { %3743 = vst.msk [vmem:[#allocation2 + $0x34] sm:$0xf] %vm3706_vm13, %v3589_v30  ;;  %3746 = vst [vmem:[#allocation2 + $0x38] sm:$0x1] %v3745_v38  ;;  %v3438_v3 = vsel %vm9787_vm6, %v3356_v46, 0.0  ;;  %v3354_v55 = vmax.f32 %v3334_v12, 0.0  ;;  %v7800_v41 = vadd.f32 %v9734_v34, %v9519_v63 }
 0x24b   : > { %v3795_v60 = vsel %vm9615_vm11, 0, %v3794_v42  ;;  %v3628_v24 = vrot.slane %v3626_v6, 7  ;;  %v7218_v61 = vpack.c.bf16 %v3438_v3, %v3438_v3  ;;  %v3359_v26 = vmax.f32 %v3339_v14, 0.0  ;;  %v3765_v51 = vld [vmem:[#allocation2 + $0x5c] sm:$0x1] }
 0x24c   : > { %3796 = vst [vmem:[#allocation2 + $0x30] sm:$0x1] %v3795_v60  ;;  %v3609_v45 = vshrl.u32 %v7215_v53, 16  ;;  %v3612_v18 = vshll.u32 %v7215_v53, 16  ;;  %v3436_v1 = vsel %vm9803_vm2, %v3354_v55, 0.0  ;;  %v3310_v34 = vmul.f32 %v7800_v41, %v9535_v20 }
 0x24d   : > { %v3828_v23 = vld [vmem:[#allocation2 + $0x44] sm:$0x1]  ;;  %v3631_v4 = vor.u32 %v3629_v35, %v3628_v24  ;;  %v3632_v2 = vrot.slane %v3628_v24, 4  ;;  %v3634_v22 = vshrl.u32 %v7218_v61, 16  ;;  %v3637_v36 = vshll.u32 %v7218_v61, 16 }
 0x24e   : > { %v3829_v5 = vsel %vm9673_vm8, 0, %v3828_v23  ;;  %v3611_v32 = vrot.slane %v3609_v45, 7  ;;  %v7216_v50 = vpack.c.bf16 %v3436_v1, %v3436_v1  ;;  %v3441_v10 = vsel %vm9836_vm9, %v3359_v26, 0.0  ;;  %v3758_v57 = vld [vmem:[#allocation2 + $0x50] sm:$0x1] }
 0x24f   : > { %3830 = vst [vmem:[#allocation2 + $0x44] sm:$0x1] %v3829_v5  ;;  %v3762_v11 = vsel %vm9609_vm1, %v3631_v4, %v3761_v54  ;;  %v3636_v48 = vrot.slane %v3634_v22, 7  ;;  %v7221_v63 = vpack.c.bf16 %v3441_v10, %v3441_v10  ;;  %v3337_v31 = vadd.f32 %v9540_v16, %v3310_v34  ;;  %v9856_v46 = vld [vmem:[#allocation2] sm:$0xf] }
 0x250   : > { %3763 = vst [vmem:[#allocation2 + $0x54] sm:$0xf] %v3762_v11  ;;  %v3614_v62 = vor.u32 %v3612_v18, %v3611_v32  ;;  %v3615_v40 = vrot.slane %v3611_v32, 4  ;;  %v3617_v25 = vshrl.u32 %v7216_v50, 16  ;;  %v3620_v9 = vshll.u32 %v7216_v50, 16 }
 0x251   : > { %v3825_v7 = vld [vmem:[#allocation2 + $0x38] sm:$0x1]  ;;  %v3639_v28 = vor.u32 %v3637_v36, %v3636_v48  ;;  %v3641_v17 = vrot.slane %v3636_v48, 4  ;;  %v3660_v44 = vshrl.u32 %v7221_v63, 16  ;;  %v3663_v47 = vshll.u32 %v7221_v63, 16 }
 0x252   : > { %v3826_v13 = vsel %vm9673_vm8, 0, %v3825_v7  ;;  %v3755_v12 = vsel %vm9609_vm1, %v3614_v62, %v3754_v33  ;;  %v3619_v29 = vrot.slane %v3617_v25, 7  ;;  %v3775_v38 = vld [vmem:[#allocation2 + $0x6c] sm:$0xf]  ;;  %v7801_v42 = vadd.f32 %v9736_v56, %v9521_v49  ;;  %v9880_v61 = vld [vmem:[#allocation2 + $0x4] sm:$0xf] }
 0x253   : > { %3827 = vst [vmem:[#allocation2 + $0x38] sm:$0x1] %v3826_v13  ;;  %3756 = vst [vmem:[#allocation2 + $0x48] sm:$0xf] %v3755_v12  ;;  %v3640_v14 = vsel %vm9622_vm12, %v3632_v2, %v3639_v28  ;;  %v3766_v8 = vsel %vm9615_vm11, %v3641_v17, %v3765_v51  ;;  %v9862_v30 = vrot.slane %v3660_v44, 7  ;;  %v3357_v3 = vmax.f32 %v3337_v31, 0.0 }
 0x254   : > { %3764 = vst.msk [vmem:[#allocation2 + $0x58] sm:$0xf] %vm3706_vm13, %v3640_v14  ;;  %3767 = vst [vmem:[#allocation2 + $0x5c] sm:$0x1] %v3766_v8  ;;  %v3622_v35 = vor.u32 %v3620_v9, %v3619_v29  ;;  %v3624_v53 = vrot.slane %v3619_v29, 4  ;;  %v7802_v55 = vadd.f32 %v9742_v43, %v9523_v15  ;;  %v3313_v24 = vmul.f32 %v7801_v42, %v9535_v20 }
 0x255   : > { %v3665_v60 = vor.u32 %v3663_v47, %v9862_v30  ;;  %v3666_v58 = vrot.slane %v9862_v30, 4  ;;  %v3869_v26 = vshrl.u32 %v9856_v46, 16  ;;  %v3439_v54 = vsel %vm9868_vm10, %v3357_v3, 0.0  ;;  %v9894_v41 = vld [vmem:[#allocation2 + $0x8] sm:$0x1] }
 0x256   : > { %v3623_v49 = vsel %vm9622_vm12, %v3615_v40, %v3622_v35  ;;  %v3759_v56 = vsel %vm9615_vm11, %v3624_v53, %v3758_v57  ;;  %v3311_v15 = vmul.f32 %v7802_v55, %v9535_v20  ;;  %v7219_v18 = vpack.c.bf16 %v3439_v54, %v3439_v54  ;;  %v3768_v9 = vld [vmem:[#allocation2 + $0x60] sm:$0xf]  ;;  %v9911_v44 = vld [vmem:[#allocation2 + $0x10] sm:$0xf]  ;;  %v3779_v53 = vld [vmem:[#allocation2 + $0x74] sm:$0x1] }
 0x257   : > { %v3803_v43 = vld [vmem:[#allocation2 + $0x54] sm:$0x1]  ;;  %3757 = vst.msk [vmem:[#allocation2 + $0x4c] sm:$0xf] %vm3706_vm13, %v3623_v49  ;;  %3760 = vst [vmem:[#allocation2 + $0x50] sm:$0x1] %v3759_v56  ;;  %v3776_v45 = vsel %vm9609_vm1, %v3665_v60, %v3775_v38  ;;  %v3340_v1 = vadd.f32 %v9540_v16, %v3313_v24 }
 0x258   : > { %v3871_v23 = vrot.slane %v3869_v26, 4  ;;  %v3804_v4 = vsel %vm9615_vm11, 0, %v3803_v43  ;;  %3777 = vst [vmem:[#allocation2 + $0x6c] sm:$0xf] %v3776_v45  ;;  %v3338_v2 = vadd.f32 %v9540_v16, %v3311_v15  ;;  %v3872_v20 = vshll.u32 %v9856_v46, 16 }
 0x259   : > { %v3878_v22 = vshll.u32 %v9880_v61, 16  ;;  %3805 = vst [vmem:[#allocation2 + $0x54] sm:$0x1] %v3804_v4  ;;  %v3643_v36 = vshrl.u32 %v7219_v18, 16  ;;  %v3646_v5 = vshll.u32 %v7219_v18, 16  ;;  %v3360_v32 = vmax.f32 %v3340_v1, 0.0 }
 0x25a   : > { %v3882_v33 = vshrl.u32 %v9880_v61, 16  ;;  %v3800_v50 = vld [vmem:[#allocation2 + $0x48] sm:$0x1]  ;;  %v3358_v10 = vmax.f32 %v3338_v2, 0.0  ;;  %v3874_v11 = vrot.slane %v3872_v20, 5  ;;  %v3888_v63 = vshll.u32 %v9894_v41, 16 }
 0x25b   : > { %v3880_v48 = vrot.slane %v3878_v22, 5  ;;  %v3801_v34 = vsel %vm9615_vm11, 0, %v3800_v50  ;;  %v3834_v16 = vld [vmem:[#allocation2 + $0x5c] sm:$0x1]  ;;  %v3645_v62 = vrot.slane %v3643_v36, 7  ;;  %v3442_v40 = vsel %vm9836_vm9, %v3360_v32, 0.0 }
 0x25c   : > { %v3884_v51 = vrot.slane %v3882_v33, 4  ;;  %3802 = vst [vmem:[#allocation2 + $0x48] sm:$0x1] %v3801_v34  ;;  %v3835_v25 = vsel %vm9673_vm8, 0, %v3834_v16  ;;  %v7222_v7 = vpack.c.bf16 %v3442_v40, %v3442_v40  ;;  %v3440_v28 = vsel %vm9868_vm10, %v3358_v10, 0.0 }
 0x25d   : > { %v3875_v17 = vor.u32 %v3874_v11, %v3871_v23  ;;  %3836 = vst [vmem:[#allocation2 + $0x5c] sm:$0x1] %v3835_v25  ;;  %v3648_v47 = vor.u32 %v3646_v5, %v3645_v62  ;;  %v3649_v13 = vrot.slane %v3645_v62, 4  ;;  %v7220_v12 = vpack.c.bf16 %v3440_v28, %v3440_v28  ;;  %v3772_v26 = vld [vmem:[#allocation2 + $0x68] sm:$0x1] }
 0x25e   : > { %v3885_v29 = vor.u32 %v3884_v51, %v3880_v48  ;;  %v3831_v57 = vld [vmem:[#allocation2 + $0x50] sm:$0x1]  ;;  %v3668_v31 = vshrl.u32 %v7222_v7, 16  ;;  %v3671_v14 = vshll.u32 %v7222_v7, 16  ;;  %v3890_v38 = vrot.slane %v3888_v63, 5 }
 0x25f   : > { %v3876_v8 = vrot.slane %v3875_v17, 4  ;;  %v3832_v42 = vsel %vm9673_vm8, 0, %v3831_v57  ;;  %v3809_v6 = vld [vmem:[#allocation2 + $0x6c] sm:$0x1]  ;;  %v3769_v35 = vsel %vm9609_vm1, %v3648_v47, %v3768_v9  ;;  %v3651_v3 = vshrl.u32 %v7220_v12, 16 }
 0x260   : > { %v3654_v55 = vshll.u32 %v7220_v12, 16  ;;  %3833 = vst [vmem:[#allocation2 + $0x50] sm:$0x1] %v3832_v42  ;;  %v3810_v60 = vsel %vm9615_vm11, 0, %v3809_v6  ;;  %3770 = vst [vmem:[#allocation2 + $0x60] sm:$0xf] %v3769_v35 }
 0x261   : > { %v3670_v24 = vrot.slane %v3668_v31, 7  ;;  %v3881_v49 = vsel %vm8768_vm7, %v3876_v8, %v3880_v48  ;;  %v3886_v56 = vrot.slane %v3885_v29, 4  ;;  %v9923_v54 = vld [vmem:[#allocation2 + $0x14] sm:$0x1]  ;;  %3811 = vst [vmem:[#allocation2 + $0x6c] sm:$0x1] %v3810_v60 }
 0x262   : > { %v3653_v15 = vrot.slane %v3651_v3, 7  ;;  %v3893_v27 = vshrl.u32 %v9913_v39, 16  ;;  %v3896_v43 = vshll.u32 %v9913_v39, 16  ;;  %v3902_v45 = vshll.u32 %v9911_v44, 16  ;;  %v9928_v18 = vld [vmem:[#allocation2 + $0x18] sm:$0xf] }
 0x263   : > { %v3673_v1 = vor.u32 %v3671_v14, %v3670_v24  ;;  %v3675_v23 = vrot.slane %v3670_v24, 4  ;;  %v3891_v4 = vsel %vm8768_vm7, %v3886_v56, %v3890_v38  ;;  %v3906_v2 = vshrl.u32 %v9911_v44, 16  ;;  %v9933_v32 = vld [vmem:[#allocation2 + $0x1c] sm:$0xf]  ;;  %v9941_v48 = vld [vmem:[#allocation2 + $0x20] sm:$0x1] }
 0x264   : > { %v3656_v20 = vor.u32 %v3654_v55, %v3653_v15  ;;  %v3658_v22 = vrot.slane %v3653_v15, 4  ;;  %v6997_v36 = vcombine.low %v3881_v49, %v3891_v4  ;;  %v3895_v5 = vrot.slane %v3893_v27, 4  ;;  %v9960_v57 = vld [vmem:[#allocation2 + $0x28] sm:$0xf]  ;;  %v9964_v35 = vld [vmem:[#allocation2 + $0x2c] sm:$0x1] }
 0x265   : > { %v3674_v33 = vsel %vm9622_vm12, %v3666_v58, %v3673_v1  ;;  %v3780_v50 = vsel %vm9615_vm11, %v3675_v23, %v3779_v53  ;;  %v3898_v10 = vrot.slane %v3896_v43, 5  ;;  %v3904_v11 = vrot.slane %v3902_v45, 5  ;;  %v9974_v49 = vld [vmem:[#allocation2 + $0x34] sm:$0xf]  ;;  %v9979_v56 = vld [vmem:[%s10647_s4 + $0x4] sm:$0x3] }
 0x266   : > { %3778 = vst.msk [vmem:[#allocation2 + $0x70] sm:$0xf] %vm3706_vm13, %v3674_v33  ;;  %3781 = vst [vmem:[#allocation2 + $0x74] sm:$0x1] %v3780_v50  ;;  %v3657_v63 = vsel %vm9622_vm12, %v3649_v13, %v3656_v20  ;;  %v3773_v34 = vsel %vm9615_vm11, %v3658_v22, %v3772_v26  ;;  %vm10763_vm1 = vcmask 31744   ;;  %v3908_v30 = vrot.slane %v3906_v2, 4 }
 0x267   : > { %7623 = vmatprep.mubr.msk.bf16.mxu1 %vm10763_vm1, %v6997_v36  ;;  %v3912_v58 = vshll.u32 %v9923_v54, 16  ;;  %3771 = vst.msk [vmem:[#allocation2 + $0x64] sm:$0xf] %vm3706_vm13, %v3657_v63  ;;  %3774 = vst [vmem:[#allocation2 + $0x68] sm:$0x1] %v3773_v34  ;;  %v3899_v16 = vor.u32 %v3898_v10, %v3895_v5  ;;  %v3917_v62 = vshrl.u32 %v9928_v18, 16 }
 0x268   : > { %v3920_v40 = vshll.u32 %v9928_v18, 16  ;;  %v3926_v51 = vshll.u32 %v9933_v32, 16  ;;  %v3806_v25 = vld [vmem:[#allocation2 + $0x60] sm:$0x1]  ;;  %v3909_v9 = vor.u32 %v3908_v30, %v3904_v11  ;;  %v3930_v28 = vshrl.u32 %v9933_v32, 16  ;;  %vm10764_vm13 = vmmov %vm10763_vm1 }
 0x269   : > { %v3914_v7 = vrot.slane %v3912_v58, 5  ;;  %v3936_v17 = vshll.u32 %v9941_v48, 16  ;;  %v3807_v47 = vsel %vm9615_vm11, 0, %v3806_v25  ;;  %v3900_v13 = vrot.slane %v3899_v16, 4  ;;  %v9972_v26 = vld [vmem:[#allocation2 + $0x30] sm:$0xf]  ;;  %vm10766_vm12 = vmmov %vm10763_vm1 }
 0x26a   : > { %v3919_v12 = vrot.slane %v3917_v62, 4  ;;  %v3922_v29 = vrot.slane %v3920_v40, 5  ;;  %3808 = vst [vmem:[#allocation2 + $0x60] sm:$0x1] %v3807_v47  ;;  %v3910_v31 = vrot.slane %v3909_v9, 4  ;;  %v3928_v14 = vrot.slane %v3926_v51, 5  ;;  %vm10768_vm14 = vmmov %vm10763_vm1 }
 0x26b   : > { %v3932_v8 = vrot.slane %v3930_v28, 4  ;;  %v3938_v38 = vrot.slane %v3936_v17, 5  ;;  %v3905_v42 = vsel %vm8768_vm7, %v3900_v13, %v3904_v11  ;;  %v3941_v53 = vshrl.u32 %v9954_v19, 16  ;;  %v9992_v63 = vld [vmem:[#allocation2 + $0x38] sm:$0x1]  ;;  %vm10769_vm5 = vmmov %vm10763_vm1 }
 0x26c   : > { %v3923_v6 = vor.u32 %v3922_v29, %v3919_v12  ;;  %v3944_v21 = vshll.u32 %v9954_v19, 16  ;;  %v3915_v3 = vsel %vm8768_vm7, %v3910_v31, %v3914_v7  ;;  %v3950_v60 = vshll.u32 %v9960_v57, 16  ;;  %v9996_v30 = vld [vmem:[#allocation2 + $0x3c] sm:$0xf]  ;;  %v10002_v7 = vld [vmem:[#allocation2 + $0x40] sm:$0xf]  ;;  %vm10770_vm15 = vmmov %vm10763_vm1 }
 0x26d   : > { %v3933_v55 = vor.u32 %v3932_v8, %v3928_v14  ;;  %v3954_v24 = vshrl.u32 %v9960_v57, 16  ;;  %v3840_v15 = vld [vmem:[#allocation2 + $0x74] sm:$0x1]  ;;  %v6998_v27 = vcombine.low %v3905_v42, %v3915_v3  ;;  %v3943_v45 = vrot.slane %v3941_v53, 4  ;;  %vm10771_vm6 = vmmov %vm10763_vm1 }
 0x26e   : > { %v3924_v43 = vrot.slane %v3923_v6, 4  ;;  %v3946_v1 = vrot.slane %v3944_v21, 5  ;;  %v3841_v23 = vsel %vm9673_vm8, 0, %v3840_v15  ;;  %v3837_v4 = vld [vmem:[#allocation2 + $0x68] sm:$0x1]  ;;  %v3952_v20 = vrot.slane %v3950_v60, 5  ;;  %vm10772_vm2 = vmmov %vm10763_vm1 }
 0x26f   : > { %v3934_v2 = vrot.slane %v3933_v55, 4  ;;  %v3956_v22 = vrot.slane %v3954_v24, 4  ;;  %3842 = vst [vmem:[#allocation2 + $0x74] sm:$0x1] %v3841_v23  ;;  %v3838_v36 = vsel %vm9673_vm8, 0, %v3837_v4  ;;  %7624 = vmatmul.mubr.msk.bf16.vlgmr.msra.gmra.mrb[20].mxu1 %vm10764_vm13, %v6998_v27  ;;  %v3960_v50 = vshll.u32 %v9964_v35, 16  ;;  %vm10767_vm8 = vmmov %vm10763_vm1 }
 0x270   : > { %v3929_v5 = vsel %vm8768_vm7, %v3924_v43, %v3928_v14  ;;  %v3947_v33 = vor.u32 %v3946_v1, %v3943_v45  ;;  %3839 = vst [vmem:[#allocation2 + $0x68] sm:$0x1] %v3838_v36  ;;  %7640 = vmatpush3.bf16.msra.mxu1 %v9584_v52  ;;  %v3965_v0 = vshrl.u32 %v9972_v26, 16  ;;  %v3968_v34 = vshll.u32 %v9972_v26, 16  ;;  %v10011_v14 = vld [vmem:[#allocation2 + $0x44] sm:$0x1]  ;;  %vm10774_vm0 = vmmov %vm10763_vm1 }
 0x271   : > { %v3939_v10 = vsel %vm8768_vm7, %v3934_v2, %v3938_v38  ;;  %v3957_v11 = vor.u32 %v3956_v22, %v3952_v20  ;;  %v3962_v62 = vrot.slane %v3960_v50, 5  ;;  %v3974_v40 = vshll.u32 %v9974_v49, 16  ;;  %v10014_v38 = vld [vmem:[#allocation2 + $0x48] sm:$0xf]  ;;  %v10018_v15 = vld [vmem:[#allocation2 + $0x4c] sm:$0xf]  ;;  %vm10775_vm9 = vmmov %vm10774_vm0 }
 0x272   : > { %v6999_v58 = vcombine.low %v3929_v5, %v3939_v10  ;;  %v3948_v16 = vrot.slane %v3947_v33, 4  ;;  %vm10765_vm11 = vcmask 1041408   ;;  %v3967_v51 = vrot.slane %v3965_v0, 4  ;;  %v10026_v22 = vld [vmem:[#allocation2 + $0x50] sm:$0x1]  ;;  %vm10777_vm1 = vmmov %vm10774_vm0 }
 0x273   : > { %8082 = vmatprep.subr.msk.bf16.mxu1 %vm10765_vm11, %v9979_v56  ;;  %v3958_v52 = vrot.slane %v3957_v11, 4  ;;  %v3970_v25 = vrot.slane %v3968_v34, 5  ;;  %v3978_v9 = vshrl.u32 %v9974_v49, 16  ;;  %v3976_v17 = vrot.slane %v3974_v40, 5  ;;  %v10028_v36 = vld [vmem:[#allocation2 + $0x54] sm:$0xf]  ;;  %vm10773_vm3 = vmmov %vm10765_vm11 }
 0x274   : > { %7627 = vmatprep.mubr.msk.bf16.mxu1 %vm10766_vm12, %v6999_v58  ;;  %v3953_v28 = vsel %vm8768_vm7, %v3948_v16, %v3952_v20  ;;  %v3984_v47 = vshll.u32 %v9992_v63, 16  ;;  %v3989_v13 = vshrl.u32 %v9996_v30, 16  ;;  %v3992_v8 = vshll.u32 %v9996_v30, 16  ;;  %v10030_v5 = vld [vmem:[#allocation2 + $0x58] sm:$0xf]  ;;  %vm10776_vm10 = vmmov %vm10773_vm3 }
 0x275   : > { %v3963_v12 = vsel %vm8768_vm7, %v3958_v52, %v3962_v62  ;;  %v3971_v29 = vor.u32 %v3970_v25, %v3967_v51  ;;  %v3980_v31 = vrot.slane %v3978_v9, 4  ;;  %v3998_v21 = vshll.u32 %v10002_v7, 16  ;;  %v10037_v25 = vld [vmem:[#allocation2 + $0x5c] sm:$0x1]  ;;  %vm10778_vm13 = vmmov %vm10774_vm0 }
 0x276   : > { %v7000_v42 = vcombine.low %v3953_v28, %v3963_v12  ;;  %v3986_v6 = vrot.slane %v3984_v47, 5  ;;  %v3991_v53 = vrot.slane %v3989_v13, 4  ;;  %v3994_v60 = vrot.slane %v3992_v8, 5  ;;  %vm10779_vm11 = vmmov %vm10774_vm0 }
 0x277   : > { %v3972_v3 = vrot.slane %v3971_v29, 4  ;;  %v3981_v55 = vor.u32 %v3980_v31, %v3976_v17  ;;  %v4002_v24 = vshrl.u32 %v10002_v7, 16  ;;  %v4000_v27 = vrot.slane %v3998_v21, 5  ;;  %vm10780_vm12 = vmmov %vm10774_vm0 }
 0x278   : > { %7628 = vmatmul.mubr.msk.bf16.gmra.mrb[24].mxu1 %vm10767_vm8, %v7000_v42  ;;  %v4008_v43 = vshll.u32 %v10011_v14, 16  ;;  %v4013_v45 = vshrl.u32 %v10014_v38, 16  ;;  %v4016_v1 = vshll.u32 %v10014_v38, 16  ;;  %v3995_v2 = vor.u32 %v3994_v60, %v3991_v53  ;;  %vm10781_vm8 = vmmov %vm10774_vm0 }
 0x279   : > { %v3977_v23 = vsel %vm8768_vm7, %v3972_v3, %v3976_v17  ;;  %v3982_v4 = vrot.slane %v3981_v55, 4  ;;  %v4004_v20 = vrot.slane %v4002_v24, 4  ;;  %v4022_v11 = vshll.u32 %v10018_v15, 16 }
 0x27a   : > { %v4010_v33 = vrot.slane %v4008_v43, 5  ;;  %v4015_v50 = vrot.slane %v4013_v45, 4  ;;  %v4018_v10 = vrot.slane %v4016_v1, 5  ;;  %v3996_v34 = vrot.slane %v3995_v2, 4 }
 0x27b   : > { %v3987_v0 = vsel %vm8768_vm7, %v3982_v4, %v3986_v6  ;;  %v4005_v58 = vor.u32 %v4004_v20, %v4000_v27  ;;  %v4026_v16 = vshrl.u32 %v10018_v15, 16  ;;  %v4024_v52 = vrot.slane %v4022_v11, 5  ;;  %v4375_v11 = vld [vmem:[#allocation2 + $0xc] sm:$0xe] }
 0x27c   : > { %v7001_v62 = vcombine.low %v3977_v23, %v3987_v0  ;;  %v4019_v40 = vor.u32 %v4018_v10, %v4015_v50  ;;  %v4032_v51 = vshll.u32 %v10026_v22, 16  ;;  %v4001_v9 = vsel %vm8768_vm7, %v3996_v34, %v4000_v27 }
 0x27d   : > { %v4006_v28 = vrot.slane %v4005_v58, 4  ;;  %v4028_v17 = vrot.slane %v4026_v16, 4  ;;  %v4037_v47 = vshrl.u32 %v10028_v36, 16  ;;  %v4040_v29 = vshll.u32 %v10028_v36, 16 }
 0x27e   : > { %7631 = vmatprep.mubr.msk.bf16.mxu1 %vm10768_vm14, %v7001_v62  ;;  %v4020_v13 = vrot.slane %v4019_v40, 4  ;;  %v4034_v12 = vrot.slane %v4032_v51, 5  ;;  %v4046_v31 = vshll.u32 %v10030_v5, 16  ;;  %v4050_v53 = vshrl.u32 %v10030_v5, 16  ;;  %vm10782_vm14 = vmmov %vm10774_vm0 }
 0x27f   : > { %v4011_v8 = vsel %vm8768_vm7, %v4006_v28, %v4010_v33  ;;  %v4029_v42 = vor.u32 %v4028_v17, %v4024_v52  ;;  %v4039_v6 = vrot.slane %v4037_v47, 4  ;;  %v4042_v3 = vrot.slane %v4040_v29, 5  ;;  %v4374_v33 = vld [vmem:[#allocation2] sm:$0xe]  ;;  %v4376_v47 = vld [vmem:[#allocation2 + $0x18] sm:$0xe] }
 0x280   : > { %v7002_v21 = vcombine.low %v4001_v9, %v4011_v8  ;;  %v4048_v55 = vrot.slane %v4046_v31, 5  ;;  %v4025_v60 = vsel %vm8768_vm7, %v4020_v13, %v4024_v52  ;;  %v4052_v27 = vrot.slane %v4050_v53, 4  ;;  %v4377_v31 = vld [vmem:[#allocation2 + $0x24] sm:$0xe] }
 0x281   : > { %v4030_v24 = vrot.slane %v4029_v42, 4  ;;  %v4056_v43 = vshll.u32 %v10037_v25, 16  ;;  %v4043_v45 = vor.u32 %v4042_v3, %v4039_v6  ;;  %v4400_v10 = vrot.slane %v9880_v61, 5 }
 0x282   : > { %7632 = vmatmul.mubr.msk.bf16.gmra.mrb[28].mxu1 %vm10769_vm5, %v7002_v21  ;;  %v4053_v23 = vor.u32 %v4052_v27, %v4048_v55  ;;  %v4403_v34 = vrot.slane %v9894_v41, 5  ;;  %v4407_v58 = vrot.slane %v9911_v44, 5  ;;  %v7029_v62 = vrot.slane %v4374_v33, 9  ;;  %vm10783_vm5 = vmmov %vm10773_vm3 }
 0x283   : > { %v4035_v1 = vsel %vm8768_vm7, %v4030_v24, %v4034_v12  ;;  %v4058_v4 = vrot.slane %v4056_v43, 5  ;;  %v4044_v20 = vrot.slane %v4043_v45, 4  ;;  %v4402_v40 = vrot.slane %v4400_v10, 4 }
 0x284   : > { %v7003_v2 = vcombine.low %v4025_v60, %v4035_v1  ;;  %v4054_v50 = vrot.slane %v4053_v23, 4  ;;  %v4410_v52 = vrot.slane %v9923_v54, 5  ;;  %v7013_v9 = vcombine.low %v9856_v46, %v9880_v61 }
 0x285   : > { %v4049_v0 = vsel %vm8768_vm7, %v4044_v20, %v4048_v55  ;;  %v7030_v28 = vrot.slane %v4375_v11, 9  ;;  %v4409_v17 = vrot.slane %v4407_v58, 4  ;;  %v4401_v13 = vsel %vm8547_vm4, %v7029_v62, %v4400_v10  ;;  %v4379_v55 = vld [vmem:[#allocation2 + $0x3c] sm:$0xe]  ;;  %v7054_v11 = vld [vmem:[%s10647_s4 + $0x6] sm:$0x3] }
 0x286   : > { %7635 = vmatprep.mubr.msk.bf16.mxu1 %vm10770_vm15, %v7003_v2  ;;  %v4059_v16 = vsel %vm8768_vm7, %v4054_v50, %v4058_v4  ;;  %v4404_v41 = vsel %vm8547_vm4, %v4402_v40, %v4403_v34  ;;  %v4414_v12 = vrot.slane %v9933_v32, 5  ;;  %v4417_v29 = vrot.slane %v9941_v48, 5  ;;  %v4381_v50 = vld [vmem:[#allocation2 + $0x54] sm:$0xe]  ;;  %vm10784_vm15 = vmmov %vm10774_vm0 }
 0x287   : > { %v7004_v51 = vcombine.low %v4049_v0, %v4059_v16  ;;  %v7038_v54 = vcombine.low %v4401_v13, %v4404_v41  ;;  %v4408_v46 = vsel %vm8547_vm4, %v7030_v28, %v4407_v58  ;;  %v4411_v61 = vsel %vm8547_vm4, %v4409_v17, %v4410_v52  ;;  %v4380_v17 = vld [vmem:[#allocation2 + $0x48] sm:$0xe] }
 0x288   : > { %v4421_v8 = vrot.slane %v9960_v57, 5  ;;  %v7039_v42 = vcombine.low %v4408_v46, %v4411_v61  ;;  %v7031_v6 = vrot.slane %v4376_v47, 9  ;;  %v4416_v53 = vrot.slane %v4414_v12, 4  ;;  %v10156_v46 = vld [vmem:[%s10647_s4 + $0xa] sm:$0x3] }
 0x289   : > { %v4424_v21 = vrot.slane %v9964_v35, 5  ;;  %v7032_v48 = vrot.slane %v4377_v31, 9  ;;  %v4435_v27 = vrot.slane %v10002_v7, 5  ;;  %v7034_v35 = vrot.slane %v4379_v55, 9  ;;  %v4819_v61 = vld [vmem:[#allocation2 + $0xc] sm:$0xf] }
 0x28a   : > { %7636 = vmatmul.mubr.msk.bf16.gmra.mrb[32].mxu1 %vm10771_vm6, %v7004_v51  ;;  %v4423_v3 = vrot.slane %v4421_v8, 4  ;;  %v4415_v60 = vsel %vm8547_vm4, %v7031_v6, %v4414_v12  ;;  %v4418_v24 = vsel %vm8547_vm4, %v4416_v53, %v4417_v29  ;;  %v4438_v2 = vrot.slane %v10011_v14, 5  ;;  %vm10785_vm6 = vmmov %vm10774_vm0  ;;  %v8204_v55 = vld [vmem:[#allocation2 + $0x3c] sm:$0xff]  }
 0x28b   : > { %7641 = vmatprep.mubr.msk.bf16.mxu1 %vm10772_vm2, %v7013_v9  ;;  %v7040_v43 = vcombine.low %v4415_v60, %v4418_v24  ;;  %v4422_v45 = vsel %vm8547_vm4, %v7032_v48, %v4421_v8  ;;  %v4437_v4 = vrot.slane %v4435_v27, 4  ;;  %v7014_v20 = vcombine.low %v9913_v39, %v9911_v44  ;;  %vm10786_vm2 = vmmov %vm10773_vm3  ;;  %v10160_v8 = vld [vmem:[#allocation2 + $0x10] sm:$0xf]  ;;  %v4822_v48 = vld [vmem:[#allocation2 + $0x18] sm:$0xf] }
 0x28c   : > { %v4425_v1 = vsel %vm8547_vm4, %v4423_v3, %v4424_v21  ;;  %v4505_v33 = vsel %vm10773_vm3, %v9979_v56, 0  ;;  %v7015_v10 = vcombine.low %v9928_v18, %v9933_v32  ;;  %v4436_v0 = vsel %vm8547_vm4, %v7034_v35, %v4435_v27  ;;  %vm10787_vm3 = vmmov %vm10774_vm0  ;;  %v8203_v3 = vld [vmem:[#allocation2 + $0x30] sm:$0xff]  }
 0x28d   : > { %v7041_v23 = vcombine.low %v4422_v45, %v4425_v1  ;;  %v4439_v14 = vsel %vm8547_vm4, %v4437_v4, %v4438_v2  ;;  %v4449_v34 = vrot.slane %v10030_v5, 5  ;;  %v4452_v39 = vrot.slane %v10037_v25, 5  ;;  %v10167_v27 = vld [vmem:[#allocation2 + $0x14] sm:$0x1]  ;;  %v4825_v4 = vld [vmem:[#allocation2 + $0x24] sm:$0xf] }
 0x28e   : > { %v7043_v44 = vcombine.low %v4436_v0, %v4439_v14  ;;  %v7036_v18 = vrot.slane %v4381_v50, 9  ;;  %v7016_v62 = vcombine.low %v9954_v19, %v9960_v57  ;;  %v7017_v25 = vcombine.low %v9972_v26, %v9974_v49 }
 0x28f   : > { %v4451_v32 = vrot.slane %v4449_v34, 4  ;;  %v7018_v40 = vcombine.low %v9996_v30, %v10002_v7  ;;  %v7019_v52 = vcombine.low %v10014_v38, %v10018_v15  ;;  %v7020_v19 = vcombine.low %v10028_v36, %v10030_v5  ;;  %v7071_v30 = vld [vmem:[%s10647_s4 + $0x8] sm:$0x3]  ;;  %v4378_v38 = vld [vmem:[#allocation2 + $0x30] sm:$0xe] }
 0x290   : > { %v4450_v56 = vsel %vm8547_vm4, %v7036_v18, %v4449_v34  ;;  %v4704_v57 = vsel %vm10783_vm5, %v7054_v11, 0  ;;  %v4428_v26 = vrot.slane %v9974_v49, 5  ;;  %v4431_v7 = vrot.slane %v9992_v63, 5  ;;  %vm10796_vm5 = vmmov %vm10774_vm0 }
 0x291   : > { %v4453_v58 = vsel %vm8547_vm4, %v4451_v32, %v4452_v39  ;;  %v7033_v5 = vrot.slane %v4378_v38, 9  ;;  %v4442_v9 = vrot.slane %v10018_v15, 5  ;;  %v4445_v63 = vrot.slane %v10026_v22, 5  ;;  %v8200_v15 = vld [vmem:[#allocation2 + $0xc] sm:$0xff]   ;;  %v8201_v22 = vld [vmem:[#allocation2 + $0x18] sm:$0xff]  }
 0x292   : > { %7642 = vmatmul.mubr.msk.bf16.vlgmr.msra.gmra.mrb[20].mxu1 %vm10774_vm0, %v7014_v20  ;;  %v7045_v16 = vcombine.low %v4450_v56, %v4453_v58  ;;  %v4430_v36 = vrot.slane %v4428_v26, 4  ;;  %v7035_v13 = vrot.slane %v4380_v17, 9  ;;  %v4847_v6 = vshll.u32 %v4819_v61, 16  ;;  %v8205_v39 = vld [vmem:[#allocation2 + $0x48] sm:$0xff]   ;;  %v4828_v56 = vld [vmem:[#allocation2 + $0x30] sm:$0xf] }
 0x293   : > { %7658 = vmatpush3.bf16.msra.mxu1 %v4505_v33  ;;  %7645 = vmatprep.mubr.msk.bf16.mxu1 %vm10775_vm9, %v7015_v10  ;;  %v4429_v49 = vsel %vm8547_vm4, %v7033_v5, %v4428_v26  ;;  %v4444_v47 = vrot.slane %v4442_v9, 4  ;;  %vm10788_vm9 = vmmov %vm10774_vm0  ;;  %v4853_v53 = vshll.u32 %v10160_v8, 16  ;;  %v4857_v21 = vshrl.u32 %v10160_v8, 16  ;;  %v10175_v10 = vld [vmem:[#allocation2 + $0x28] sm:$0xf]  ;;  %v8206_v58 = vld [vmem:[#allocation2 + $0x54] sm:$0xff]  }
 0x294   : > { %8083 = vmatprep.subr.msk.bf16.mxu1 %vm10776_vm10, %v7054_v11  ;;  %v4432_v51 = vsel %vm8547_vm4, %v4430_v36, %v4431_v7  ;;  %v4443_v12 = vsel %vm8547_vm4, %v7035_v13, %v4442_v9  ;;  %vm10789_vm10 = vmmov %vm10774_vm0  ;;  %v4849_v24 = vrot.slane %v4847_v6, 5  ;;  %v4868_v45 = vshrl.u32 %v4822_v48, 16  ;;  %v10183_v38 = vld [vmem:[#allocation2 + $0x2c] sm:$0x1]  ;;  %v8207_v6 = vld [vmem:[#allocation2 + $0x60] sm:$0xff]  }
 0x295   : > { %v7042_v28 = vcombine.low %v4429_v49, %v4432_v51  ;;  %v4446_v41 = vsel %vm8547_vm4, %v4444_v47, %v4445_v63  ;;  %v4871_v1 = vshll.u32 %v4822_v48, 16  ;;  %v4859_v35 = vrot.slane %v4857_v21, 4 }
 0x296   : > { %v7044_v29 = vcombine.low %v4443_v12, %v4446_v41  ;;  %v4863_v20 = vshll.u32 %v10167_v27, 16  ;;  %v4870_v11 = vrot.slane %v4868_v45, 4  ;;  %v4892_v14 = vshrl.u32 %v4825_v4, 16  ;;  %v4834_v45 = vld [vmem:[#allocation2 + $0x48] sm:$0xf] }
 0x297   : > { %v4873_v0 = vrot.slane %v4871_v1, 5  ;;  %v4895_v34 = vshll.u32 %v4825_v4, 16  ;;  %v4901_v18 = vshll.u32 %v10175_v10, 16  ;;  %v4905_v32 = vshrl.u32 %v10175_v10, 16 }
 0x298   : > { %v4916_v36 = vshrl.u32 %v4828_v56, 16  ;;  %v4919_v5 = vshll.u32 %v4828_v56, 16 }
 0x299   : > { %v4897_v26 = vrot.slane %v4895_v34, 5  ;;  %v4903_v49 = vrot.slane %v4901_v18, 5  ;;  %v4907_v9 = vrot.slane %v4905_v32, 4  ;;  %v4967_v18 = vshll.u32 %v4834_v45, 16 }
 0x29a   : > { %7646 = vmatmul.mubr.msk.bf16.gmra.mrb[24].mxu1 %vm10777_vm1, %v7016_v62  ;;  %vm10790_vm1 = vmmov %vm10774_vm0  ;;  %v4865_v62 = vrot.slane %v4863_v20, 5 }
 0x29b   : > { %7649 = vmatprep.mubr.msk.bf16.mxu1 %vm10778_vm13, %v7017_v25  ;;  %vm10791_vm13 = vmmov %vm10774_vm0  ;;  %v10179_v25 = vld [vmem:[#allocation2 + $0x20] sm:$0x1]  ;;  %v4908_v48 = vor.u32 %v4907_v9, %v4903_v49 }
 0x29c   : > { %v4887_v51 = vshll.u32 %v10179_v25, 16 }
 0x29d   : > { %v4909_v34 = vrot.slane %v4908_v48, 4 }
 0x29e   : > { %v4889_v21 = vrot.slane %v4887_v51, 5  ;;  %v4969_v51 = vrot.slane %v4967_v18, 5 }
 0x2a2   : > { %7650 = vmatmul.mubr.msk.bf16.gmra.mrb[28].mxu1 %vm10779_vm11, %v7018_v40  ;;  %vm10792_vm11 = vmmov %vm10786_vm2 }
 0x2a3   : > { %7653 = vmatprep.mubr.msk.bf16.mxu1 %vm10780_vm12, %v7019_v52  ;;  %v5086_v31 = vsel %vm10792_vm11, %v7071_v30, 0  ;;  %vm10793_vm12 = vmmov %vm10774_vm0  ;;  %v4874_v52 = vor.u32 %v4873_v0, %v4870_v11  ;;  %v4837_v0 = vld [vmem:[#allocation2 + $0x54] sm:$0xf] }
 0x2a5   : > { %v4875_v41 = vrot.slane %v4874_v52, 4  ;;  %v4988_v52 = vshrl.u32 %v4837_v0, 16 }
 0x2aa   : > { %7654 = vmatmul.mubr.msk.bf16.gmra.mrb[32].mxu1 %vm10781_vm8, %v7020_v19  ;;  %vm10794_vm8 = vmmov %vm10774_vm0 }
 0x2ab   : > { %7659 = vmatprep.mubr.msk.bf16.mxu1 %vm10782_vm14, %v7038_v54  ;;  %v8202_v54 = vld [vmem:[#allocation2 + $0x24] sm:$0xff]   ;;  %vm10795_vm14 = vmmov %vm10786_vm2 }
 0x2b2   : > { %7660 = vmatmul.mubr.msk.bf16.vlgmr.msra.gmra.mrb[20].mxu1 %vm10784_vm15, %v7039_v42  ;;  %v4844_v42 = vshrl.u32 %v4819_v61, 16  ;;  %vm10797_vm15 = vmmov %vm10774_vm0 }
 0x2b3   : > { %7676 = vmatpush3.bf16.msra.mxu1 %v4704_v57  ;;  %7663 = vmatprep.mubr.msk.bf16.mxu1 %vm10785_vm6, %v7040_v43  ;;  %v10169_v43 = vld [vmem:[#allocation2 + $0x1c] sm:$0xf]  ;;  %vm10798_vm6 = vmmov %vm10774_vm0  ;;  %v4894_v57 = vrot.slane %v4892_v14, 4 }
 0x2b4   : > { %8084 = vmatprep.subr.msk.bf16.mxu1 %vm10786_vm2, %v7071_v30  ;;  %v4846_v60 = vrot.slane %v4844_v42, 4  ;;  %v4877_v33 = vshll.u32 %v10169_v43, 16  ;;  %v4881_v50 = vshrl.u32 %v10169_v43, 16  ;;  %v4831_v30 = vld [vmem:[#allocation2 + $0x3c] sm:$0xf]  ;;  %vm10799_vm2 = vmmov %vm10774_vm0 }
 0x2b5   : > { %v4940_v47 = vshrl.u32 %v4831_v30, 16  ;;  %v4943_v13 = vshll.u32 %v4831_v30, 16 }
 0x2b6   : > { %v4850_v2 = vor.u32 %v4849_v24, %v4846_v60  ;;  %v4879_v40 = vrot.slane %v4877_v33, 5  ;;  %v4883_v19 = vrot.slane %v4881_v50, 4 }
 0x2b8   : > { %v4884_v12 = vor.u32 %v4883_v19, %v4879_v40  ;;  %v4880_v1 = vsel %vm8768_vm7, %v4875_v41, %v4879_v40  ;;  %v4991_v19 = vshll.u32 %v4837_v0, 16  ;;  %v10226_v41 = vld [vmem:[%s10647_s4 + $0xc] sm:$0x3] }
 0x2ba   : > { %7664 = vmatmul.mubr.msk.bf16.gmra.mrb[24].mxu1 %vm10787_vm3, %v7041_v23  ;;  %v4855_v23 = vrot.slane %v4853_v53, 5  ;;  %vm10800_vm3 = vmmov %vm10774_vm0 }
 0x2bb   : > { %7667 = vmatprep.mubr.msk.bf16.mxu1 %vm10774_vm0, %v7042_v28  ;;  %v10186_v28 = vld [vmem:[#allocation2 + $0x34] sm:$0xf]  ;;  %vm10801_vm0 = vmmov %vm10792_vm11 }
 0x2bc   : > { %v4925_v61 = vshll.u32 %v10186_v28, 16  ;;  %v4929_v42 = vshrl.u32 %v10186_v28, 16  ;;  %vm10805_vm11 = vmmov %vm10790_vm1 }
 0x2be   : > { %v4927_v50 = vrot.slane %v4925_v61, 5  ;;  %v4931_v11 = vrot.slane %v4929_v42, 4 }
 0x2c0   : > { %v4932_v30 = vor.u32 %v4931_v11, %v4927_v50 }
 0x2c2   : > { %7668 = vmatmul.mubr.msk.bf16.gmra.mrb[28].mxu1 %vm10788_vm9, %v7043_v44  ;;  %v4860_v44 = vor.u32 %v4859_v35, %v4855_v23  ;;  %v5340_v35 = vsel %vm10801_vm0, %v10156_v46, 0  ;;  %vm10802_vm9 = vmmov %vm10790_vm1 }
 0x2c3   : > { %7671 = vmatprep.mubr.msk.bf16.mxu1 %vm10789_vm10, %v7044_v29  ;;  %v4898_v29 = vor.u32 %v4897_v26, %v4894_v57  ;;  %vm10803_vm10 = vmmov %vm10790_vm1 }
 0x2c4   : > { %v4861_v7 = vrot.slane %v4860_v44, 4  ;;  %v10209_v44 = vld [vmem:[#allocation2 + $0x44] sm:$0x1] }
 0x2c5   : > { %v4899_v4 = vrot.slane %v4898_v29, 4  ;;  %v4993_v29 = vrot.slane %v4991_v19, 5 }
 0x2c6   : > { %v4866_v17 = vsel %vm8768_vm7, %v4861_v7, %v4865_v62  ;;  %v4959_v7 = vshll.u32 %v10209_v44, 16 }
 0x2c7   : > { %v4904_v40 = vsel %vm8768_vm7, %v4899_v4, %v4903_v49 }
 0x2c8   : > { %v4961_v42 = vrot.slane %v4959_v7, 5 }
 0x2ca   : > { %7672 = vmatmul.mubr.msk.bf16.gmra.mrb[32].mxu1 %vm10790_vm1, %v7045_v16  ;;  %v4851_v16 = vrot.slane %v4850_v2, 4  ;;  %v10204_v2 = vld [vmem:[#allocation2 + $0x38] sm:$0x1] }
 0x2cb   : > { %7677 = vmatprep.mubr.msk.bf16.mxu1 %vm10791_vm13, %v8200_v15  ;;  %v4911_v15 = vshll.u32 %v10183_v38, 16  ;;  %vm10804_vm13 = vmmov %vm10801_vm0 }
 0x2cc   : > { %v4856_v63 = vsel %vm8768_vm7, %v4851_v16, %v4855_v23  ;;  %v4885_v23 = vrot.slane %v4884_v12, 4  ;;  %v10212_v16 = vld [vmem:[#allocation2 + $0x4c] sm:$0xf]  ;;  %v4990_v12 = vrot.slane %v4988_v52, 4 }
 0x2cd   : > { %v7072_v53 = vcombine.low %v4856_v63, %v4866_v17  ;;  %v4913_v20 = vrot.slane %v4911_v15, 5  ;;  %v4973_v9 = vshll.u32 %v10212_v16, 16  ;;  %v4977_v63 = vshrl.u32 %v10212_v16, 16 }
 0x2ce   : > { %v4890_v14 = vsel %vm8768_vm7, %v4885_v23, %v4889_v21 }
 0x2cf   : > { %v7073_v62 = vcombine.low %v4880_v1, %v4890_v14  ;;  %v4914_v57 = vsel %vm8768_vm7, %v4909_v34, %v4913_v20  ;;  %v4975_v48 = vrot.slane %v4973_v9, 5 }
 0x2d0   : > { %v7074_v17 = vcombine.low %v4904_v40, %v4914_v57 }
 0x2d2   : > { %7678 = vmatmul.mubr.msk.bf16.vlgmr.msra.gmra.mrb[20].mxu1 %vm10793_vm12, %v8201_v22  ;;  %v10193_v22 = vld [vmem:[#allocation2 + $0x40] sm:$0xf]  ;;  %vm10806_vm12 = vmmov %vm10790_vm1 }
 0x2d3   : > { %7694 = vmatpush3.bf16.msra.mxu1 %v5086_v31  ;;  %7681 = vmatprep.mubr.msk.bf16.mxu1 %vm10794_vm8, %v8202_v54  ;;  %v4918_v31 = vrot.slane %v4916_v36, 4  ;;  %v4921_v54 = vrot.slane %v4919_v5, 5  ;;  %v4949_v60 = vshll.u32 %v10193_v22, 16  ;;  %v4953_v24 = vshrl.u32 %v10193_v22, 16  ;;  %v10219_v36 = vld [vmem:[#allocation2 + $0x58] sm:$0xf]  ;;  %vm10807_vm8 = vmmov %vm10790_vm1 }
 0x2d4   : > { %8085 = vmatprep.subr.msk.bf16.mxu1 %vm10795_vm14, %v10156_v46  ;;  %v4935_v46 = vshll.u32 %v10204_v2, 16  ;;  %v4997_v15 = vshll.u32 %v10219_v36, 16  ;;  %vm10808_vm14 = vmmov %vm10790_vm1 }
 0x2d5   : > { %v4922_v33 = vor.u32 %v4921_v54, %v4918_v31  ;;  %v4951_v56 = vrot.slane %v4949_v60, 5  ;;  %v5001_v31 = vshrl.u32 %v10219_v36, 16  ;;  %v4840_v54 = vld [vmem:[#allocation2 + $0x60] sm:$0xf] }
 0x2d6   : > { %v5015_v1 = vshll.u32 %v4840_v54, 16  ;;  %v4999_v4 = vrot.slane %v4997_v15, 5 }
 0x2d7   : > { %v4923_v26 = vrot.slane %v4922_v33, 4  ;;  %v5003_v20 = vrot.slane %v5001_v31, 4  ;;  %v10244_v33 = vld [vmem:[#allocation2 + $0x64] sm:$0xf] }
 0x2d9   : > { %v4928_v61 = vsel %vm8768_vm7, %v4923_v26, %v4927_v50  ;;  %v5004_v40 = vor.u32 %v5003_v20, %v4999_v4  ;;  %v10256_v26 = vld [vmem:[#allocation2 + $0x68] sm:$0x1]  ;;  %v5252_v20 = vrot.slane %v10183_v38, 5 }
 0x2da   : > { %7682 = vmatmul.mubr.msk.bf16.gmra.mrb[24].mxu1 %vm10796_vm5, %v8203_v3  ;;  %v4942_v3 = vrot.slane %v4940_v47, 4  ;;  %v4937_v47 = vrot.slane %v4935_v46, 5  ;;  %vm10809_vm5 = vmmov %vm10790_vm1 }
 0x2db   : > { %7685 = vmatprep.mubr.msk.bf16.mxu1 %vm10797_vm15, %v8204_v55  ;;  %v4945_v55 = vrot.slane %v4943_v13, 5  ;;  %vm10810_vm15 = vmmov %vm10790_vm1 }
 0x2dd   : > { %v4946_v32 = vor.u32 %v4945_v55, %v4942_v3  ;;  %v4979_v3 = vrot.slane %v4977_v63, 4  ;;  %v5005_v63 = vrot.slane %v5004_v40, 4  ;;  %v5204_v40 = vld [vmem:[#allocation2 + $0x30] sm:$0xe] }
 0x2df   : > { %v4947_v49 = vrot.slane %v4946_v32, 4  ;;  %v5017_v32 = vrot.slane %v5015_v1, 5  ;;  %v5249_v1 = vrot.slane %v10175_v10, 5 }
 0x2e1   : > { %v4952_v55 = vsel %vm8768_vm7, %v4947_v49, %v4951_v56 }
 0x2e2   : > { %7686 = vmatmul.mubr.msk.bf16.gmra.mrb[28].mxu1 %vm10798_vm6, %v8205_v39  ;;  %v4964_v39 = vshrl.u32 %v4834_v45, 16  ;;  %v5012_v45 = vshrl.u32 %v4840_v54, 16  ;;  %v5238_v54 = vrot.slane %v10167_v27, 5  ;;  %vm10811_vm6 = vmmov %vm10801_vm0 }
 0x2e3   : > { %7689 = vmatprep.mubr.msk.bf16.mxu1 %vm10799_vm2, %v8206_v58  ;;  %v4955_v58 = vrot.slane %v4953_v24, 4  ;;  %v10240_v24 = vld [vmem:[#allocation2 + $0x5c] sm:$0x1]  ;;  %v5539_v38 = vsel %vm10811_vm6, %v10226_v41, 0  ;;  %vm10812_vm2 = vmmov %vm10790_vm1 }
 0x2e4   : > { %v4966_v5 = vrot.slane %v4964_v39, 4  ;;  %v4980_v39 = vor.u32 %v4979_v3, %v4975_v48  ;;  %v5007_v18 = vshll.u32 %v10240_v24, 16  ;;  %v5014_v46 = vrot.slane %v5012_v45, 4  ;;  %vm10823_vm6 = vmmov %vm10790_vm1 }
 0x2e5   : > { %v4956_v13 = vor.u32 %v4955_v58, %v4951_v56  ;;  %v5021_v56 = vshll.u32 %v10244_v33, 16  ;;  %v5025_v58 = vshrl.u32 %v10244_v33, 16 }
 0x2e6   : > { %v4970_v21 = vor.u32 %v4969_v51, %v4966_v5  ;;  %v5009_v57 = vrot.slane %v5007_v18, 5  ;;  %v5018_v7 = vor.u32 %v5017_v32, %v5014_v46  ;;  %v5263_v32 = vrot.slane %v10193_v22, 5 }
 0x2e7   : > { %v4957_v60 = vrot.slane %v4956_v13, 4  ;;  %v5023_v5 = vrot.slane %v5021_v56, 5  ;;  %v5027_v51 = vrot.slane %v5025_v58, 4  ;;  %v5259_v58 = vrot.slane %v10204_v2, 5 }
 0x2e8   : > { %v4971_v34 = vrot.slane %v4970_v21, 4  ;;  %v5010_v13 = vsel %vm8768_vm7, %v5005_v63, %v5009_v57  ;;  %v5019_v15 = vrot.slane %v5018_v7, 4  ;;  %v7091_v22 = vrot.slane %v5204_v40, 9 }
 0x2e9   : > { %v4962_v11 = vsel %vm8768_vm7, %v4957_v60, %v4961_v42  ;;  %v5028_v31 = vor.u32 %v5027_v51, %v5023_v5  ;;  %v5201_v42 = vld [vmem:[#allocation2 + $0xc] sm:$0xe]  ;;  %v5242_v60 = vrot.slane %v10169_v43, 5 }
 0x2ea   : > { %7690 = vmatmul.mubr.msk.bf16.gmra.mrb[32].mxu1 %vm10800_vm3, %v8207_v6  ;;  %v4933_v6 = vrot.slane %v4932_v30, 4  ;;  %v7076_v14 = vcombine.low %v4952_v55, %v4962_v11  ;;  %v4976_v19 = vsel %vm8768_vm7, %v4971_v34, %v4975_v48  ;;  %v4981_v30 = vrot.slane %v4980_v39, 4  ;;  %v5203_v11 = vld [vmem:[#allocation2 + $0x24] sm:$0xe]  ;;  %vm10813_vm3 = vmmov %vm10790_vm1 }
 0x2eb   : > { %7695 = vmatprep.mubr.msk.bf16.mxu1 %vm10802_vm9, %v7072_v53  ;;  %v10234_v53 = vld [vmem:[#allocation2 + $0x50] sm:$0x1]  ;;  %v5024_v21 = vsel %vm8768_vm7, %v5019_v15, %v5023_v5  ;;  %v5029_v48 = vrot.slane %v5028_v31, 4  ;;  %v7088_v3 = vrot.slane %v5201_v42, 9  ;;  %v7090_v34 = vrot.slane %v5203_v11, 9  ;;  %vm10814_vm9 = vmmov %vm10790_vm1 }
 0x2ec   : > { %v4938_v23 = vsel %vm8768_vm7, %v4933_v6, %v4937_v47  ;;  %v4983_v0 = vshll.u32 %v10234_v53, 16  ;;  %v5031_v47 = vshll.u32 %v10256_v26, 16  ;;  %v5256_v39 = vrot.slane %v10186_v28, 5 }
 0x2ed   : > { %v7075_v50 = vcombine.low %v4928_v61, %v4938_v23  ;;  %v5250_v46 = vsel %vm8547_vm4, %v7090_v34, %v5249_v1  ;;  %v5266_v28 = vrot.slane %v10209_v44, 5  ;;  %v5270_v44 = vrot.slane %v10212_v16, 5 }
 0x2ee   : > { %v4985_v52 = vrot.slane %v4983_v0, 5  ;;  %v5033_v61 = vrot.slane %v5031_v47, 5  ;;  %v5251_v0 = vrot.slane %v5249_v1, 4  ;;  %v5257_v7 = vsel %vm8547_vm4, %v7091_v22, %v5256_v39  ;;  %v5206_v47 = vld [vmem:[#allocation2 + $0x48] sm:$0xe] }
 0x2ef   : > { %v7093_v16 = vrot.slane %v5206_v47, 9  ;;  %v10339_v1 = vld [vmem:[%s10647_s4 + $0x10] sm:$0x3]  ;;  %v8214_v47 = vld [vmem:[#allocation2 + $0x60] sm:$0xff]  }
 0x2f0   : > { %v5034_v55 = vsel %vm8768_vm7, %v5029_v48, %v5033_v61  ;;  %v5253_v10 = vsel %vm8547_vm4, %v5251_v0, %v5252_v20 }
 0x2f1   : > { %v7079_v45 = vcombine.low %v5024_v21, %v5034_v55  ;;  %v7099_v56 = vcombine.low %v5250_v46, %v5253_v10  ;;  %v5208_v21 = vld [vmem:[#allocation2 + $0x60] sm:$0xe] }
 0x2f2   : > { %7696 = vmatmul.mubr.msk.bf16.vlgmr.msra.gmra.mrb[20].mxu1 %vm10803_vm10, %v7073_v62  ;;  %vm10815_vm10 = vmmov %vm10790_vm1 }
 0x2f3   : > { %7712 = vmatpush3.bf16.msra.mxu1 %v5340_v35  ;;  %7699 = vmatprep.mubr.msk.bf16.mxu1 %vm10790_vm1, %v7074_v17  ;;  %v4994_v35 = vor.u32 %v4993_v29, %v4990_v12  ;;  %v4986_v17 = vsel %vm8768_vm7, %v4981_v30, %v4985_v52  ;;  %v5235_v12 = vrot.slane %v10160_v8, 5  ;;  %v5205_v52 = vld [vmem:[#allocation2 + $0x3c] sm:$0xe] }
 0x2f4   : > { %8086 = vmatprep.subr.msk.bf16.mxu1 %vm10804_vm13, %v10226_v41  ;;  %v7077_v49 = vcombine.low %v4976_v19, %v4986_v17  ;;  %v5258_v41 = vrot.slane %v5256_v39, 4  ;;  %v5265_v19 = vrot.slane %v5263_v32, 4  ;;  %v7092_v57 = vrot.slane %v5205_v52, 9  ;;  %vm10816_vm13 = vmmov %vm10790_vm1  ;;  %v10357_v52 = vld [vmem:[#allocation2 + $0x34] sm:$0xf] }
 0x2f5   : > { %v4995_v62 = vrot.slane %v4994_v35, 4  ;;  %v5237_v6 = vrot.slane %v5235_v12, 4  ;;  %v5236_v27 = vsel %vm8547_vm4, %v7088_v3, %v5235_v12  ;;  %v5245_v35 = vrot.slane %v10179_v25, 5  ;;  %v5207_v12 = vld [vmem:[#allocation2 + $0x54] sm:$0xe] }
 0x2f6   : > { %v5260_v2 = vsel %vm8547_vm4, %v5258_v41, %v5259_v58  ;;  %v5267_v30 = vsel %vm8547_vm4, %v5265_v19, %v5266_v28  ;;  %v5264_v51 = vsel %vm8547_vm4, %v7092_v57, %v5263_v32  ;;  %v5273_v17 = vrot.slane %v10234_v53, 5  ;;  %v5660_v58 = vld [vmem:[#allocation2 + $0x30] sm:$0xf] }
 0x2f7   : > { %v5000_v9 = vsel %vm8768_vm7, %v4995_v62, %v4999_v4  ;;  %v5239_v8 = vsel %vm8547_vm4, %v5237_v6, %v5238_v54  ;;  %v5202_v4 = vld [vmem:[#allocation2 + $0x18] sm:$0xe]  ;;  %v7130_v62 = vld [vmem:[%s10647_s4 + $0xe] sm:$0x3]  ;;  %v7100_v5 = vcombine.low %v5257_v7, %v5260_v2  ;;  %v7101_v63 = vcombine.low %v5264_v51, %v5267_v30  ;;  %v10360_v30 = vld [vmem:[#allocation2 + $0x2c] sm:$0x1] }
 0x2f8   : > { %v7078_v29 = vcombine.low %v5000_v9, %v5010_v13  ;;  %v7097_v23 = vcombine.low %v5236_v27, %v5239_v8  ;;  %v7089_v43 = vrot.slane %v5202_v4, 9  ;;  %v5277_v9 = vrot.slane %v10219_v36, 5  ;;  %v8210_v27 = vld [vmem:[#allocation2 + $0x30] sm:$0xff]  }
 0x2f9   : > { %v5272_v13 = vrot.slane %v5270_v44, 4  ;;  %v7094_v31 = vrot.slane %v5207_v12, 9  ;;  %v5271_v53 = vsel %vm8547_vm4, %v7093_v16, %v5270_v44  ;;  %v5284_v54 = vrot.slane %v10244_v33, 5  ;;  %v8213_v44 = vld [vmem:[#allocation2 + $0x54] sm:$0xff]  }
 0x2fa   : > { %7700 = vmatmul.mubr.msk.bf16.gmra.mrb[24].mxu1 %vm10805_vm11, %v7075_v50  ;;  %v5244_v50 = vrot.slane %v5242_v60, 4  ;;  %v5243_v25 = vsel %vm8547_vm4, %v7089_v43, %v5242_v60  ;;  %v5287_v6 = vrot.slane %v10256_v26, 5  ;;  %v7095_v3 = vrot.slane %v5208_v21, 9  ;;  %v8208_v60 = vld [vmem:[#allocation2 + $0x18] sm:$0xff]   ;;  %vm10817_vm11 = vmmov %vm10790_vm1  ;;  %v8209_v26 = vld [vmem:[#allocation2 + $0x24] sm:$0xff]  }
 0x2fb   : > { %7703 = vmatprep.mubr.msk.bf16.mxu1 %vm10806_vm12, %v7076_v14  ;;  %v5274_v15 = vsel %vm8547_vm4, %v5272_v13, %v5273_v17  ;;  %v5286_v48 = vrot.slane %v5284_v54, 4  ;;  %vm10818_vm12 = vmmov %vm10790_vm1  ;;  %v8211_v43 = vld [vmem:[#allocation2 + $0x3c] sm:$0xff]   ;;  %v5727_v22 = vshrl.u32 %v5660_v58, 16  ;;  %v5730_v2 = vshll.u32 %v5660_v58, 16  ;;  %v10385_v58 = vld [vmem:[#allocation2 + $0x44] sm:$0x1] }
 0x2fc   : > { %v5246_v14 = vsel %vm8547_vm4, %v5244_v50, %v5245_v35  ;;  %v7102_v61 = vcombine.low %v5271_v53, %v5274_v15  ;;  %v5285_v33 = vsel %vm8547_vm4, %v7095_v3, %v5284_v54  ;;  %v10343_v35 = vld [vmem:[#allocation2 + $0x1c] sm:$0xf]  ;;  %v5657_v50 = vld [vmem:[#allocation2 + $0x24] sm:$0xf]  ;;  %v5722_v12 = vshll.u32 %v10360_v30, 16 }
 0x2fd   : > { %v7098_v18 = vcombine.low %v5243_v25, %v5246_v14  ;;  %v5288_v8 = vsel %vm8547_vm4, %v5286_v48, %v5287_v6  ;;  %v5688_v11 = vshll.u32 %v10343_v35, 16  ;;  %v5692_v0 = vshrl.u32 %v10343_v35, 16  ;;  %v10349_v14 = vld [vmem:[#allocation2 + $0x28] sm:$0xf]  ;;  %v5663_v17 = vld [vmem:[#allocation2 + $0x3c] sm:$0xf] }
 0x2fe   : > { %v7104_v55 = vcombine.low %v5285_v33, %v5288_v8  ;;  %v5703_v34 = vshrl.u32 %v5657_v50, 16  ;;  %v5706_v10 = vshll.u32 %v5657_v50, 16  ;;  %v8212_v25 = vld [vmem:[#allocation2 + $0x48] sm:$0xff]   ;;  %v5716_v28 = vshrl.u32 %v10349_v14, 16  ;;  %v10369_v21 = vld [vmem:[#allocation2 + $0x40] sm:$0xf] }
 0x2ff   : > { %v5690_v46 = vrot.slane %v5688_v11, 5  ;;  %v5694_v32 = vrot.slane %v5692_v0, 4  ;;  %v5732_v16 = vrot.slane %v5730_v2, 5  ;;  %v5666_v15 = vld [vmem:[#allocation2 + $0x48] sm:$0xf]  ;;  %v5751_v53 = vshrl.u32 %v5663_v17, 16 }
 0x300   : > { %v5708_v40 = vrot.slane %v5706_v10, 5  ;;  %v5718_v51 = vrot.slane %v5716_v28, 4  ;;  %v5754_v54 = vshll.u32 %v5663_v17, 16  ;;  %v5775_v3 = vshrl.u32 %v5666_v15, 16  ;;  %v8215_v50 = vld [vmem:[#allocation2 + $0x6c] sm:$0xff]  }
 0x301   : > { %v5695_v57 = vor.u32 %v5694_v32, %v5690_v46  ;;  %v5778_v8 = vshll.u32 %v5666_v15, 16  ;;  %v10393_v17 = vld [vmem:[#allocation2 + $0x58] sm:$0xf] }
 0x302   : > { %7704 = vmatmul.mubr.msk.bf16.gmra.mrb[28].mxu1 %vm10807_vm8, %v7077_v49  ;;  %v5280_v49 = vrot.slane %v10240_v24, 5  ;;  %v5278_v24 = vsel %vm8547_vm4, %v7094_v31, %v5277_v9  ;;  %vm10819_vm8 = vmmov %vm10801_vm0  ;;  %v5777_v10 = vrot.slane %v5775_v3, 4 }
 0x303   : > { %7707 = vmatprep.mubr.msk.bf16.mxu1 %vm10808_vm14, %v7078_v29  ;;  %v5279_v29 = vrot.slane %v5277_v9, 4  ;;  %vm10820_vm14 = vmmov %vm10790_vm1  ;;  %v5736_v9 = vshll.u32 %v10357_v52, 16  ;;  %v5696_v31 = vrot.slane %v5695_v57, 4  ;;  %v10390_v57 = vld [vmem:[#allocation2 + $0x50] sm:$0x1] }
 0x305   : > { %v5281_v36 = vsel %vm8547_vm4, %v5279_v29, %v5280_v49  ;;  %v5729_v29 = vrot.slane %v5727_v22, 4 }
 0x306   : > { %v7103_v42 = vcombine.low %v5278_v24, %v5281_v36  ;;  %v10367_v36 = vld [vmem:[#allocation2 + $0x38] sm:$0x1] }
 0x30a   : > { %7708 = vmatmul.mubr.msk.bf16.gmra.mrb[32].mxu1 %vm10809_vm5, %v7079_v45  ;;  %v5921_v45 = vsel %vm10819_vm8, %v7130_v62, 0  ;;  %vm10821_vm5 = vmmov %vm10790_vm1 }
 0x30b   : > { %7713 = vmatprep.mubr.msk.bf16.mxu1 %vm10810_vm15, %v7097_v23  ;;  %v5654_v23 = vld [vmem:[#allocation2 + $0x18] sm:$0xf]  ;;  %vm10822_vm15 = vmmov %vm10801_vm0 }
 0x30c   : > { %v5679_v4 = vshrl.u32 %v5654_v23, 16  ;;  %v5682_v20 = vshll.u32 %v5654_v23, 16  ;;  %v5756_v23 = vrot.slane %v5754_v54, 5 }
 0x30e   : > { %v5681_v39 = vrot.slane %v5679_v4, 4  ;;  %v5760_v4 = vshll.u32 %v10369_v21, 16 }
 0x310   : > { %v5762_v28 = vrot.slane %v5760_v4, 5 }
 0x312   : > { %7714 = vmatmul.mubr.msk.bf16.vlgmr.msra.gmra.mrb[20].mxu1 %vm10812_vm2, %v7098_v18  ;;  %v5684_v18 = vrot.slane %v5682_v20, 5  ;;  %vm10824_vm2 = vmmov %vm10790_vm1  ;;  %v5764_v20 = vshrl.u32 %v10369_v21, 16 }
 0x313   : > { %7730 = vmatpush3.bf16.msra.mxu1 %v5539_v38  ;;  %7717 = vmatprep.mubr.msk.bf16.mxu1 %vm10813_vm3, %v7099_v56  ;;  %v10352_v38 = vld [vmem:[#allocation2 + $0x20] sm:$0x1]  ;;  %v5712_v56 = vshll.u32 %v10349_v14, 16  ;;  %vm10825_vm3 = vmmov %vm10790_vm1 }
 0x314   : > { %8087 = vmatprep.subr.msk.bf16.mxu1 %vm10801_vm0, %v7130_v62  ;;  %v5705_v62 = vrot.slane %v5703_v34, 4  ;;  %v5685_v41 = vor.u32 %v5684_v18, %v5681_v39  ;;  %v5698_v19 = vshll.u32 %v10352_v38, 16  ;;  %vm10826_vm0 = vmmov %vm10790_vm1 }
 0x315   : > { %v5714_v7 = vrot.slane %v5712_v56, 5 }
 0x316   : > { %v5686_v49 = vrot.slane %v5685_v41, 4  ;;  %v5700_v13 = vrot.slane %v5698_v19, 5  ;;  %v5766_v41 = vrot.slane %v5764_v20, 4  ;;  %v5672_v19 = vld [vmem:[#allocation2 + $0x60] sm:$0xf] }
 0x317   : > { %v5719_v24 = vor.u32 %v5718_v51, %v5714_v7  ;;  %v10412_v20 = vld [vmem:[#allocation2 + $0x5c] sm:$0x1] }
 0x318   : > { %v5691_v48 = vsel %vm8768_vm7, %v5686_v49, %v5690_v46  ;;  %v5701_v33 = vsel %vm8768_vm7, %v5696_v31, %v5700_v13  ;;  %v5669_v46 = vld [vmem:[#allocation2 + $0x54] sm:$0xf]  ;;  %v5823_v13 = vshrl.u32 %v5672_v19, 16  ;;  %v5767_v15 = vor.u32 %v5766_v41, %v5762_v28 }
 0x319   : > { %v7131_v11 = vcombine.low %v5691_v48, %v5701_v33  ;;  %v5794_v31 = vshll.u32 %v10390_v57, 16  ;;  %v5818_v41 = vshll.u32 %v10412_v20, 16 }
 0x31a   : > { %7718 = vmatmul.mubr.msk.bf16.gmra.mrb[24].mxu1 %vm10814_vm9, %v7100_v5  ;;  %v5709_v5 = vor.u32 %v5708_v40, %v5705_v62  ;;  %vm10827_vm9 = vmmov %vm10826_vm0 }
 0x31b   : > { %7721 = vmatprep.mubr.msk.bf16.mxu1 %vm10815_vm10, %v7101_v63  ;;  %v5740_v63 = vshrl.u32 %v10357_v52, 16  ;;  %vm10828_vm10 = vmmov %vm10826_vm0 }
 0x31d   : > { %v5742_v6 = vrot.slane %v5740_v63, 4 }
 0x322   : > { %7722 = vmatmul.mubr.msk.bf16.gmra.mrb[28].mxu1 %vm10790_vm1, %v7102_v61  ;;  %v5710_v61 = vrot.slane %v5709_v5, 4  ;;  %v5770_v5 = vshll.u32 %v10385_v58, 16  ;;  %vm10829_vm1 = vmmov %vm10819_vm8 }
 0x323   : > { %7725 = vmatprep.mubr.msk.bf16.mxu1 %vm10816_vm13, %v7103_v42  ;;  %v5738_v42 = vrot.slane %v5736_v9, 5  ;;  %vm10830_vm13 = vmmov %vm10826_vm0 }
 0x324   : > { %v5715_v0 = vsel %vm8768_vm7, %v5710_v61, %v5714_v7  ;;  %v5799_v7 = vshrl.u32 %v5669_v46, 16  ;;  %v5772_v48 = vrot.slane %v5770_v5, 5  ;;  %vm10833_vm8 = vmmov %vm10826_vm0 }
 0x325   : > { %v5743_v34 = vor.u32 %v5742_v6, %v5738_v42 }
 0x326   : > { %v5801_v54 = vrot.slane %v5799_v7, 4 }
 0x327   : > { %v5744_v2 = vrot.slane %v5743_v34, 4 }
 0x32a   : > { %7726 = vmatmul.mubr.msk.bf16.gmra.mrb[32].mxu1 %vm10817_vm11, %v7104_v55  ;;  %v5724_v55 = vrot.slane %v5722_v12, 5  ;;  %v5826_v12 = vshll.u32 %v5672_v19, 16  ;;  %vm10831_vm11 = vmmov %vm10826_vm0 }
 0x32b   : > { %7731 = vmatprep.mubr.msk.bf16.mxu1 %vm10818_vm12, %v8208_v60  ;;  %v5733_v60 = vor.u32 %v5732_v16, %v5729_v29  ;;  %vm10832_vm12 = vmmov %vm10826_vm0 }
 0x32c   : > { %v5828_v33 = vrot.slane %v5826_v12, 5 }
 0x32d   : > { %v5734_v32 = vrot.slane %v5733_v60, 4 }
 0x32f   : > { %v5739_v49 = vsel %vm8768_vm7, %v5734_v32, %v5738_v42 }
 0x332   : > { %7732 = vmatmul.mubr.msk.bf16.vlgmr.msra.gmra.mrb[20].mxu1 %vm10820_vm14, %v8209_v26  ;;  %v5746_v26 = vshll.u32 %v10367_v36, 16  ;;  %vm10834_vm14 = vmmov %vm10826_vm0 }
 0x333   : > { %7748 = vmatpush3.bf16.msra.mxu1 %v5921_v45  ;;  %7735 = vmatprep.mubr.msk.bf16.mxu1 %vm10821_vm5, %v8210_v27  ;;  %v10376_v45 = vld [vmem:[#allocation2 + $0x4c] sm:$0xf]  ;;  %v5753_v27 = vrot.slane %v5751_v53, 4  ;;  %v10402_v53 = vld [vmem:[#allocation2 + $0x64] sm:$0xf]  ;;  %vm10835_vm5 = vmmov %vm10826_vm0 }
 0x334   : > { %8088 = vmatprep.subr.msk.bf16.mxu1 %vm10822_vm15, %v10339_v1  ;;  %v5784_v39 = vshll.u32 %v10376_v45, 16  ;;  %v5788_v18 = vshrl.u32 %v10376_v45, 16  ;;  %v5748_v56 = vrot.slane %v5746_v26, 5  ;;  %v5836_v60 = vshrl.u32 %v10402_v53, 16  ;;  %v5675_v26 = vld [vmem:[#allocation2 + $0x6c] sm:$0xf]  ;;  %vm10836_vm15 = vmmov %vm10826_vm0 }
 0x335   : > { %v5757_v40 = vor.u32 %v5756_v23, %v5753_v27  ;;  %v5768_v27 = vrot.slane %v5767_v15, 4  ;;  %v5796_v23 = vrot.slane %v5794_v31, 5 }
 0x336   : > { %v5786_v9 = vrot.slane %v5784_v39, 5  ;;  %v5790_v63 = vrot.slane %v5788_v18, 4  ;;  %v5749_v29 = vsel %vm8768_vm7, %v5744_v2, %v5748_v56  ;;  %v5850_v39 = vshll.u32 %v5675_v26, 16 }
 0x337   : > { %v5758_v16 = vrot.slane %v5757_v40, 4  ;;  %v7133_v6 = vcombine.low %v5739_v49, %v5749_v29  ;;  %v5773_v18 = vsel %vm8768_vm7, %v5768_v27, %v5772_v48  ;;  %v5838_v56 = vrot.slane %v5836_v60, 4  ;;  %v10432_v29 = vld [vmem:[#allocation2 + $0x74] sm:$0x1]  ;;  %v6036_v27 = vld [vmem:[#allocation2 + $0x18] sm:$0xe] }
 0x338   : > { %v5791_v3 = vor.u32 %v5790_v63, %v5786_v9  ;;  %v5852_v5 = vrot.slane %v5850_v39, 5  ;;  %v5820_v49 = vrot.slane %v5818_v41, 5  ;;  %v6073_v60 = vrot.slane %v10352_v38, 5 }
 0x339   : > { %v5763_v4 = vsel %vm8768_vm7, %v5758_v16, %v5762_v28 }
 0x33a   : > { %7736 = vmatmul.mubr.msk.bf16.gmra.mrb[24].mxu1 %vm10823_vm6, %v8211_v43  ;;  %v5720_v43 = vrot.slane %v5719_v24, 4  ;;  %v5808_v24 = vshll.u32 %v10393_v17, 16  ;;  %v5792_v34 = vrot.slane %v5791_v3, 4  ;;  %v7134_v40 = vcombine.low %v5763_v4, %v5773_v18  ;;  %vm10837_vm6 = vmmov %vm10826_vm0 }
 0x33b   : > { %7739 = vmatprep.mubr.msk.bf16.mxu1 %vm10824_vm2, %v8212_v25  ;;  %v5780_v25 = vrot.slane %v5778_v8, 5  ;;  %v5825_v8 = vrot.slane %v5823_v13, 4  ;;  %v6070_v3 = vrot.slane %v10343_v35, 5  ;;  %v6080_v18 = vrot.slane %v10360_v30, 5  ;;  %vm10839_vm2 = vmmov %vm10826_vm0 }
 0x33c   : > { %v5725_v62 = vsel %vm8768_vm7, %v5720_v43, %v5724_v55  ;;  %v5832_v55 = vshll.u32 %v10402_v53, 16  ;;  %v5797_v28 = vsel %vm8768_vm7, %v5792_v34, %v5796_v23 }
 0x33d   : > { %v7132_v22 = vcombine.low %v5715_v0, %v5725_v62  ;;  %v5781_v51 = vor.u32 %v5780_v25, %v5777_v10  ;;  %v10416_v10 = vld [vmem:[#allocation2 + $0x68] sm:$0x1]  ;;  %v5847_v25 = vshrl.u32 %v5675_v26, 16  ;;  %v10420_v62 = vld [vmem:[#allocation2 + $0x70] sm:$0xf]  ;;  %v6072_v23 = vrot.slane %v6070_v3, 4 }
 0x33e   : > { %v5834_v32 = vrot.slane %v5832_v55, 5  ;;  %v5842_v7 = vshll.u32 %v10416_v10, 16 }
 0x33f   : > { %v5782_v42 = vrot.slane %v5781_v51, 4  ;;  %v5856_v51 = vshll.u32 %v10420_v62, 16  ;;  %v6074_v35 = vsel %vm8547_vm4, %v6072_v23, %v6073_v60  ;;  %v6122_v60 = vrot.slane %v10432_v29, 5 }
 0x340   : > { %v5844_v12 = vrot.slane %v5842_v7, 5 }
 0x341   : > { %v5787_v43 = vsel %vm8768_vm7, %v5782_v42, %v5786_v9  ;;  %v5860_v9 = vshrl.u32 %v10420_v62, 16  ;;  %v5858_v31 = vrot.slane %v5856_v51, 5  ;;  %v6101_v51 = vrot.slane %v10390_v57, 5 }
 0x342   : > { %7740 = vmatmul.mubr.msk.bf16.gmra.mrb[28].mxu1 %vm10825_vm3, %v8213_v44  ;;  %v5802_v44 = vshll.u32 %v5669_v46, 16  ;;  %v5829_v46 = vor.u32 %v5828_v33, %v5825_v8  ;;  %v7135_v19 = vcombine.low %v5787_v43, %v5797_v28  ;;  %v6077_v43 = vrot.slane %v10349_v14, 5  ;;  %vm10840_vm3 = vmmov %vm10826_vm0 }
 0x343   : > { %7743 = vmatprep.mubr.msk.bf16.mxu1 %vm10826_vm0, %v8214_v47  ;;  %v6175_v47 = vsel %vm10829_vm1, %v10339_v1, 0  ;;  %v5812_v1 = vshrl.u32 %v10393_v17, 16  ;;  %vm10843_vm1 = vmmov %vm10826_vm0 }
 0x344   : > { %v5804_v61 = vrot.slane %v5802_v44, 5  ;;  %v5849_v44 = vrot.slane %v5847_v25, 4  ;;  %v5830_v63 = vrot.slane %v5829_v46, 4  ;;  %v6084_v25 = vrot.slane %v10357_v52, 5  ;;  %v6037_v46 = vld [vmem:[#allocation2 + $0x24] sm:$0xe] }
 0x345   : > { %v5814_v0 = vrot.slane %v5812_v1, 4  ;;  %v6079_v59 = vrot.slane %v6077_v43, 4  ;;  %v7148_v14 = vrot.slane %v6037_v46, 9 }
 0x346   : > { %v5853_v15 = vor.u32 %v5852_v5, %v5849_v44  ;;  %v6094_v44 = vrot.slane %v10385_v58, 5  ;;  %v6039_v5 = vld [vmem:[#allocation2 + $0x3c] sm:$0xe] }
 0x347   : > { %v6081_v28 = vsel %vm8547_vm4, %v6079_v59, %v6080_v18  ;;  %v6078_v30 = vsel %vm8547_vm4, %v7148_v14, %v6077_v43 }
 0x348   : > { %v5854_v33 = vrot.slane %v5853_v15, 4  ;;  %v6112_v15 = vrot.slane %v10402_v53, 5 }
 0x34a   : > { %7744 = vmatmul.mubr.msk.bf16.gmra.mrb[32].mxu1 %vm10827_vm9, %v8215_v50  ;;  %v5805_v50 = vor.u32 %v5804_v61, %v5801_v54  ;;  %v5862_v54 = vrot.slane %v5860_v9, 4  ;;  %v5835_v61 = vsel %vm8768_vm7, %v5830_v63, %v5834_v32  ;;  %v5859_v4 = vsel %vm8768_vm7, %v5854_v33, %v5858_v31  ;;  %v6040_v63 = vld [vmem:[#allocation2 + $0x48] sm:$0xe]  ;;  %vm10841_vm9 = vmmov %vm10826_vm0 }
 0x34b   : > { %7749 = vmatprep.mubr.msk.bf16.mxu1 %vm10828_vm10, %v7131_v11  ;;  %v5810_v11 = vrot.slane %v5808_v24, 5  ;;  %vm10842_vm10 = vmmov %vm10826_vm0 }
 0x34c   : > { %v5863_v55 = vor.u32 %v5862_v54, %v5858_v31  ;;  %v6108_v54 = vrot.slane %v10412_v20, 5 }
 0x34d   : > { %v5815_v2 = vor.u32 %v5814_v0, %v5810_v11 }
 0x34f   : > { %v5816_v16 = vrot.slane %v5815_v2, 4  ;;  %v6098_v2 = vrot.slane %v10376_v45, 5 }
 0x351   : > { %v5821_v1 = vsel %vm8768_vm7, %v5816_v16, %v5820_v49 }
 0x352   : > { %7750 = vmatmul.mubr.msk.bf16.vlgmr.msra.gmra.mrb[20].mxu1 %vm10830_vm13, %v7132_v22  ;;  %v5806_v22 = vrot.slane %v5805_v50, 4  ;;  %v5864_v50 = vrot.slane %v5863_v55, 4  ;;  %vm6362_vm13 = vcmask 1046528  }
 0x353   : > { %7766 = vmatpush3.bf16.msra.mxu1 %v6175_v47  ;;  %7753 = vmatprep.mubr.msk.bf16.mxu1 %vm10831_vm11, %v7133_v6  ;;  %v5839_v47 = vor.u32 %v5838_v56, %v5834_v32  ;;  %v5866_v6 = vshll.u32 %v10432_v29, 16  ;;  %v6087_v32 = vrot.slane %v10367_v36, 5  ;;  %v6038_v56 = vld [vmem:[#allocation2 + $0x30] sm:$0xe] }
 0x354   : > { %v5811_v13 = vsel %vm8768_vm7, %v5806_v22, %v5810_v11  ;;  %v7147_v11 = vrot.slane %v6036_v27, 9  ;;  %v7149_v41 = vrot.slane %v6038_v56, 9  ;;  %v7157_v22 = vcombine.low %v6078_v30, %v6081_v28  ;;  %v7177_v28 = vld [vmem:[%s8452_s12 + $0x2c] sm:$0x1] }
 0x355   : > { %v5840_v24 = vrot.slane %v5839_v47, 4  ;;  %v7136_v48 = vcombine.low %v5811_v13, %v5821_v1  ;;  %v5868_v26 = vrot.slane %v5866_v6, 5  ;;  %v6100_v47 = vrot.slane %v6098_v2, 4  ;;  %v6042_v6 = vld [vmem:[#allocation2 + $0x60] sm:$0xe] }
 0x356   : > { %v6071_v38 = vsel %vm8547_vm4, %v7147_v11, %v6070_v3  ;;  %v6085_v36 = vsel %vm8547_vm4, %v7149_v41, %v6084_v25  ;;  %v7151_v13 = vrot.slane %v6040_v63, 9  ;;  %v7153_v3 = vrot.slane %v6042_v6, 9  ;;  %v7239_v11 = vld [vmem:[%s8452_s12 + $0x18] sm:$0xff]  }
 0x357   : > { %v5845_v42 = vsel %vm8768_vm7, %v5840_v24, %v5844_v12  ;;  %v5869_v0 = vsel %vm8768_vm7, %v5864_v50, %v5868_v26  ;;  %v7156_v39 = vcombine.low %v6071_v38, %v6074_v35  ;;  %vm10838_vm7 = vmmov %vm10826_vm0  ;;  %v6102_v45 = vsel %vm8547_vm4, %v6100_v47, %v6101_v51  ;;  %v6043_v26 = vld [vmem:[#allocation2 + $0x6c] sm:$0xe]  ;;  %v7174_v35 = vld [vmem:[%s8452_s12 + $0x20] sm:$0x1] }
 0x358   : > { %v7137_v8 = vcombine.low %v5835_v61, %v5845_v42  ;;  %v7138_v34 = vcombine.low %v5859_v4, %v5869_v0  ;;  %v6105_v12 = vrot.slane %v10393_v17, 5  ;;  %v6099_v57 = vsel %vm8547_vm4, %v7151_v13, %v6098_v2  ;;  %v6041_v61 = vld [vmem:[#allocation2 + $0x54] sm:$0xe]  ;;  %v10510_v38 = vld [vmem:[%s10648_s5] ss:$0 sm:$0xff] }
 0x359   : > { %v7160_v31 = vcombine.low %v6099_v57, %v6102_v45  ;;  %v6115_v24 = vrot.slane %v10416_v10, 5  ;;  %v7152_v17 = vrot.slane %v6041_v61, 9  ;;  %v6119_v10 = vrot.slane %v10420_v62, 5 }
 0x35a   : > { %7754 = vmatmul.mubr.msk.bf16.gmra.mrb[24].mxu1 %vm10832_vm12, %v7134_v40  ;;  %v6086_v40 = vrot.slane %v6084_v25, 4  ;;  %v6107_v1 = vrot.slane %v6105_v12, 4  ;;  %v6113_v33 = vsel %vm8547_vm4, %v7153_v3, %v6112_v15  ;;  %v7154_v23 = vrot.slane %v6043_v26, 9 }
 0x35b   : > { %7757 = vmatprep.mubr.msk.bf16.mxu1 %vm10833_vm8, %v7135_v19  ;;  %v6091_v19 = vrot.slane %v10369_v21, 5  ;;  %v7150_v21 = vrot.slane %v6039_v5, 9  ;;  %v6106_v20 = vsel %vm8547_vm4, %v7152_v17, %v6105_v12  ;;  %v6121_v27 = vrot.slane %v6119_v10, 4 }
 0x35c   : > { %v6088_v52 = vsel %vm8547_vm4, %v6086_v40, %v6087_v32  ;;  %v6109_v42 = vsel %vm8547_vm4, %v6107_v1, %v6108_v54  ;;  %v6120_v62 = vsel %vm8547_vm4, %v7154_v23, %v6119_v10  ;;  %v7225_v0 = vunpack.c.l.bf16 %v7239_v11 }
 0x35d   : > { %v7158_v7 = vcombine.low %v6085_v36, %v6088_v52  ;;  %v6093_v9 = vrot.slane %v6091_v19, 4  ;;  %v6092_v58 = vsel %vm8547_vm4, %v7150_v21, %v6091_v19  ;;  %v6123_v4 = vsel %vm8547_vm4, %v6121_v27, %v6122_v60 }
 0x35e   : > { %v7163_v50 = vcombine.low %v6120_v62, %v6123_v4  ;;  %v7226_v29 = vunpack.c.h.bf16 %v7239_v11  ;;  %v6316_v43 = vunpack.c.l.bf16 %v7174_v35  ;;  %v6363_v25 = vrot.slane %v7225_v0, 1 }
 0x35f   : > { %v6095_v49 = vsel %vm8547_vm4, %v6093_v9, %v6094_v44  ;;  %v6319_v44 = vunpack.c.l.bf16 %v7177_v28  ;;  %v7240_v9 = vld [vmem:[%s8452_s12 + $0x30] sm:$0xff]  }
 0x360   : > { %v7159_v16 = vcombine.low %v6092_v58, %v6095_v49  ;;  %v6366_v32 = vrot.slane %v6316_v43, 1  ;;  %v7230_v57 = vunpack.c.h.bf16 %v7240_v9 }
 0x361   : > { %v6371_v12 = vrot.slane %v6319_v44, 1 }
 0x362   : > { %7758 = vmatmul.mubr.msk.bf16.gmra.mrb[28].mxu1 %vm10834_vm14, %v7136_v48  ;;  %v6114_v48 = vrot.slane %v6112_v15, 4 }
 0x363   : > { %7761 = vmatprep.mubr.msk.bf16.mxu1 %vm10835_vm5, %v7137_v8  ;;  %v7161_v8 = vcombine.low %v6106_v20, %v6109_v42  ;;  %v6374_v42 = vrot.slane %v7230_v57, 1 }
 0x364   : > { %v6116_v53 = vsel %vm8547_vm4, %v6114_v48, %v6115_v24 }
 0x365   : > { %v7162_v55 = vcombine.low %v6113_v33, %v6116_v53  ;;  %v7181_v53 = vld [vmem:[%s8452_s12 + $0x3c] sm:$0xff]  }
 0x366   : > { %v6323_v23 = vunpack.c.l.bf16 %v7181_v53  ;;  %v6324_v4 = vunpack.c.h.bf16 %v7181_v53  ;;  %v7242_v53 = vld [vmem:[%s8452_s12 + $0x60] sm:$0xff]  }
 0x36a   : > { %7762 = vmatmul.mubr.msk.bf16.gmra.mrb[32].mxu1 %vm10836_vm15, %v7138_v34  ;;  %v7175_v34 = vld [vmem:[%s8452_s12 + $0x24] sm:$0xff]  }
 0x36b   : > { %7767 = vmatprep.mubr.msk.bf16.mxu1 %vm10837_vm6, %v7156_v39  ;;  %v6364_v39 = vrot.slane %v7226_v29, 1  ;;  %v6317_v59 = vunpack.c.l.bf16 %v7175_v34  ;;  %v6318_v56 = vunpack.c.h.bf16 %v7175_v34 }
 0x36d   : > { %v6365_v52 = vsel %vm6362_vm13, %v6363_v25, %v6364_v39  ;;  %v6367_v36 = vsel %vm6362_vm13, %v6364_v39, %v6366_v32  ;;  %v6368_v2 = vrot.slane %v6317_v59, 1  ;;  %v6378_v25 = vrot.slane %v6323_v23, 1  ;;  %v7192_v23 = vld [vmem:[%s8452_s12 + $0x68] sm:$0x1] }
 0x36e   : > { %v6379_v39 = vrot.slane %v6324_v4, 1 }
 0x372   : > { %7768 = vmatmul.mubr.msk.bf16.vlgmr.msra.gmra.mrb[20].mxu1 %vm10838_vm7, %v7157_v22 }
 0x373   : > { %7771 = vmatprep.mubr.msk.bf16.mxu1 %vm10839_vm2, %v7158_v7  ;;  %v6369_v7 = vrot.slane %v6318_v56, 1 }
 0x375   : > { %v6370_v58 = vsel %vm6362_vm13, %v6368_v2, %v6369_v7  ;;  %v6372_v48 = vsel %vm6362_vm13, %v6369_v7, %v6371_v12 }
 0x37a   : > { %7772 = vmatmul.mubr.msk.bf16.gmra.mrb[24].mxu1 %vm10840_vm3, %v7159_v16  ;;  %v7229_v16 = vunpack.c.l.bf16 %v7240_v9 }
 0x37b   : > { %7775 = vmatprep.mubr.msk.bf16.mxu1 %vm10826_vm0, %v7160_v31  ;;  %v7180_v31 = vld [vmem:[%s8452_s12 + $0x38] sm:$0x1] }
 0x37c   : > { %v6373_v17 = vrot.slane %v7229_v16, 1  ;;  %v6322_v3 = vunpack.c.l.bf16 %v7180_v31 }
 0x37e   : > { %v6375_v26 = vsel %vm6362_vm13, %v6373_v17, %v6374_v42  ;;  %v6376_v27 = vrot.slane %v6322_v3, 1 }
 0x380   : > { %v6377_v34 = vsel %vm6362_vm13, %v6374_v42, %v6376_v27  ;;  %v7238_v27 = vunpack.c.h.bf16 %v7242_v53 }
 0x382   : > { %7776 = vmatmul.mubr.msk.bf16.gmra.mrb[28].mxu1 %vm10841_vm9, %v7161_v8 }
 0x383   : > { %7779 = vmatprep.mubr.msk.bf16.mxu1 %vm10842_vm10, %v7162_v55 }
 0x38a   : > { %7780 = vmatmul.mubr.msk.bf16.gmra.mrb[32].mxu1 %vm10843_vm1, %v7163_v50  ;;  %v7183_v50 = vld [vmem:[%s8452_s12 + $0x44] sm:$0x1] }
 0x445   : > { %v7769_v18 = vpop.f32.mrb[20].mxu1 }
 0x446   : > { %v6211_v46 = vpop.f32.mrb[21].mxu1  ;;  %v6428_v30 = vmul.f32 %v7769_v18, %v10510_v38  ;;  %v6325_v18 = vunpack.c.l.bf16 %v7183_v50 }
 0x447   : > { %v6426_v40 = vmul.f32 %v10510_v38, %v6211_v46  ;;  %v7770_v14 = vpop.f32.mrb[22].mxu1  ;;  %v7241_v46 = vld [vmem:[%s8452_s12 + $0x48] sm:$0xff]  }
 0x448   : > { %v6214_v41 = vpop.f32.mrb[23].mxu1  ;;  %v6451_v63 = vadd.f32 %v10515_v37, %v6428_v30  ;;  %v6429_v47 = vmul.f32 %v7770_v14, %v10510_v38  ;;  %v7233_v30 = vunpack.c.l.bf16 %v7241_v46 }
 0x449   : > { %v6427_v19 = vmul.f32 %v10510_v38, %v6214_v41  ;;  %v6449_v22 = vadd.f32 %v10515_v37, %v6426_v40  ;;  %v6380_v41 = vsel %vm6362_vm13, %v6378_v25, %v6379_v39 }
 0x44a   : > { %v6452_v61 = vadd.f32 %v10515_v37, %v6429_v47  ;;  %v6467_v6 = vadd.f32 %v6451_v63, %v6370_v58  ;;  %v6383_v63 = vrot.slane %v7233_v30, 1 }
 0x44b   : > { %v6450_v5 = vadd.f32 %v10515_v37, %v6427_v19  ;;  %v6465_v51 = vadd.f32 %v6449_v22, %v6365_v52  ;;  %v6381_v52 = vrot.slane %v6325_v18, 1  ;;  %v7234_v19 = vunpack.c.h.bf16 %v7241_v46 }
 0x44c   : > { %v6483_v33 = vmax.f32 %v6467_v6, 0.0  ;;  %v6468_v55 = vadd.f32 %v6452_v61, %v6372_v48 }
 0x44d   : > { %v7773_v21 = vpop.f32.mrb[24].mxu1  ;;  %v6481_v49 = vmax.f32 %v6465_v51, 0.0  ;;  %v6466_v13 = vadd.f32 %v6450_v5, %v6367_v36  ;;  %v7186_v36 = vld [vmem:[%s8452_s12 + $0x50] sm:$0x1]  ;;  %v6382_v9 = vsel %vm6362_vm13, %v6379_v39, %v6381_v52  ;;  %v6384_v47 = vrot.slane %v7234_v19, 1 }
 0x44e   : > { %v6227_v45 = vpop.f32.mrb[25].mxu1  ;;  %v6432_v35 = vmul.f32 %v7773_v21, %v10510_v38  ;;  %v6484_v29 = vmax.f32 %v6468_v55, 0.0  ;;  %v6328_v21 = vunpack.c.l.bf16 %v7186_v36 }
 0x44f   : > { %v7774_v15 = vpop.f32.mrb[26].mxu1  ;;  %6497 = vxpose.xlu0.b32.start [1/16] (narrow) %v6481_v49, 8  ;;  %v6430_v24 = vmul.f32 %v10510_v38, %v6227_v45  ;;  %v6482_v1 = vmax.f32 %v6466_v13, 0.0  ;;  %v7187_v49 = vld [vmem:[%s8452_s12 + $0x54] sm:$0xff]   ;;  %v6385_v16 = vsel %vm6362_vm13, %v6383_v63, %v6384_v47 }
 0x450   : > { %v6230_v54 = vpop.f32.mrb[27].mxu1  ;;  %v6455_v32 = vadd.f32 %v10515_v37, %v6432_v35  ;;  %v6433_v59 = vmul.f32 %v7774_v15, %v10510_v38  ;;  %v6386_v57 = vrot.slane %v6328_v21, 1  ;;  %v6329_v15 = vunpack.c.l.bf16 %v7187_v49 }
 0x451   : > { %v6453_v20 = vadd.f32 %v10515_v37, %v6430_v24  ;;  %v6431_v10 = vmul.f32 %v10510_v38, %v6230_v54  ;;  %v6330_v31 = vunpack.c.h.bf16 %v7187_v49  ;;  %v7189_v54 = vld [vmem:[%s8452_s12 + $0x5c] sm:$0x1] }
 0x452   : > { %v6456_v7 = vadd.f32 %v10515_v37, %v6433_v59  ;;  %v6471_v51 = vadd.f32 %v6455_v32, %v6380_v41  ;;  %v6387_v48 = vsel %vm6362_vm13, %v6384_v47, %v6386_v57  ;;  %v6388_v17 = vrot.slane %v6329_v15, 1 }
 0x453   : > { %6498 = vxpose.xlu0.b32.cont [2/16] (narrow) %v6482_v1, 8  ;;  %v6454_v0 = vadd.f32 %v10515_v37, %v6431_v10  ;;  %v6469_v43 = vadd.f32 %v6453_v20, %v6375_v26  ;;  %v6389_v42 = vrot.slane %v6330_v31, 1  ;;  %v6331_v3 = vunpack.c.l.bf16 %v7189_v54 }
 0x454   : > { %v6487_v58 = vmax.f32 %v6471_v51, 0.0  ;;  %v6472_v12 = vadd.f32 %v6456_v7, %v6382_v9  ;;  %v7237_v26 = vunpack.c.l.bf16 %v7242_v53 }
 0x455   : > { %v7777_v8 = vpop.f32.mrb[28].mxu1  ;;  %v6485_v40 = vmax.f32 %v6469_v43, 0.0  ;;  %v6470_v14 = vadd.f32 %v6454_v0, %v6377_v34  ;;  %v6334_v43 = vunpack.c.l.bf16 %v7192_v23  ;;  %v7193_v34 = vld [vmem:[%s8452_s12 + $0x6c] sm:$0xff]  }
 0x456   : > { %v6243_v60 = vpop.f32.mrb[29].mxu1  ;;  %v6436_v61 = vmul.f32 %v7777_v8, %v10510_v38  ;;  %v6488_v1 = vmax.f32 %v6472_v12, 0.0  ;;  %v6390_v8 = vsel %vm6362_vm13, %v6388_v17, %v6389_v42 }
 0x457   : > { %v7778_v62 = vpop.f32.mrb[30].mxu1  ;;  %6499 = vxpose.xlu0.b32.cont [3/16] (narrow) %v6483_v33, 8  ;;  %v6434_v44 = vmul.f32 %v10510_v38, %v6243_v60  ;;  %v6486_v5 = vmax.f32 %v6470_v14, 0.0  ;;  %v6391_v60 = vrot.slane %v6331_v3, 1  ;;  %v6396_v59 = vrot.slane %v6334_v43, 1 }
 0x458   : > { %v6246_v11 = vpop.f32.mrb[31].mxu1  ;;  %v6459_v20 = vadd.f32 %v10515_v37, %v6436_v61  ;;  %v6437_v10 = vmul.f32 %v7778_v62, %v10510_v38  ;;  %v6393_v62 = vrot.slane %v7237_v26, 1  ;;  %v6336_v14 = vunpack.c.h.bf16 %v7193_v34 }
 0x459   : > { %v6457_v13 = vadd.f32 %v10515_v37, %v6434_v44  ;;  %v6435_v45 = vmul.f32 %v10510_v38, %v6246_v11  ;;  %v6392_v0 = vsel %vm6362_vm13, %v6389_v42, %v6391_v60 }
 0x45a   : > { %v6460_v4 = vadd.f32 %v10515_v37, %v6437_v10  ;;  %v6475_v35 = vadd.f32 %v6459_v20, %v6390_v8 }
 0x45b   : > { %6500 = vxpose.xlu0.b32.cont [4/16] (narrow) %v6484_v29, 8  ;;  %v6458_v24 = vadd.f32 %v10515_v37, %v6435_v45  ;;  %v6473_v6 = vadd.f32 %v6457_v13, %v6385_v16  ;;  %v6394_v29 = vrot.slane %v7238_v27, 1 }
 0x45c   : > { %v6491_v18 = vmax.f32 %v6475_v35, 0.0  ;;  %v6476_v46 = vadd.f32 %v6460_v4, %v6392_v0 }
 0x45d   : > { %v10544_v56 = vpop.f32.mrb[32].mxu1  ;;  %v6489_v33 = vmax.f32 %v6473_v6, 0.0  ;;  %v6474_v55 = vadd.f32 %v6458_v24, %v6387_v48  ;;  %v6395_v32 = vsel %vm6362_vm13, %v6393_v62, %v6394_v29  ;;  %v6397_v36 = vsel %vm6362_vm13, %v6394_v29, %v6396_v59 }
 0x45e   : > { %v6259_v28 = vpop.f32.mrb[33].mxu1  ;;  %v6440_v41 = vmul.f32 %v10544_v56, %v10510_v38  ;;  %v6492_v30 = vmax.f32 %v6476_v46, 0.0 }
 0x45f   : > { %v10547_v22 = vpop.f32.mrb[34].mxu1  ;;  %6501 = vxpose.xlu0.b32.cont [5/16] (narrow) %v6485_v40, 8  ;;  %v6438_v50 = vmul.f32 %v10510_v38, %v6259_v28  ;;  %v6490_v11 = vmax.f32 %v6474_v55, 0.0  ;;  %v6335_v40 = vunpack.c.l.bf16 %v7193_v34  ;;  %v7195_v28 = vld [vmem:[%s8452_s12 + $0x74] sm:$0x1]  ;;  %s293_s12 = sand.u32 1, %s8298_s25  }
 0x460   : > { %v6262_v2 = vpop.f32.mrb[35].mxu1  ;;  %v6337_v44 = vunpack.c.l.bf16 %v7195_v28  ;;  %v6441_v51 = vmul.f32 %v10547_v22, %v10510_v38  ;;  %s6632_s9 = sshll.u32 %s293_s12, 2  ;;  %s6531_s23 = scalar_lea.sflag [#allocation4], %s293_s12 }
 0x461   : > { %v6461_v25 = vadd.f32 %v10515_v37, %v6438_v50  ;;  %v6439_v39 = vmul.f32 %v10510_v38, %v6262_v2  ;;  %v6398_v7 = vrot.slane %v6335_v40, 1  ;;  %v6399_v2 = vrot.slane %v6336_v14, 1  ;;  %s295_s16 = scalar_lea.vmem [#allocation3], %s6632_s9  ;;  %s8234_s9 = scalar_lea.vmem %s8233_s28, 128 }
 0x462   : > { %v6401_v47 = vrot.slane %v6337_v44, 1  ;;  %v6464_v21 = vadd.f32 %v10515_v37, %v6441_v51  ;;  %s6546_s17 = sshll.u32 %s295_s16, 4  ;;  %s10587_s17 = int_to_ptr.vmem [resolvable:$true] %s6546_s17 }
 0x463   : > { %6502 = vxpose.xlu0.b32.cont [6/16] (narrow) %v6486_v5, 8  ;;  %v6462_v52 = vadd.f32 %v10515_v37, %v6439_v39  ;;  %v6477_v19 = vadd.f32 %v6461_v25, %v6395_v32  ;;  %v6463_v5 = vadd.f32 %v10515_v37, %v6440_v41  ;;  %v6400_v56 = vsel %vm6362_vm13, %v6398_v7, %v6399_v2  ;;  %s8228_s0 = scalar_lea.vmem %s10587_s17, 64  ;;  %p8235_p4 = scmp.lt.s32.totalorder %s10587_s17, %s8233_s28 }
 0x464   : > { %v6402_v45 = vsel %vm6362_vm13, %v6399_v2, %v6401_v47  ;;  %p8229_p0 = scmp.ne.s32.totalorder %s10587_s17, %s8228_s0  ;;  %p8236_p5 = scmp.lt.s32.totalorder %s8234_s9, %s8228_s0 }
 0x465   : > { %v6493_v9 = vmax.f32 %v6477_v19, 0.0  ;;  %v6478_v63 = vadd.f32 %v6462_v52, %v6397_v36  ;;  %v6479_v13 = vadd.f32 %v6463_v5, %v6400_v56  ;;  %v6480_v12 = vadd.f32 %v6464_v21, %v6402_v45 }
 0x466   : > { %p8230_p1 = pnand %p8229_p0, %p8416_p3  ;;  %p8237_p6 = por %p8236_p5, %p8235_p4 }
 0x467   : > { %6503 = vxpose.xlu0.b32.cont [7/16] (narrow) %v6487_v58, 8  ;;  %v6494_v49 = vmax.f32 %v6478_v63, 0.0  ;;  %v6495_v58 = vmax.f32 %v6479_v13, 0.0  ;;  %v6496_v38 = vmax.f32 %v6480_v12, 0.0 }
 0x468   : > { %p8231_p2 = pneg %p8230_p1 }
 0x46a   : > { %p8238_p7 = pnand %p8237_p6, %p8231_p2 }
 0x46b   : > { %6504 = vxpose.xlu0.b32.cont [8/16] (narrow) %v6488_v1, 8 }
 0x46f   : > { %6505 = vxpose.xlu0.b32.cont [9/16] (narrow) %v6489_v33, 8 }
 0x473   : > { %6506 = vxpose.xlu0.b32.cont [10/16] (narrow) %v6490_v11, 8 }
 0x477   : > { %6507 = vxpose.xlu0.b32.cont [11/16] (narrow) %v6491_v18, 8 }
 0x47b   : > { %6508 = vxpose.xlu0.b32.cont [12/16] (narrow) %v6492_v30, 8 }
 0x47f   : > { %6509 = vxpose.xlu0.b32.cont [13/16] (narrow) %v6493_v9, 8 }
 0x483   : > { %6510 = vxpose.xlu0.b32.cont [14/16] (narrow) %v6494_v49, 8 }
 0x487   : > { %6511 = vxpose.xlu0.b32.cont [15/16] (narrow) %v6495_v58, 8 }
 0x48b   : > { %6512 = vxpose.xlu0.b32.end [16/16] (narrow) %v6496_v38, 8 }
 0x4cf   : > { %v6513_v37 = vpop.trf.xlu0 }
 0x4d0   : > { %6529 = vst [vmem:[%s295_s16] sm:$0xf] %v6513_v37 }
 0x4d1   : > { %8241 = shalt.err (!%p8238_p7)
}
 0x4d2   : > { %s8242_s12 = scalar_lea.hbm %s10592_s22, 64  ;;  %s8246_s16 = scalar_lea.hbm %s10650_s7, 256 }
 0x4d3   : > { %p8243_p9 = scmp.ne.s32.totalorder %s10592_s22, %s8242_s12  ;;  %p8247_p12 = scmp.lt.u32.totalorder %s10592_s22, %s10650_s7 }
 0x4d4   : > { %p8248_p13 = scmp.lt.u32.totalorder %s8246_s16, %s8242_s12  ;;  %p8250_p1 = scmp.lt.u32.totalorder %s8242_s12, %s10592_s22 }
 0x4d5   : > { %p8244_p10 = pnand %p8243_p9, %p8416_p3 }
 0x4d6   : > { %p8249_p0 = por %p8248_p13, %p8247_p12 }
 0x4d7   : > { %p8245_p11 = pneg %p8244_p10 }
 0x4d8   : > { %p8251_p2 = por %p8250_p1, %p8249_p0 }
 0x4da   : > { %p8252_p4 = pnand %p8251_p2, %p8245_p11 }
 0x4dc   : > { %8255 = shalt.err (!%p8252_p4)
}
 0x4dd   : > { %8091 = dma.vmem_to_hbm [thread:$0]  (%p8416_p3), %s10587_s17, 64, %s10592_s22, %s6531_s23  }
 0x4de PF: > { %p8097_p5 = scmp.ge.s32.totalorder %s8322_s8, 2  ;;  %s6558_s0 = sand.u32 1, %s8294_s24  }
 0x4df   : > { %s6559_s21 = scalar_lea.sflag [#allocation4], %s6558_s0 }
 0x4e0   : > { %p8094_p6 = pnand %p8097_p5, %p8425_p8 }
 0x4e2   : > { %8289 = dma.done.wait (!%p8094_p6), %s6559_s21, 64  }
 0x4e3   : > { %8291 = vsyncadd (!%p8094_p6), %s6559_s21, 4294967232  ;;  %s20_s8 = sadd.s32 1, %s8322_s8   ;;  %s10844_s14 = sld [smem:[#allocation6_spill]] }
 0x4e4   : > { %p17_p7 = scmp.ge.s32.totalorder %s20_s8, 6   ;;  %s10845_s24 = smov %s8298_s25 }
 0x4e5   : > { %s10846_s25 = smov %s8302_s26  ;;  %s10847_s26 = smov %s8434_s19 }
 0x4e6   : > { %s10848_s27 = smov %s8314_s29  ;;  %s10849_s28 = smov %s8318_s30 }
 0x4e7   : > { %s10850_s29 = smov %s10853_s11  ;;  %19 = sbr.rel (!%p17_p7) target bundleno = 7 (0x7), region = 103 }
 0x4e9   : > { %s10851_s30 = smov %s10844_s14 }
 0x4ee   :  { %6564 = vsyncpa [#allocation4], 1 }
 0x4ef   :  { %6566 = vsyncpa [#allocation4 + $0x1], 1 }

</bundles_post_ra>
